<compile_context>
chip_gen: v5e
topology: v5e:2x2
jax: 0.10.0
libtpu: 0.0.40
codegen_flags: <defaults>
</compile_context>

<pallas_src>
import jax
import jax.numpy as jnp
from jax.experimental import pallas as pl
from jax.experimental.pallas import tpu as pltpu

# ---------------------------------------------------------------------------
# Problem sizes (consistent with the module: encoder out = 100, latent = 8)
# ---------------------------------------------------------------------------
STATE_DIM = 16       # input "state" feature dim
ENC_HID = 32         # encoder hidden
ENC_OUT = 100        # true h_enc dim (the VAE hard-codes Linear(100, 8) heads)
LATENT = 8           # VAE.latent_dim
DEC_HID = 32         # decoder hidden
DEC_OUT = 16         # reconstructed state dim

LANES = 128          # lane width; every activation / weight block is 128-wide
TB = 128             # batch tile (rows per grid step)
NPARAM = 5           # number of padded [128,128] weight blocks

# Lane layout of the packed input xin[B, 128]:
EPS_OFF = 0          # eps occupies lanes [0, 8)
X_OFF = LATENT       # x occupies lanes [8, 24)
C_IN = 127           # constant 1.0 lane of the packed input (bias carrier)

# Constant-1 carry lanes propagated through the encoder activations:
C_H1 = 126           # lane of h     that equals 1.0 (carries eb2)
C_H2 = 125           # lane of h_enc that equals 1.0 (carries mu/log_sigma bias)
C_D = 126            # lane of d     that equals 1.0 (carries db2)

# Column offset of log_sigma inside the fused head output (mu at lanes [0,8)).
# Exactly LANES/2 so pltpu.roll(heads, 64) aligns log_sigma onto the eps lanes
# regardless of rotation direction convention.
LS_COL = LANES // 2


# ---------------------------------------------------------------------------
# Pallas kernel: fused VAE forward (5 lane-dense matmuls + ReLUs + exp + reparam)
# ---------------------------------------------------------------------------
def vae_kernel(in_ref, p_ref, out_ref):
    xin = in_ref[...]                                   # [TB, 128] eps|x|...|1

    def dot(a, b):
        return jnp.dot(a, b, preferred_element_type=jnp.float32,
                       precision=jax.lax.Precision.HIGHEST)

    # encoder: relu(x @ W1 + b1) -> relu(h @ W2 + b2); biases are folded into
    # the padded weights via the constant-1 carry lane.
    h = jnp.maximum(dot(xin, p_ref[0]), 0.0)            # [TB,128], lane 126 == 1
    h_enc = jnp.maximum(dot(h, p_ref[1]), 0.0)          # [TB,128], lane 125 == 1

    # fused mu|log_sigma heads: mu at lanes [0,8), log_sigma at lanes [64,72).
    heads = dot(h_enc, p_ref[2])                        # [TB,128]

    # reparameterization: align log_sigma with eps via an XLU lane rotation,
    # then z = mu + exp(log_sigma) * eps purely elementwise.  Lane 127 of z is
    # exp(0)*1 == 1 and carries the decoder bias; junk lanes hit zero weight
    # rows and are inert.
    sigma = jnp.exp(pltpu.roll(heads, LS_COL, axis=1))
    z = heads + sigma * xin                             # [TB,128]

    # decoder: relu(z @ W3 + b3) -> z2 @ W4 + b4 (all 128-lane dense).
    d = jnp.maximum(dot(z, p_ref[3]), 0.0)              # [TB,128], lane 126 == 1
    out_ref[...] = dot(d, p_ref[4]).astype(out_ref.dtype)


def vae_forward(x, eps, packed_params):
    """x: [B, STATE_DIM] f32, eps: [B, LATENT] f32, packed_params: [5,128,128] f32."""
    b = x.shape[0]
    bp = pl.cdiv(b, TB) * TB                            # pad batch to a tile multiple

    # Pack x and eps (plus the constant-1 bias lane) into one lane-dense input.
    xin = jnp.zeros((bp, LANES), jnp.float32)
    xin = xin.at[:b, EPS_OFF:EPS_OFF + LATENT].set(eps)
    xin = xin.at[:b, X_OFF:X_OFF + STATE_DIM].set(x)
    xin = xin.at[:, C_IN].set(1.0)

    cost = pl.CostEstimate(
        flops=int(2 * bp * LANES * LANES * NPARAM),
        transcendentals=int(bp * LANES),
        bytes_accessed=int(2 * bp * LANES * 4 + NPARAM * LANES * LANES * 4),
    )

    out = pl.pallas_call(
        vae_kernel,
        out_shape=jax.ShapeDtypeStruct((bp, LANES), jnp.float32),
        grid=(bp // TB,),
        in_specs=[
            pl.BlockSpec((TB, LANES), lambda i: (i, 0)),
            # constant index_map: params DMA'd once, VMEM-resident across steps
            pl.BlockSpec((NPARAM, LANES, LANES), lambda i: (0, 0, 0)),
        ],
        out_specs=pl.BlockSpec((TB, LANES), lambda i: (i, 0)),
        compiler_params=pltpu.CompilerParams(dimension_semantics=("parallel",)),
        cost_estimate=cost,
    )(xin, packed_params)

    # lane-dense [bp,128] store in-kernel; slice to the real output host-side
    return out[:b, :DEC_OUT]


vae_forward = jax.jit(vae_forward)


# ---------------------------------------------------------------------------
# Deterministic parameter initialization + host-side packing
# ---------------------------------------------------------------------------
def init_params(key):
    def linear(key, d_in, d_out):
        kw, kb = jax.random.split(key)
        bound = 1.0 / jnp.sqrt(d_in)  # PyTorch default Linear init range
        w = jax.random.uniform(kw, (d_in, d_out), jnp.float32, -bound, bound)
        b = jax.random.uniform(kb, (1, d_out), jnp.float32, -bound, bound)
        return w, b

    keys = jax.random.split(key, 6)
    ew1, eb1 = linear(keys[0], STATE_DIM, ENC_HID)
    ew2, eb2 = linear(keys[1], ENC_HID, ENC_OUT)
    mw, mb = linear(keys[2], ENC_OUT, LATENT)
    lw, lb = linear(keys[3], ENC_OUT, LATENT)
    dw1, db1 = linear(keys[4], LATENT, DEC_HID)
    dw2, db2 = linear(keys[5], DEC_HID, DEC_OUT)
    return dict(ew1=ew1, eb1=eb1, ew2=ew2, eb2=eb2,
                mw=mw, mb=mb, lw=lw, lb=lb,
                dw1=dw1, db1=db1, dw2=dw2, db2=db2)


def pack_params(p):
    """Pack all weights+biases into one [5, 128, 128] f32 buffer.

    Each layer's weight is zero-padded to [128, 128]; its bias lives in the row
    addressed by the constant-1 lane of that layer's input, and a 1.0 entry
    forwards the constant lane to the next activation.  Zero padding is
    mathematically inert (padded/junk lanes always hit zero weight rows).
    """
    def blk():
        return jnp.zeros((LANES, LANES), jnp.float32)

    # encoder layer 1: x from lanes [8,24); bias from input lane 127; carry->126
    w1 = blk()
    w1 = w1.at[X_OFF:X_OFF + STATE_DIM, 0:ENC_HID].set(p["ew1"])
    w1 = w1.at[C_IN, 0:ENC_HID].set(p["eb1"][0])
    w1 = w1.at[C_IN, C_H1].set(1.0)

    # encoder layer 2: bias from h lane 126; carry->125
    w2 = blk()
    w2 = w2.at[0:ENC_HID, 0:ENC_OUT].set(p["ew2"])
    w2 = w2.at[C_H1, 0:ENC_OUT].set(p["eb2"][0])
    w2 = w2.at[C_H1, C_H2].set(1.0)

    # fused latent heads: mu -> lanes [0,8), log_sigma -> lanes [64,72);
    # biases from h_enc lane 125 (no carry needed: z reuses the input 1-lane).
    wh = blk()
    wh = wh.at[0:ENC_OUT, 0:LATENT].set(p["mw"])
    wh = wh.at[0:ENC_OUT, LS_COL:LS_COL + LATENT].set(p["lw"])
    wh = wh.at[C_H2, 0:LATENT].set(p["mb"][0])
    wh = wh.at[C_H2, LS_COL:LS_COL + LATENT].set(p["lb"][0])

    # decoder layer 1: z real lanes [0,8); bias from z lane 127 (== 1); carry->126
    w3 = blk()
    w3 = w3.at[0:LATENT, 0:DEC_HID].set(p["dw1"])
    w3 = w3.at[C_IN, 0:DEC_HID].set(p["db1"][0])
    w3 = w3.at[C_IN, C_D].set(1.0)

    # decoder layer 2 (no activation): bias from d lane 126
    w4 = blk()
    w4 = w4.at[0:DEC_HID, 0:DEC_OUT].set(p["dw2"])
    w4 = w4.at[C_D, 0:DEC_OUT].set(p["db2"][0])

    return jnp.stack([w1, w2, wh, w3, w4])              # [5, 128, 128]


def vae_forward_ref(x, eps, p):
    """Pure-JAX reference (unpadded, unpacked) for correctness checking."""
    hp = jax.lax.Precision.HIGHEST
    h = jnp.maximum(jnp.dot(x, p["ew1"], precision=hp) + p["eb1"], 0.0)
    h_enc = jnp.maximum(jnp.dot(h, p["ew2"], precision=hp) + p["eb2"], 0.0)
    mu = jnp.dot(h_enc, p["mw"], precision=hp) + p["mb"]
    sigma = jnp.exp(jnp.dot(h_enc, p["lw"], precision=hp) + p["lb"])
    z = mu + sigma * eps
    d = jnp.maximum(jnp.dot(z, p["dw1"], precision=hp) + p["db1"], 0.0)
    return jnp.dot(d, p["dw2"], precision=hp) + p["db2"]


if __name__ == "__main__":
    key = jax.random.PRNGKey(0)
    k_param, k_x, k_eps = jax.random.split(key, 3)

    params = init_params(k_param)
    packed = pack_params(params)

    # Batch large enough to exercise the grid (4 tiles of 128 rows).
    B = 512
    x = jax.random.normal(k_x, (B, STATE_DIM), jnp.float32)
    # std_z ~ N(0,1): the torch module draws it with np.random; here we draw it
    # deterministically with JAX and feed it to the kernel packed next to x.
    eps = jax.random.normal(k_eps, (B, LATENT), jnp.float32)

    out = jax.block_until_ready(vae_forward(x, eps, packed))

    ref = vae_forward_ref(x, eps, params)
    assert out.shape == (B, DEC_OUT)
    assert jnp.allclose(out, ref, atol=1e-3, rtol=1e-3), "mismatch vs JAX reference"

    print("KERNEL_OK")
</pallas_src>

<mosaic_0001>
module attributes {stable_mosaic.version = 11 : i64} {
  func.func @vae_kernel(%arg0: i32, %arg1: memref<128x128xf32, #tpu.memory_space<vmem>>, %arg2: memref<5x128x128xf32, #tpu.memory_space<vmem>>, %arg3: memref<128x128xf32, #tpu.memory_space<vmem>>) attributes {dimension_semantics = [#tpu.dimension_semantics<parallel>], iteration_bounds = array<i64: 4>, scalar_prefetch = 0 : i64, scratch_operands = 0 : i64, tpu.core_type = #tpu.core_type<tc>, window_params = [{transform_indices = @transform_0, window_bounds = array<i64: 128, 128>}, {pipeline_mode = #tpu.pipeline_mode<synchronous>, transform_indices = @transform_1, window_bounds = array<i64: 5, 128, 128>}, {transform_indices = @transform_2, window_bounds = array<i64: 128, 128>}]} {
    %c0 = arith.constant 0 : index
    %c0_0 = arith.constant 0 : index
    %0 = vector.load %arg1[%c0, %c0_0] : memref<128x128xf32, #tpu.memory_space<vmem>>, vector<128x128xf32>
    %c0_1 = arith.constant 0 : index
    %c0_2 = arith.constant 0 : index
    %c0_3 = arith.constant 0 : index
    %1 = vector.load %arg2[%c0_1, %c0_2, %c0_3] : memref<5x128x128xf32, #tpu.memory_space<vmem>>, vector<1x128x128xf32>
    %2 = vector.shape_cast %1 : vector<1x128x128xf32> to vector<128x128xf32>
    %cst = arith.constant dense<0.000000e+00> : vector<128x128xf32>
    %3 = tpu.matmul %0, %2, %cst {dimension_numbers = #tpu.dot_dimension_numbers<[1], [0], [0], [1], [0, 0, 1, 1], [], []>, precision = #tpu.contract_precision<fp32>} : vector<128x128xf32>, vector<128x128xf32>, vector<128x128xf32> -> vector<128x128xf32>
    %cst_4 = arith.constant 0.000000e+00 : f32
    %4 = vector.broadcast %cst_4 : f32 to vector<128x128xf32>
    %5 = arith.maximumf %3, %4 : vector<128x128xf32>
    %c1 = arith.constant 1 : index
    %c0_5 = arith.constant 0 : index
    %c0_6 = arith.constant 0 : index
    %6 = vector.load %arg2[%c1, %c0_5, %c0_6] : memref<5x128x128xf32, #tpu.memory_space<vmem>>, vector<1x128x128xf32>
    %7 = vector.shape_cast %6 : vector<1x128x128xf32> to vector<128x128xf32>
    %cst_7 = arith.constant dense<0.000000e+00> : vector<128x128xf32>
    %8 = tpu.matmul %5, %7, %cst_7 {dimension_numbers = #tpu.dot_dimension_numbers<[1], [0], [0], [1], [0, 0, 1, 1], [], []>, precision = #tpu.contract_precision<fp32>} : vector<128x128xf32>, vector<128x128xf32>, vector<128x128xf32> -> vector<128x128xf32>
    %cst_8 = arith.constant 0.000000e+00 : f32
    %9 = vector.broadcast %cst_8 : f32 to vector<128x128xf32>
    %10 = arith.maximumf %8, %9 : vector<128x128xf32>
    %c2 = arith.constant 2 : index
    %c0_9 = arith.constant 0 : index
    %c0_10 = arith.constant 0 : index
    %11 = vector.load %arg2[%c2, %c0_9, %c0_10] : memref<5x128x128xf32, #tpu.memory_space<vmem>>, vector<1x128x128xf32>
    %12 = vector.shape_cast %11 : vector<1x128x128xf32> to vector<128x128xf32>
    %cst_11 = arith.constant dense<0.000000e+00> : vector<128x128xf32>
    %13 = tpu.matmul %10, %12, %cst_11 {dimension_numbers = #tpu.dot_dimension_numbers<[1], [0], [0], [1], [0, 0, 1, 1], [], []>, precision = #tpu.contract_precision<fp32>} : vector<128x128xf32>, vector<128x128xf32>, vector<128x128xf32> -> vector<128x128xf32>
    %c64_i32 = arith.constant 64 : i32
    %14 = tpu.dynamic_rotate %13 by %c64_i32 dim 1 : vector<128x128xf32>, i32 -> vector<128x128xf32>
    %15 = math.exp %14 : vector<128x128xf32>
    %16 = arith.mulf %15, %0 : vector<128x128xf32>
    %17 = arith.addf %13, %16 : vector<128x128xf32>
    %c3 = arith.constant 3 : index
    %c0_12 = arith.constant 0 : index
    %c0_13 = arith.constant 0 : index
    %18 = vector.load %arg2[%c3, %c0_12, %c0_13] : memref<5x128x128xf32, #tpu.memory_space<vmem>>, vector<1x128x128xf32>
    %19 = vector.shape_cast %18 : vector<1x128x128xf32> to vector<128x128xf32>
    %cst_14 = arith.constant dense<0.000000e+00> : vector<128x128xf32>
    %20 = tpu.matmul %17, %19, %cst_14 {dimension_numbers = #tpu.dot_dimension_numbers<[1], [0], [0], [1], [0, 0, 1, 1], [], []>, precision = #tpu.contract_precision<fp32>} : vector<128x128xf32>, vector<128x128xf32>, vector<128x128xf32> -> vector<128x128xf32>
    %cst_15 = arith.constant 0.000000e+00 : f32
    %21 = vector.broadcast %cst_15 : f32 to vector<128x128xf32>
    %22 = arith.maximumf %20, %21 : vector<128x128xf32>
    %c4 = arith.constant 4 : index
    %c0_16 = arith.constant 0 : index
    %c0_17 = arith.constant 0 : index
    %23 = vector.load %arg2[%c4, %c0_16, %c0_17] : memref<5x128x128xf32, #tpu.memory_space<vmem>>, vector<1x128x128xf32>
    %24 = vector.shape_cast %23 : vector<1x128x128xf32> to vector<128x128xf32>
    %cst_18 = arith.constant dense<0.000000e+00> : vector<128x128xf32>
    %25 = tpu.matmul %22, %24, %cst_18 {dimension_numbers = #tpu.dot_dimension_numbers<[1], [0], [0], [1], [0, 0, 1, 1], [], []>, precision = #tpu.contract_precision<fp32>} : vector<128x128xf32>, vector<128x128xf32>, vector<128x128xf32> -> vector<128x128xf32>
    %c0_19 = arith.constant 0 : index
    %c0_20 = arith.constant 0 : index
    %26 = vector.load %arg3[%c0_19, %c0_20] : memref<128x128xf32, #tpu.memory_space<vmem>>, vector<128x128xf32>
    tpu.vector_store %arg3[%c0_19, %c0_20], %25 {strides = array<i32>} : memref<128x128xf32, #tpu.memory_space<vmem>>, vector<128x128xf32>,
    return
  }
  func.func @transform_0(%arg0: i32) -> (i32, i32) {
    %c0_i32 = arith.constant 0 : i32
    %c0_i32_0 = arith.constant 0 : i32
    return %arg0, %c0_i32 : i32, i32
  }
  func.func @transform_1(%arg0: i32) -> (i32, i32, i32) {
    %c0_i32 = arith.constant 0 : i32
    %c0_i32_0 = arith.constant 0 : i32
    %c0_i32_1 = arith.constant 0 : i32
    %c0_i32_2 = arith.constant 0 : i32
    return %c0_i32, %c0_i32_0, %c0_i32_1 : i32, i32, i32
  }
  func.func @transform_2(%arg0: i32) -> (i32, i32) {
    %c0_i32 = arith.constant 0 : i32
    %c0_i32_0 = arith.constant 0 : i32
    return %arg0, %c0_i32 : i32, i32
  }
}

</mosaic_0001>

<bundles_post_ra>
// kernel: vae_forward.1
= control target key start
LH: loop header
LB: loop body
LE: loop exit
PB: predicated region body
PF: predicated region fallthrough
CT: control target
= control target key end

     0   :  { %s4681_s9 = smov 0   ;;  %s7310_s0 = inlined_call_operand.vmem [shape: f32[512,128], index: 0, kind: input, shape index: {}]   ;;  %s7311_s1 = inlined_call_operand.vmem [shape: f32[5,128,128], index: 1, kind: input, shape index: {}]   ;;  %s7312_s2 = inlined_call_operand.vmem [shape: f32[512,128], index: 2, kind: output, shape index: {}]  }
   0x1 LB: > { %s4493_s10 = sadd.s32 4294967295, %s4663_s9   ;;  %p4497_p0 = scmp.ge.s32.totalorder %s4663_s9, 1  ;;  %s4663_s9 = sphi %s4681_s9, %s12_s9  }
   0x2   : > { %p113_p1 = scmp.lt.s32.totalorder %s4663_s9, 5 }
   0x4   : > { %p114_p2 = pnand %p4497_p0, %p113_p1 }
   0x6   : > { %117 = sbr.rel (%p114_p2) target bundleno = 1594 (0x63a), region = 28 }
   0xb   : > { %v178_v0 = vld [vmem:[%s7311_s1 + $0x78] sm:$0xff]  ;;  %v177_v1 = vld [vmem:[%s7311_s1 + $0x70] sm:$0xff]  ;;  %v176_v2 = vld [vmem:[%s7311_s1 + $0x68] sm:$0xff]  ;;  %s4498_s17 = sshll.u32 %s4493_s10, 4  ;;  %s4665_s20 = smov 64  }
   0xc   : > { %v4698_v3 = vand.u32 4294901760, %v178_v0  ;;  %v4700_v4 = vand.u32 4294901760, %v177_v1  ;;  %v4702_v5 = vand.u32 4294901760, %v176_v2  ;;  %v175_v6 = vld [vmem:[%s7311_s1 + $0x60] sm:$0xff]  ;;  %v174_v7 = vld [vmem:[%s7311_s1 + $0x58] sm:$0xff]  ;;  %v173_v8 = vld [vmem:[%s7311_s1 + $0x50] sm:$0xff] }
   0xd   : > { %v4713_v9 = vand.u32 4294901760, %v175_v6  ;;  %v4715_v10 = vand.u32 4294901760, %v174_v7  ;;  %v4717_v11 = vand.u32 4294901760, %v173_v8  ;;  %v172_v12 = vld [vmem:[%s7311_s1 + $0x48] sm:$0xff]  ;;  %v171_v13 = vld [vmem:[%s7311_s1 + $0x40] sm:$0xff]  ;;  %v170_v17 = vld [vmem:[%s7311_s1 + $0x38] sm:$0xff] }
   0xe   : > { %4568 = vmatpush.msra.mxu2 %v4698_v3  ;;  %v4727_v14 = vsub.f32 %v178_v0, %v4698_v3  ;;  %v4730_v15 = vsub.f32 %v177_v1, %v4700_v4  ;;  %v4733_v16 = vsub.f32 %v176_v2, %v4702_v5  ;;  %180 = vmatpush.msra.mxu0 %v4698_v3  ;;  %p136_p3 = scmp.lt.s32.totalorder %s4498_s17, 63  ;;  %v4739_v18 = vand.u32 4294901760, %v172_v12  ;;  %v169_v25 = vld [vmem:[%s7311_s1 + $0x30] sm:$0xff]  ;;  %v168_v33 = vld [vmem:[%s7311_s1 + $0x28] sm:$0xff]  ;;  %v167_v42 = vld [vmem:[%s7311_s1 + $0x20] sm:$0xff] }
   0xf   : > { %v4742_v19 = vsub.f32 %v175_v6, %v4713_v9  ;;  %v4745_v20 = vsub.f32 %v174_v7, %v4715_v10  ;;  %v4751_v24 = vand.u32 4294901760, %v171_v13  ;;  %v4760_v27 = vand.u32 4294901760, %v170_v17  ;;  %v166_v49 = vld [vmem:[%s7311_s1 + $0x18] sm:$0xff]  ;;  %v165_v55 = vld [vmem:[%s7311_s1 + $0x10] sm:$0xff]  ;;  %v164_v62 = vld [vmem:[%s7311_s1 + $0x8] sm:$0xff] }
  0x10   : > { %4569 = vmatpush.msra.mxu2 %v4700_v4  ;;  %v342_v21 = vand.u32 4294901760, %v4727_v14  ;;  %v348_v22 = vand.u32 4294901760, %v4730_v15  ;;  %v354_v23 = vand.u32 4294901760, %v4733_v16  ;;  %182 = vmatpush.msra.mxu0 %v4700_v4  ;;  %s7480_s17 = smov (!%p136_p3, %s4498_s17), 63  ;;  %v4763_v28 = vsub.f32 %v173_v8, %v4717_v11  ;;  %v163_v2 = vld [vmem:[%s7311_s1] sm:$0xff] }
  0x11   : > { %v360_v26 = vand.u32 4294901760, %v4742_v19  ;;  %v366_v32 = vand.u32 4294901760, %v4745_v20  ;;  %s4499_s6 = sshll.u32 %s7480_s17, 3  ;;  %v4784_v35 = vand.u32 4294901760, %v169_v25  ;;  %v4787_v36 = vsub.f32 %v172_v12, %v4739_v18 }
  0x12   : > { %4570 = vmatpush.msra.mxu2 %v4702_v5  ;;  %v343_v29 = vsub.f32 %v4727_v14, %v342_v21  ;;  %v349_v30 = vsub.f32 %v4730_v15, %v348_v22  ;;  %v355_v31 = vsub.f32 %v4733_v16, %v354_v23  ;;  %184 = vmatpush.msra.mxu0 %v4702_v5  ;;  %s4794_s10 = scalar_lea.vmem %s7310_s0, %s4499_s6  ;;  %v7324_v39 = vand.u32 4294901760, %v4763_v28  ;;  %s7269_s3 = scalar_lea.vmem %s7312_s2, %s4499_s6 }
  0x13   : > { %v361_v34 = vsub.f32 %v4742_v19, %v360_v26  ;;  %v4800_v40 = vsub.f32 %v171_v13, %v4751_v24  ;;  %v4802_v41 = vand.u32 4294901760, %v168_v33  ;;  %v367_v44 = vsub.f32 %v4745_v20, %v366_v32  ;;  %v155_v47 = vld [vmem:[%s4794_s10 + $0x40] sm:$0xff] }
  0x14   : > { %4571 = vmatpush.msra.mxu2 %v4713_v9  ;;  %v344_v37 = vand.u32 4294901760, %v343_v29  ;;  %v350_v38 = vand.u32 4294901760, %v349_v30  ;;  %186 = vmatpush.msra.mxu0 %v4713_v9  ;;  %v356_v43 = vand.u32 4294901760, %v355_v31  ;;  %v7323_v45 = vand.u32 4294901760, %v4787_v36  ;;  %v147_v12 = vld [vmem:[%s4794_s10] sm:$0xff]  ;;  %v156_v30 = vld [vmem:[%s4794_s10 + $0x48] sm:$0xff] }
  0x15   : > { %v4813_v46 = vsub.f32 %v170_v17, %v4760_v27  ;;  %v7321_v48 = vand.u32 4294901760, %v4800_v40  ;;  %v362_v50 = vand.u32 4294901760, %v361_v34  ;;  %v373_v51 = vsub.f32 %v4763_v28, %v7324_v39 }
  0x16   : > { %4572 = vmatpush.msra.mxu2 %v4715_v10  ;;  %4584 = vmatpush.msra.mxu3 %v344_v37  ;;  %v4825_v52 = vand.u32 4294901760, %v167_v42  ;;  %v4828_v53 = vsub.f32 %v169_v25, %v4784_v35  ;;  %v4835_v56 = vand.u32 4294901760, %v155_v47  ;;  %v368_v57 = vand.u32 4294901760, %v367_v44 }
  0x17   : > { %345 = vmatpush.msra.mxu1 %v344_v37  ;;  %188 = vmatpush.msra.mxu0 %v4715_v10  ;;  %v7317_v54 = vand.u32 4294901760, %v4813_v46  ;;  %v379_v58 = vsub.f32 %v4787_v36, %v7323_v45  ;;  %v4841_v59 = vand.u32 4294901760, %v166_v49  ;;  %v4844_v60 = vsub.f32 %v168_v33, %v4802_v41  ;;  %v158_v45 = vld [vmem:[%s4794_s10 + $0x58] sm:$0xff] }
  0x18   : > { %4573 = vmatpush.msra.mxu2 %v4717_v11  ;;  %4585 = vmatpush.msra.mxu3 %v350_v38  ;;  %v385_v61 = vsub.f32 %v4800_v40, %v7321_v48  ;;  %v374_v63 = vand.u32 4294901760, %v373_v51  ;;  %v4854_v0 = vand.u32 4294901760, %v165_v55  ;;  %v7316_v1 = vand.u32 4294901760, %v4828_v53 }
  0x19   : > { %351 = vmatpush.msra.mxu1 %v350_v38  ;;  %190 = vmatpush.msra.mxu0 %v4717_v11  ;;  %v4861_v6 = vsub.f32 %v167_v42, %v4825_v52  ;;  %v391_v7 = vsub.f32 %v4813_v46, %v7317_v54  ;;  %v4868_v8 = vsub.f32 %v155_v47, %v4835_v56  ;;  %v380_v13 = vand.u32 4294901760, %v379_v58 }
  0x1a   : > { %4574 = vmatpush.msra.mxu2 %v4739_v18  ;;  %4586 = vmatpush.msra.mxu3 %v356_v43  ;;  %v4872_v17 = vand.u32 4294901760, %v164_v62  ;;  %v7313_v25 = vand.u32 4294901760, %v4844_v60  ;;  %v4876_v29 = vsub.f32 %v166_v49, %v4841_v59  ;;  %v386_v31 = vand.u32 4294901760, %v385_v61 }
  0x1b   : > { %357 = vmatpush.msra.mxu1 %v356_v43  ;;  %192 = vmatpush.msra.mxu0 %v4739_v18  ;;  %v4879_v33 = vand.u32 4294901760, %v163_v2  ;;  %v397_v34 = vsub.f32 %v4828_v53, %v7316_v1  ;;  %v7315_v37 = vand.u32 4294901760, %v4861_v6  ;;  %v4888_v38 = vsub.f32 %v165_v55, %v4854_v0 }
  0x1c   : > { %4575 = vmatpush.msra.mxu2 %v4751_v24  ;;  %4587 = vmatpush.msra.mxu3 %v362_v50  ;;  %v4890_v42 = vand.u32 4294901760, %v147_v12  ;;  %v392_v43 = vand.u32 4294901760, %v391_v7  ;;  %v7314_v44 = vand.u32 4294901760, %v4868_v8  ;;  %v4894_v47 = vand.u32 4294901760, %v156_v30 }
  0x1d   : > { %363 = vmatpush.msra.mxu1 %v362_v50  ;;  %194 = vmatpush.msra.mxu0 %v4751_v24  ;;  %v403_v49 = vsub.f32 %v4844_v60, %v7313_v25  ;;  %v7318_v50 = vand.u32 4294901760, %v4876_v29  ;;  %v4902_v51 = vsub.f32 %v164_v62, %v4872_v17  ;;  %v398_v58 = vand.u32 4294901760, %v397_v34  ;;  %v157_v34 = vld [vmem:[%s4794_s10 + $0x50] sm:$0xff] }
  0x1e   : > { %4576 = vmatpush.msra.mxu2 %v4760_v27  ;;  %4588 = vmatpush.msra.mxu3 %v368_v57  ;;  %v4905_v55 = vsub.f32 %v147_v12, %v4890_v42  ;;  %v409_v61 = vsub.f32 %v4861_v6, %v7315_v37  ;;  %v4915_v62 = vsub.f32 %v163_v2, %v4879_v33  ;;  %v4939_v1 = vand.u32 4294901760, %v157_v34 }
  0x1f   : > { %369 = vmatpush.msra.mxu1 %v368_v57  ;;  %196 = vmatpush.msra.mxu0 %v4760_v27  ;;  %v148_v57 = vld [vmem:[%s4794_s10 + $0x8] sm:$0xff]  ;;  %v278_v7 = vsub.f32 %v4868_v8, %v7314_v44  ;;  %v4922_v12 = vsub.f32 %v156_v30, %v4894_v47  ;;  %v404_v2 = vand.u32 4294901760, %v403_v49  ;;  %v7322_v44 = vand.u32 4294901760, %v4902_v51 }
  0x20   : > { %4577 = vmatpush.msra.mxu2 %v4784_v35  ;;  %4589 = vmatpush.msra.mxu3 %v374_v63  ;;  %v4926_v25 = vand.u32 4294901760, %v148_v57  ;;  %v410_v30 = vand.u32 4294901760, %v409_v61  ;;  %v432_v49 = vand.u32 4294901760, %v4915_v62  ;;  %v4960_v48 = vsub.f32 %v157_v34, %v4939_v1 }
  0x21   : > { %375 = vmatpush.msra.mxu1 %v374_v63  ;;  %198 = vmatpush.msra.mxu0 %v4784_v35  ;;  %v7319_v63 = vand.u32 4294901760, %v4888_v38  ;;  %v279_v54 = vand.u32 4294901760, %v278_v7  ;;  %v149_v7 = vld [vmem:[%s4794_s10 + $0x10] sm:$0xff]  ;;  %v4972_v34 = vand.u32 4294901760, %v158_v45 }
  0x22   : > { %4578 = vmatpush.msra.mxu2 %v4802_v41  ;;  %4590 = vmatpush.msra.mxu3 %v380_v13  ;;  %v4947_v61 = vsub.f32 %v148_v57, %v4926_v25  ;;  %v433_v57 = vsub.f32 %v4915_v62, %v432_v49  ;;  %v4967_v39 = vand.u32 4294901760, %v149_v7 }
  0x23   : > { %381 = vmatpush.msra.mxu1 %v380_v13  ;;  %200 = vmatpush.msra.mxu0 %v4802_v41  ;;  %v7320_v13 = vand.u32 4294901760, %v4905_v55  ;;  %v421_v37 = vsub.f32 %v4888_v38, %v7319_v63 }
  0x24   : > { %4579 = vmatpush.msra.mxu2 %v4825_v52  ;;  %4591 = vmatpush.msra.mxu3 %v386_v31 }
  0x25   : > { %387 = vmatpush.msra.mxu1 %v386_v31  ;;  %202 = vmatpush.msra.mxu0 %v4825_v52  ;;  %v415_v31 = vsub.f32 %v4876_v29, %v7318_v50  ;;  %v7325_v50 = vand.u32 4294901760, %v4922_v12 }
  0x26   : > { %4580 = vmatpush.msra.mxu2 %v4841_v59  ;;  %4592 = vmatpush.msra.mxu3 %v392_v43 }
  0x27   : > { %393 = vmatpush.msra.mxu1 %v392_v43  ;;  %204 = vmatpush.msra.mxu0 %v4841_v59  ;;  %v214_v43 = vsub.f32 %v4905_v55, %v7320_v13  ;;  %v416_v63 = vand.u32 4294901760, %v415_v31  ;;  %v422_v13 = vand.u32 4294901760, %v421_v37  ;;  %v286_v31 = vsub.f32 %v4922_v12, %v7325_v50 }
  0x28   : > { %4581 = vmatpush.msra.mxu2 %v4854_v0  ;;  %4593 = vmatpush.msra.mxu3 %v398_v58 }
  0x29   : > { %399 = vmatpush.msra.mxu1 %v398_v58  ;;  %206 = vmatpush.msra.mxu0 %v4854_v0  ;;  %v427_v58 = vsub.f32 %v4902_v51, %v7322_v44  ;;  %v221_v44 = vand.u32 4294901760, %v4947_v61 }
  0x2a   : > { %4582 = vmatpush.msra.mxu2 %v4872_v17  ;;  %4594 = vmatpush.msra.mxu3 %v404_v2 }
  0x2b   : > { %405 = vmatpush.msra.mxu1 %v404_v2  ;;  %208 = vmatpush.msra.mxu0 %v4872_v17  ;;  %v215_v2 = vand.u32 4294901760, %v214_v43  ;;  %v428_v37 = vand.u32 4294901760, %v427_v58  ;;  %v293_v43 = vand.u32 4294901760, %v4960_v48  ;;  %v222_v58 = vsub.f32 %v4947_v61, %v221_v44 }
  0x2c   : > { %4583 = vmatpush.msra.mxu2 %v4879_v33  ;;  %4595 = vmatpush.msra.mxu3 %v410_v30 }
  0x2d   : > { %280 = vmatmul.f32.vlgmr.msra.gmra.mxu2 %v279_v54  ;;  %411 = vmatpush.msra.mxu1 %v410_v30  ;;  %v434_v54 = vand.u32 4294901760, %v433_v57  ;;  %v287_v30 = vand.u32 4294901760, %v286_v31  ;;  %v150_v57 = vld [vmem:[%s4794_s10 + $0x18] sm:$0xff]  ;;  %v223_v31 = vand.u32 4294901760, %v222_v58 }
  0x2e   : > { %4596 = vmatpush.msra.mxu3 %v416_v63  ;;  %503 = vmatpush.msrb.mxu2 %v4727_v14  ;;  %v4995_v50 = vand.u32 4294901760, %v150_v57 }
  0x2f   : > { %417 = vmatpush.msra.mxu1 %v416_v63  ;;  %210 = vmatpush.msra.mxu0 %v4879_v33  ;;  %v4979_v63 = vsub.f32 %v149_v7, %v4967_v39  ;;  %v294_v7 = vsub.f32 %v4960_v48, %v293_v43 }
  0x30   : > { %4597 = vmatpush.msra.mxu3 %v422_v13  ;;  %506 = vmatpush.msrb.mxu2 %v4730_v15 }
  0x31   : > { %423 = vmatpush.msra.mxu1 %v422_v13  ;;  %216 = vmatmul.f32.vlgmr.msra.gmra.mxu0 %v215_v2  ;;  %v4987_v13 = vsub.f32 %v158_v45, %v4972_v34  ;;  %v229_v2 = vand.u32 4294901760, %v4979_v63 }
  0x32   : > { %4598 = vmatpush.msra.mxu3 %v428_v37  ;;  %509 = vmatpush.msrb.mxu2 %v4733_v16 }
  0x33   : > { %429 = vmatpush.msra.mxu1 %v428_v37  ;;  %762 = vmatpush.msrb.mxu0 %v342_v21  ;;  %v159_v37 = vld [vmem:[%s4794_s10 + $0x60] sm:$0xff]  ;;  %v295_v21 = vand.u32 4294901760, %v294_v7  ;;  %v301_v45 = vand.u32 4294901760, %v4987_v13 }
  0x34   : > { %4599 = vmatpush.msra.mxu3 %v434_v54  ;;  %512 = vmatpush.msrb.mxu2 %v4742_v19  ;;  %v5003_v14 = vand.u32 4294901760, %v159_v37 }
  0x35   : > { %288 = vmatmul.f32.gmra.mxu2 %v287_v30  ;;  %469 = vmatmul.f32.vlgmr.msra.gmra.mxu3 %v4835_v56  ;;  %v5011_v30 = vsub.f32 %v150_v57, %v4995_v50 }
  0x36   : > { %631 = vmatpush.msrb.mxu3 %v4698_v3  ;;  %435 = vmatpush.msra.mxu1 %v434_v54  ;;  %v230_v54 = vsub.f32 %v4979_v63, %v229_v2  ;;  %v5022_v15 = vsub.f32 %v159_v37, %v5003_v14  ;;  %v7383_v37 = vand.u32 4294901760, %v4763_v28 }
  0x37   : > { %437 = vmatmul.f32.vlgmr.msra.gmra.mxu1 %v4890_v42  ;;  %766 = vmatpush.msrb.mxu0 %v348_v22  ;;  %v237_v16 = vand.u32 4294901760, %v5011_v30 }
  0x38   : > { %633 = vmatpush.msrb.mxu3 %v4700_v4  ;;  %889 = vmatpush.msrb.mxu1 %v4698_v3  ;;  %v151_v3 = vld [vmem:[%s4794_s10 + $0x20] sm:$0xff]  ;;  %v231_v22 = vand.u32 4294901760, %v230_v54  ;;  %v309_v58 = vand.u32 4294901760, %v5022_v15 }
  0x39   : > { %515 = vmatpush.msrb.mxu2 %v4745_v20  ;;  %224 = vmatmul.f32.gmra.mxu0 %v223_v31  ;;  %v238_v19 = vsub.f32 %v5011_v30, %v237_v16 }
  0x3a   : > { %635 = vmatpush.msrb.mxu3 %v4702_v5  ;;  %891 = vmatpush.msrb.mxu1 %v4700_v4  ;;  %v302_v4 = vsub.f32 %v4987_v13, %v301_v45  ;;  %v310_v31 = vsub.f32 %v5022_v15, %v309_v58 }
  0x3b   : > { %770 = vmatpush.msrb.mxu0 %v354_v23  ;;  %518 = vmatpush.msrb.mxu2 %v4763_v28  ;;  %v5029_v23 = vand.u32 4294901760, %v151_v3  ;;  %v7384_v28 = vand.u32 4294901760, %v4787_v36 }
  0x3c   : > { %637 = vmatpush.msrb.mxu3 %v4713_v9  ;;  %893 = vmatpush.msrb.mxu1 %v4702_v5  ;;  %v160_v5 = vld [vmem:[%s4794_s10 + $0x68] sm:$0xff]  ;;  %v303_v57 = vand.u32 4294901760, %v302_v4  ;;  %v311_v4 = vand.u32 4294901760, %v310_v31 }
  0x3d   : > { %296 = vmatmul.f32.gmra.mxu2 %v295_v21  ;;  %473 = vmatmul.f32.gmra.mxu3 %v4894_v47  ;;  %v5047_v7 = vsub.f32 %v151_v3, %v5029_v23  ;;  %v239_v21 = vand.u32 4294901760, %v238_v19  ;;  %v7386_v19 = vand.u32 4294901760, %v4813_v46 }
  0x3e   : > { %639 = vmatpush.msrb.mxu3 %v4715_v10  ;;  %774 = vmatpush.msrb.mxu0 %v360_v26  ;;  %v5044_v26 = vand.u32 4294901760, %v160_v5 }
  0x3f   : > { %441 = vmatmul.f32.gmra.mxu1 %v4926_v25  ;;  %521 = vmatpush.msrb.mxu2 %v4787_v36  ;;  %v7385_v36 = vand.u32 4294901760, %v4800_v40 }
  0x40   : > { %641 = vmatpush.msrb.mxu3 %v4717_v11  ;;  %895 = vmatpush.msrb.mxu1 %v4713_v9  ;;  %v152_v9 = vld [vmem:[%s4794_s10 + $0x28] sm:$0xff]  ;;  %v5063_v20 = vsub.f32 %v160_v5, %v5044_v26 }
  0x41   : > { %232 = vmatmul.f32.gmra.mxu0 %v231_v22  ;;  %524 = vmatpush.msrb.mxu2 %v4800_v40  ;;  %v5067_v54 = vand.u32 4294901760, %v152_v9 }
  0x42   : > { %643 = vmatpush.msrb.mxu3 %v4739_v18  ;;  %778 = vmatpush.msrb.mxu0 %v366_v32  ;;  %v161_v32 = vld [vmem:[%s4794_s10 + $0x70] sm:$0xff]  ;;  %v7340_v22 = vand.u32 4294901760, %v5063_v20 }
  0x43   : > { %897 = vmatpush.msrb.mxu1 %v4715_v10  ;;  %527 = vmatpush.msrb.mxu2 %v4813_v46  ;;  %v245_v10 = vand.u32 4294901760, %v5047_v7  ;;  %v5076_v3 = vand.u32 4294901760, %v161_v32  ;;  %v5084_v5 = vsub.f32 %v152_v9, %v5067_v54  ;;  %v162_v46 = vld [vmem:[%s4794_s10 + $0x78] sm:$0xff] }
  0x44   : > { %645 = vmatpush.msrb.mxu3 %v4751_v24  ;;  %782 = vmatpush.msrb.mxu0 %v7383_v37  ;;  %v318_v40 = vsub.f32 %v5063_v20, %v7340_v22  ;;  %v7387_v37 = vand.u32 4294901760, %v4828_v53 }
  0x45   : > { %304 = vmatmul.f32.gmra.mxu2 %v303_v57  ;;  %477 = vmatmul.f32.gmra.mxu3 %v4939_v1  ;;  %v5093_v57 = vsub.f32 %v161_v32, %v5076_v3 }
  0x46   : > { %899 = vmatpush.msrb.mxu1 %v4717_v11  ;;  %647 = vmatpush.msrb.mxu3 %v4760_v27  ;;  %v246_v11 = vsub.f32 %v5047_v7, %v245_v10  ;;  %v319_v32 = vand.u32 4294901760, %v318_v40 }
  0x47   : > { %445 = vmatmul.f32.gmra.mxu1 %v4967_v39  ;;  %786 = vmatpush.msrb.mxu0 %v7384_v28  ;;  %v5117_v28 = vand.u32 4294901760, %v162_v46 }
  0x48   : > { %530 = vmatpush.msrb.mxu2 %v4828_v53  ;;  %901 = vmatpush.msrb.mxu1 %v4739_v18  ;;  %v153_v18 = vld [vmem:[%s4794_s10 + $0x30] sm:$0xff]  ;;  %v247_v9 = vand.u32 4294901760, %v246_v11  ;;  %v7388_v53 = vand.u32 4294901760, %v4844_v60  ;;  %v154_v11 = vld [vmem:[%s4794_s10 + $0x38] sm:$0xff] }
  0x49   : > { %240 = vmatmul.f32.gmra.mxu0 %v239_v21  ;;  %649 = vmatpush.msrb.mxu3 %v4784_v35  ;;  %v5103_v31 = vand.u32 4294901760, %v153_v18  ;;  %v7334_v21 = vand.u32 4294901760, %v5093_v57 }
  0x4a   : > { %790 = vmatpush.msrb.mxu0 %v7385_v36  ;;  %533 = vmatpush.msrb.mxu2 %v4844_v60  ;;  %v7389_v36 = vand.u32 4294901760, %v4861_v6 }
  0x4b   : > { %903 = vmatpush.msrb.mxu1 %v4751_v24  ;;  %651 = vmatpush.msrb.mxu3 %v4802_v41  ;;  %v253_v24 = vand.u32 4294901760, %v5084_v5 }
  0x4c   : > { %794 = vmatpush.msrb.mxu0 %v7386_v19  ;;  %536 = vmatpush.msrb.mxu2 %v4861_v6  ;;  %v5140_v19 = vand.u32 4294901760, %v154_v11  ;;  %v7390_v6 = vand.u32 4294901760, %v4876_v29 }
  0x4d   : > { %312 = vmatmul.f32.gmra.mxu2 %v311_v4  ;;  %481 = vmatmul.f32.gmra.mxu3 %v4972_v34  ;;  %v5121_v4 = vsub.f32 %v153_v18, %v5103_v31  ;;  %v5137_v18 = vsub.f32 %v162_v46, %v5117_v28 }
  0x4e   : > { %905 = vmatpush.msrb.mxu1 %v4760_v27  ;;  %653 = vmatpush.msrb.mxu3 %v4825_v52  ;;  %v254_v27 = vsub.f32 %v5084_v5, %v253_v24 }
  0x4f   : > { %449 = vmatmul.f32.gmra.mxu1 %v4995_v50  ;;  %798 = vmatpush.msrb.mxu0 %v7387_v37  ;;  %v7391_v37 = vand.u32 4294901760, %v4888_v38 }
  0x50   : > { %539 = vmatpush.msrb.mxu2 %v4876_v29  ;;  %907 = vmatpush.msrb.mxu1 %v4784_v35  ;;  %v326_v35 = vsub.f32 %v5093_v57, %v7334_v21  ;;  %v255_v60 = vand.u32 4294901760, %v254_v27 }
  0x51   : > { %248 = vmatmul.f32.gmra.mxu0 %v247_v9  ;;  %655 = vmatpush.msrb.mxu3 %v4841_v59  ;;  %v7327_v9 = vand.u32 4294901760, %v5137_v18 }
  0x52   : > { %802 = vmatpush.msrb.mxu0 %v7388_v53  ;;  %542 = vmatpush.msrb.mxu2 %v4888_v38  ;;  %v327_v40 = vand.u32 4294901760, %v326_v35  ;;  %v4516_v53 = vld [vmem:[%s7311_s1 + $0xf0] sm:$0xff] }
  0x53   : > { %909 = vmatpush.msrb.mxu1 %v4802_v41  ;;  %657 = vmatpush.msrb.mxu3 %v4854_v0  ;;  %v261_v41 = vand.u32 4294901760, %v5121_v4  ;;  %v334_v29 = vsub.f32 %v5137_v18, %v7327_v9 }
  0x54   : > { %806 = vmatpush.msrb.mxu0 %v7389_v36  ;;  %545 = vmatpush.msrb.mxu2 %v4902_v51 }
  0x55   : > { %320 = vmatmul.f32.gmra.mxu2 %v319_v32  ;;  %485 = vmatmul.f32.gmra.mxu3 %v5003_v14  ;;  %v262_v46 = vsub.f32 %v5121_v4, %v261_v41 }
  0x56   : > { %911 = vmatpush.msrb.mxu1 %v4825_v52  ;;  %548 = vmatpush.msrb.mxu2 %v4915_v62  ;;  %v5155_v52 = vsub.f32 %v154_v11, %v5140_v19  ;;  %v5194_v11 = vand.u32 4294901760, %v4516_v53 }
  0x57   : > { %453 = vmatmul.f32.gmra.mxu1 %v5029_v23  ;;  %659 = vmatpush.msrb.mxu3 %v4872_v17  ;;  %v263_v32 = vand.u32 4294901760, %v262_v46 }
  0x58   : > { %810 = vmatpush.msrb.mxu0 %v7390_v6  ;;  %913 = vmatpush.msrb.mxu1 %v4841_v59  ;;  %v7392_v59 = vand.u32 4294901760, %v4902_v51  ;;  %v269_v27 = vand.u32 4294901760, %v5155_v52  ;;  %v4517_v51 = vld [vmem:[%s7311_s1 + $0xf8] sm:$0xff]  ;;  %v5207_v6 = vsub.f32 %v4516_v53, %v5194_v11 }
  0x59   : > { %256 = vmatmul.f32.gmra.mxu0 %v255_v60  ;;  %661 = vmatpush.msrb.mxu3 %v4879_v33  ;;  %v5179_v62 = vand.u32 4294901760, %v4517_v51  ;;  %v7393_v60 = vand.u32 4294901760, %v4905_v55 }
  0x5a   : > { %814 = vmatpush.msrb.mxu0 %v7391_v37  ;;  %915 = vmatpush.msrb.mxu1 %v4854_v0  ;;  %v335_v0 = vand.u32 4294901760, %v334_v29  ;;  %v7339_v37 = vand.u32 4294901760, %v5207_v6  ;;  %v4514_v29 = vld [vmem:[%s7311_s1 + $0xe0] sm:$0xff] }
  0x5b   : > { %1019 = vmatpush.msra.mxu2 %v5179_v62 }
  0x5c   : > { %818 = vmatpush.msrb.mxu0 %v7392_v59  ;;  %917 = vmatpush.msrb.mxu1 %v4872_v17  ;;  %v270_v17 = vsub.f32 %v5155_v52, %v269_v27 }
  0x5d   : > { %328 = vmatmul.f32.gmra.mxu2 %v327_v40  ;;  %489 = vmatmul.f32.gmra.mxu3 %v5044_v26  ;;  %v4515_v40 = vld [vmem:[%s7311_s1 + $0xe8] sm:$0xff] }
  0x5e   : > { %822 = vmatpush.msrb.mxu0 %v432_v49  ;;  %919 = vmatpush.msrb.mxu1 %v4879_v33  ;;  %v271_v38 = vand.u32 4294901760, %v270_v17  ;;  %v5184_v33 = vsub.f32 %v4517_v51, %v5179_v62  ;;  %v5212_v46 = vand.u32 4294901760, %v4515_v40  ;;  %v4513_v17 = vld [vmem:[%s7311_s1 + $0xd8] sm:$0xff] }
  0x5f   : > { %457 = vmatmul.f32.gmra.mxu1 %v5067_v54  ;;  %1021 = vmatpush.msra.mxu2 %v5194_v11 }
  0x60   : > { %1470 = vmatpush.msra.mxu1 %v5179_v62  ;;  %1342 = vmatpush.msra.mxu0 %v5184_v33  ;;  %v7341_v49 = vand.u32 4294901760, %v5184_v33 }
  0x61   : > { %264 = vmatmul.f32.gmra.mxu0 %v263_v32  ;;  %1023 = vmatpush.msra.mxu2 %v5212_v46  ;;  %v5232_v32 = vand.u32 4294901760, %v4514_v29 }
  0x62   : > { %v1182_v35 = vsub.f32 %v5184_v33, %v7341_v49  ;;  %1472 = vmatpush.msra.mxu1 %v5194_v11  ;;  %1345 = vmatpush.msra.mxu0 %v5207_v6 }
  0x63   : > { %1025 = vmatpush.msra.mxu2 %v5232_v32 }
  0x64   : > { %v1183_v36 = vand.u32 4294901760, %v1182_v35  ;;  %1474 = vmatpush.msra.mxu1 %v5212_v46  ;;  %v4512_v35 = vld [vmem:[%s7311_s1 + $0xd0] sm:$0xff] }
  0x65   : > { %336 = vmatmul.f32.gmra.mxu2 %v335_v0  ;;  %493 = vmatmul.f32.gmra.mxu3 %v5076_v3 }
  0x66   : > { %1184 = vmatpush.msra.mxu3 %v1183_v36  ;;  %1476 = vmatpush.msra.mxu1 %v5232_v32 }
  0x67   : > { %461 = vmatmul.f32.gmra.mxu1 %v5103_v31 }
  0x69   : > { %272 = vmatmul.f32.gmra.mxu0 %v271_v38  ;;  %v5252_v38 = vand.u32 4294901760, %v4513_v17 }
  0x6b   : > { %1027 = vmatpush.msra.mxu2 %v5252_v38  ;;  %1478 = vmatpush.msra.mxu1 %v5252_v38 }
  0x6d   : > { %497 = vmatmul.f32.gmra.mxu3 %v5117_v28  ;;  %551 = vmatmul.f32.vlgmr.msrb.gmra.mxu2 %v4905_v55  ;;  %v1188_v55 = vsub.f32 %v5207_v6, %v7339_v37 }
  0x6f   : > { %465 = vmatmul.f32.gmra.mxu1 %v5140_v19  ;;  %v1189_v59 = vand.u32 4294901760, %v1188_v55 }
  0x71   : > { %824 = vmatmul.f32.vlgmr.msrb.gmra.mxu0 %v4890_v42  ;;  %1190 = vmatpush.msra.mxu3 %v1189_v59 }
  0x75   : > { %556 = vmatmul.f32.gmra.mxu2 %v4947_v61  ;;  %665 = vmatmul.f32.vlgmr.msrb.gmra.mxu3 %v7393_v60 }
  0x77   : > { %921 = vmatmul.f32.vlgmr.msrb.gmra.mxu1 %v4890_v42  ;;  %v5227_v42 = vsub.f32 %v4515_v40, %v5212_v46 }
  0x79   : > { %828 = vmatmul.f32.gmra.mxu0 %v4926_v25  ;;  %v7338_v0 = vand.u32 4294901760, %v5227_v42 }
  0x7a   : > { %1348 = vmatpush.msra.mxu0 %v5227_v42 }
  0x7d   : > { %561 = vmatmul.f32.gmra.mxu2 %v4979_v63  ;;  %671 = vmatmul.f32.gmra.mxu3 %v221_v44  ;;  %v1194_v44 = vsub.f32 %v5227_v42, %v7338_v0 }
  0x7f   : > { %925 = vmatmul.f32.gmra.mxu1 %v4926_v25  ;;  %v1195_v61 = vand.u32 4294901760, %v1194_v44  ;;  %v5247_v25 = vsub.f32 %v4514_v29, %v5232_v32 }
  0x81   : > { %832 = vmatmul.f32.gmra.mxu0 %v4967_v39  ;;  %1196 = vmatpush.msra.mxu3 %v1195_v61  ;;  %v7336_v51 = vand.u32 4294901760, %v5247_v25 }
  0x82   : > { %1351 = vmatpush.msra.mxu0 %v5247_v25 }
  0x83   : > { %v1200_v63 = vsub.f32 %v5247_v25, %v7336_v51 }
  0x85   : > { %566 = vmatmul.f32.gmra.mxu2 %v5011_v30  ;;  %677 = vmatmul.f32.gmra.mxu3 %v229_v2  ;;  %v1201_v2 = vand.u32 4294901760, %v1200_v63 }
  0x87   : > { %929 = vmatmul.f32.gmra.mxu1 %v4967_v39  ;;  %v5267_v39 = vsub.f32 %v4513_v17, %v5252_v38  ;;  %1202 = vmatpush.msra.mxu3 %v1201_v2 }
  0x89   : > { %836 = vmatmul.f32.gmra.mxu0 %v4995_v50  ;;  %v7335_v53 = vand.u32 4294901760, %v5267_v39 }
  0x8a   : > { %1354 = vmatpush.msra.mxu0 %v5267_v39 }
  0x8b   : > { %v1206_v30 = vsub.f32 %v5267_v39, %v7335_v53 }
  0x8d   : > { %571 = vmatmul.f32.gmra.mxu2 %v5047_v7  ;;  %683 = vmatmul.f32.gmra.mxu3 %v237_v16  ;;  %v5279_v16 = vand.u32 4294901760, %v4512_v35  ;;  %v1207_v36 = vand.u32 4294901760, %v1206_v30  ;;  %v4511_v7 = vld [vmem:[%s7311_s1 + $0xc8] sm:$0xff] }
  0x8f   : > { %933 = vmatmul.f32.gmra.mxu1 %v4995_v50  ;;  %1029 = vmatpush.msra.mxu2 %v5279_v16  ;;  %v5287_v50 = vsub.f32 %v4512_v35, %v5279_v16 }
  0x90   : > { %1480 = vmatpush.msra.mxu1 %v5279_v16  ;;  %1208 = vmatpush.msra.mxu3 %v1207_v36 }
  0x91   : > { %840 = vmatmul.f32.gmra.mxu0 %v5029_v23  ;;  %v7333_v60 = vand.u32 4294901760, %v5287_v50 }
  0x92   : > { %1357 = vmatpush.msra.mxu0 %v5287_v50 }
  0x93   : > { %v1212_v40 = vsub.f32 %v5287_v50, %v7333_v60 }
  0x95   : > { %576 = vmatmul.f32.gmra.mxu2 %v5084_v5  ;;  %689 = vmatmul.f32.gmra.mxu3 %v245_v10  ;;  %v5299_v10 = vand.u32 4294901760, %v4511_v7  ;;  %v1213_v55 = vand.u32 4294901760, %v1212_v40  ;;  %v4510_v5 = vld [vmem:[%s7311_s1 + $0xc0] sm:$0xff] }
  0x97   : > { %937 = vmatmul.f32.gmra.mxu1 %v5029_v23  ;;  %1031 = vmatpush.msra.mxu2 %v5299_v10  ;;  %v5307_v23 = vsub.f32 %v4511_v7, %v5299_v10  ;;  %v7394_v7 = vand.u32 4294901760, %v4868_v8 }
  0x98   : > { %1482 = vmatpush.msra.mxu1 %v5299_v10  ;;  %1214 = vmatpush.msra.mxu3 %v1213_v55 }
  0x99   : > { %844 = vmatmul.f32.gmra.mxu0 %v5067_v54  ;;  %v7331_v59 = vand.u32 4294901760, %v5307_v23 }
  0x9a   : > { %1360 = vmatpush.msra.mxu0 %v5307_v23 }
  0x9b   : > { %v1218_v29 = vsub.f32 %v5307_v23, %v7331_v59 }
  0x9d   : > { %581 = vmatmul.f32.gmra.mxu2 %v5121_v4  ;;  %695 = vmatmul.f32.gmra.mxu3 %v253_v24  ;;  %v5319_v24 = vand.u32 4294901760, %v4510_v5  ;;  %v1219_v44 = vand.u32 4294901760, %v1218_v29  ;;  %v4509_v4 = vld [vmem:[%s7311_s1 + $0xb8] sm:$0xff] }
  0x9f   : > { %941 = vmatmul.f32.gmra.mxu1 %v5067_v54  ;;  %1033 = vmatpush.msra.mxu2 %v5319_v24  ;;  %v5327_v54 = vsub.f32 %v4510_v5, %v5319_v24 }
  0xa0   : > { %1484 = vmatpush.msra.mxu1 %v5319_v24  ;;  %1220 = vmatpush.msra.mxu3 %v1219_v44 }
  0xa1   : > { %848 = vmatmul.f32.gmra.mxu0 %v5103_v31  ;;  %v7330_v61 = vand.u32 4294901760, %v5327_v54 }
  0xa2   : > { %1363 = vmatpush.msra.mxu0 %v5327_v54 }
  0xa3   : > { %v1224_v17 = vsub.f32 %v5327_v54, %v7330_v61 }
  0xa5   : > { %586 = vmatmul.f32.gmra.mxu2 %v5155_v52  ;;  %701 = vmatmul.f32.gmra.mxu3 %v261_v41  ;;  %v5339_v41 = vand.u32 4294901760, %v4509_v4  ;;  %v1225_v63 = vand.u32 4294901760, %v1224_v17 }
  0xa7   : > { %945 = vmatmul.f32.gmra.mxu1 %v5103_v31  ;;  %1035 = vmatpush.msra.mxu2 %v5339_v41  ;;  %v5347_v31 = vsub.f32 %v4509_v4, %v5339_v41  ;;  %v4507_v4 = vld [vmem:[%s7311_s1 + $0xa8] sm:$0xff] }
  0xa8   : > { %1486 = vmatpush.msra.mxu1 %v5339_v41  ;;  %1226 = vmatpush.msra.mxu3 %v1225_v63  ;;  %v5391_v63 = vand.u32 4294901760, %v4507_v4 }
  0xa9   : > { %852 = vmatmul.f32.gmra.mxu0 %v5140_v19  ;;  %v7329_v35 = vand.u32 4294901760, %v5347_v31 }
  0xaa   : > { %1366 = vmatpush.msra.mxu0 %v5347_v31 }
  0xab   : > { %v1230_v52 = vsub.f32 %v5347_v31, %v7329_v35 }
  0xad   : > { %591 = vmatmul.f32.gmra.mxu2 %v4868_v8  ;;  %707 = vmatmul.f32.gmra.mxu3 %v269_v27  ;;  %v4508_v27 = vld [vmem:[%s7311_s1 + $0xb0] sm:$0xff]  ;;  %v1231_v40 = vand.u32 4294901760, %v1230_v52 }
  0xae   : > { %v5349_v2 = vpop.f32.mrf.mxu0  ;;  %v5363_v36 = vand.u32 4294901760, %v4508_v27 }
  0xaf   : > { %949 = vmatmul.f32.gmra.mxu1 %v5140_v19  ;;  %1232 = vmatpush.msra.mxu3 %v1231_v40  ;;  %v5401_v40 = vsub.f32 %v4507_v4, %v5391_v63  ;;  %v4506_v4 = vld [vmem:[%s7311_s1 + $0xa0] sm:$0xff] }
  0xb0   : > { %v5354_v30 = vpop.f32.mrf.mxu2  ;;  %1037 = vmatpush.msra.mxu2 %v5363_v36  ;;  %1488 = vmatpush.msra.mxu1 %v5363_v36  ;;  %v5373_v55 = vsub.f32 %v4508_v27, %v5363_v36  ;;  %v7395_v27 = vand.u32 4294901760, %v4922_v12 }
  0xb1   : > { %856 = vmatmul.f32.gmra.mxu0 %v4835_v56 }
  0xb2   : > { %v7326_v5 = vand.u32 4294901760, %v5373_v55  ;;  %1369 = vmatpush.msra.mxu0 %v5373_v55  ;;  %1039 = vmatpush.msra.mxu2 %v5391_v63 }
  0xb3   : > { %1490 = vmatpush.msra.mxu1 %v5391_v63 }
  0xb4   : > { %v5365_v19 = vpop.f32.mrf.mxu1  ;;  %v1236_v8 = vsub.f32 %v5373_v55, %v7326_v5  ;;  %1372 = vmatpush.msra.mxu0 %v5401_v40 }
  0xb5   : > { %596 = vmatmul.f32.gmra.mxu2 %v4922_v12  ;;  %713 = vmatmul.f32.gmra.mxu3 %v7394_v7 }
  0xb6   : > { %v5375_v29 = vpop.f32.mrf.mxu0 }
  0xb7   : > { %953 = vmatmul.f32.gmra.mxu1 %v4835_v56  ;;  %v1237_v56 = vand.u32 4294901760, %v1236_v8  ;;  %v7328_v8 = vand.u32 4294901760, %v5401_v40 }
  0xb8   : > { %v5380_v44 = vpop.f32.mrf.mxu2  ;;  %v5382_v17 = vpop.f32.mrf.mxu3 }
  0xb9   : > { %860 = vmatmul.f32.gmra.mxu0 %v4894_v47  ;;  %1238 = vmatpush.msra.mxu3 %v1237_v56  ;;  %v1242_v12 = vsub.f32 %v5401_v40, %v7328_v8  ;;  %v5419_v56 = vand.u32 4294901760, %v4506_v4 }
  0xbb   : > { %1041 = vmatpush.msra.mxu2 %v5419_v56  ;;  %1492 = vmatpush.msra.mxu1 %v5419_v56  ;;  %v5429_v8 = vsub.f32 %v4506_v4, %v5419_v56 }
  0xbc   : > { %v5393_v52 = vpop.f32.mrf.mxu1 }
  0xbd   : > { %601 = vmatmul.f32.gmra.mxu2 %v4960_v48  ;;  %719 = vmatmul.f32.gmra.mxu3 %v7395_v27 }
  0xbe   : > { %v5403_v7 = vpop.f32.mrf.mxu0  ;;  %1375 = vmatpush.msra.mxu0 %v5429_v8 }
  0xbf   : > { %957 = vmatmul.f32.gmra.mxu1 %v4894_v47  ;;  %v1243_v47 = vand.u32 4294901760, %v1242_v12  ;;  %v7332_v12 = vand.u32 4294901760, %v5429_v8 }
  0xc0   : > { %v5408_v5 = vpop.f32.mrf.mxu2  ;;  %v5410_v9 = vpop.f32.mrf.mxu3 }
  0xc1   : > { %7396 = vst [vmem:[#allocation2_spill] sm:$0xff] %v5408_v5  ;;  %864 = vmatmul.f32.gmra.mxu0 %v4939_v1  ;;  %1244 = vmatpush.msra.mxu3 %v1243_v47  ;;  %v1248_v48 = vsub.f32 %v5429_v8, %v7332_v12  ;;  %v7406_v5 = vand.u32 4294901760, %v5227_v42 }
  0xc4   : > { %v5421_v27 = vpop.f32.mrf.mxu1 }
  0xc5   : > { %606 = vmatmul.f32.gmra.mxu2 %v4987_v13  ;;  %725 = vmatmul.f32.gmra.mxu3 %v293_v43  ;;  %v4505_v43 = vld [vmem:[%s7311_s1 + $0x98] sm:$0xff] }
  0xc6   : > { %v5431_v35 = vpop.f32.mrf.mxu0  ;;  %v5447_v4 = vand.u32 4294901760, %v4505_v43 }
  0xc7   : > { %961 = vmatmul.f32.gmra.mxu1 %v4939_v1  ;;  %v1249_v1 = vand.u32 4294901760, %v1248_v48 }
  0xc8   : > { %v5436_v61 = vpop.f32.mrf.mxu2  ;;  %v5438_v59 = vpop.f32.mrf.mxu3  ;;  %1043 = vmatpush.msra.mxu2 %v5447_v4  ;;  %1494 = vmatpush.msra.mxu1 %v5447_v4  ;;  %v5457_v12 = vsub.f32 %v4505_v43, %v5447_v4 }
  0xc9   : > { %7397 = vst [vmem:[#allocation3_spill] sm:$0xff] %v5436_v61  ;;  %868 = vmatmul.f32.gmra.mxu0 %v4972_v34  ;;  %1250 = vmatpush.msra.mxu3 %v1249_v1 }
  0xca   : > { %7398 = vst [vmem:[#allocation4_spill] sm:$0xff] %v5438_v59  ;;  %v7337_v48 = vand.u32 4294901760, %v5457_v12  ;;  %1378 = vmatpush.msra.mxu0 %v5457_v12 }
  0xcc   : > { %v5449_v47 = vpop.f32.mrf.mxu1  ;;  %v1254_v13 = vsub.f32 %v5457_v12, %v7337_v48  ;;  %v4503_v48 = vld [vmem:[%s7311_s1 + $0x88] sm:$0xff] }
  0xcd   : > { %611 = vmatmul.f32.gmra.mxu2 %v5022_v15  ;;  %731 = vmatmul.f32.gmra.mxu3 %v301_v45  ;;  %v4504_v45 = vld [vmem:[%s7311_s1 + $0x90] sm:$0xff]  ;;  %v5493_v37 = vand.u32 4294901760, %v4503_v48  ;;  %v4502_v15 = vld [vmem:[%s7311_s1 + $0x80] sm:$0xff] }
  0xce   : > { %v5459_v60 = vpop.f32.mrf.mxu0  ;;  %v5475_v43 = vand.u32 4294901760, %v4504_v45  ;;  %v5511_v49 = vand.u32 4294901760, %v4502_v15 }
  0xcf   : > { %965 = vmatmul.f32.gmra.mxu1 %v4972_v34  ;;  %v1255_v34 = vand.u32 4294901760, %v1254_v13  ;;  %v5509_v22 = vsub.f32 %v4503_v48, %v5493_v37  ;;  %v7403_v48 = vand.u32 4294901760, %v5184_v33 }
  0xd0   : > { %v5464_v21 = vpop.f32.mrf.mxu2  ;;  %v5466_v53 = vpop.f32.mrf.mxu3  ;;  %1045 = vmatpush.msra.mxu2 %v5475_v43  ;;  %v5481_v51 = vsub.f32 %v4504_v45, %v5475_v43  ;;  %1496 = vmatpush.msra.mxu1 %v5475_v43 }
  0xd1   : > { %7399 = vst [vmem:[#allocation5_spill] sm:$0xff] %v5464_v21  ;;  %872 = vmatmul.f32.gmra.mxu0 %v5003_v14  ;;  %1256 = vmatpush.msra.mxu3 %v1255_v34 }
  0xd2   : > { %7400 = vst [vmem:[#allocation6_spill] sm:$0xff] %v5466_v53  ;;  %v7342_v13 = vand.u32 4294901760, %v5481_v51  ;;  %1381 = vmatpush.msra.mxu0 %v5481_v51  ;;  %1047 = vmatpush.msra.mxu2 %v5493_v37 }
  0xd3   : > { %1498 = vmatpush.msra.mxu1 %v5493_v37 }
  0xd4   : > { %v5477_v1 = vpop.f32.mrf.mxu1  ;;  %v1260_v34 = vsub.f32 %v5481_v51, %v7342_v13  ;;  %1384 = vmatpush.msra.mxu0 %v5509_v22  ;;  %1049 = vmatpush.msra.mxu2 %v5511_v49 }
  0xd5   : > { %616 = vmatmul.f32.gmra.mxu2 %v5063_v20  ;;  %737 = vmatmul.f32.gmra.mxu3 %v309_v58 }
  0xd6   : > { %v5490_v0 = vpop.f32.mrf.mxu0  ;;  %1500 = vmatpush.msra.mxu1 %v5511_v49  ;;  %1601 = vmatpush.msrb.mxu2 %v7403_v48 }
  0xd7   : > { %969 = vmatmul.f32.gmra.mxu1 %v5003_v14  ;;  %v1261_v14 = vand.u32 4294901760, %v1260_v34 }
  0xd8   : > { %v5500_v58 = vpop.f32.mrf.mxu2  ;;  %v5502_v45 = vpop.f32.mrf.mxu3 }
  0xd9   : > { %7401 = vst [vmem:[#allocation7_spill] sm:$0xff] %v5500_v58  ;;  %876 = vmatmul.f32.gmra.mxu0 %v5044_v26  ;;  %v7343_v58 = vand.u32 4294901760, %v5509_v22  ;;  %1262 = vmatpush.msra.mxu3 %v1261_v14  ;;  %v7405_v14 = vand.u32 4294901760, %v5207_v6 }
  0xda   : > { %7402 = vst [vmem:[#allocation8_spill] sm:$0xff] %v5502_v45  ;;  %v5517_v45 = vsub.f32 %v4502_v15, %v5511_v49  ;;  %v7404_v15 = vand.u32 4294901760, %v5063_v20  ;;  %v7407_v20 = vand.u32 4294901760, %v5247_v25 }
  0xdb   : > { %v1266_v34 = vsub.f32 %v5509_v22, %v7343_v58  ;;  %1605 = vmatpush.msrb.mxu2 %v7405_v14 }
  0xdc   : > { %v5524_v13 = vpop.f32.mrf.mxu1  ;;  %v1271_v21 = vand.u32 4294901760, %v5517_v45  ;;  %1387 = vmatpush.msra.mxu0 %v5517_v45 }
  0xdd   : > { %621 = vmatmul.f32.gmra.mxu2 %v5093_v57  ;;  %743 = vmatmul.f32.gmra.mxu3 %v7404_v15  ;;  %v1267_v33 = vand.u32 4294901760, %v1266_v34 }
  0xde   : > { %v5534_v53 = vpop.f32.mrf.mxu0  ;;  %v1272_v48 = vsub.f32 %v5517_v45, %v1271_v21  ;;  %1609 = vmatpush.msrb.mxu2 %v7406_v5  ;;  %v7409_v45 = vand.u32 4294901760, %v5093_v57  ;;  %v7412_v57 = vand.u32 4294901760, %v5327_v54 }
  0xdf   : > { %973 = vmatmul.f32.gmra.mxu1 %v5044_v26  ;;  %1268 = vmatpush.msra.mxu3 %v1267_v33  ;;  %v7408_v26 = vand.u32 4294901760, %v5267_v39  ;;  %v7411_v39 = vand.u32 4294901760, %v5307_v23  ;;  %v7415_v23 = vand.u32 4294901760, %v5373_v55 }
  0xe0   : > { %v5540_v58 = vpop.f32.mrf.mxu2  ;;  %v5542_v61 = vpop.f32.mrf.mxu3  ;;  %v1273_v59 = vand.u32 4294901760, %v1272_v48  ;;  %1613 = vmatpush.msrb.mxu2 %v7407_v20 }
  0xe1   : > { %880 = vmatmul.f32.gmra.mxu0 %v5076_v3 }
  0xe2   : > { %1274 = vmatpush.msra.mxu3 %v1273_v59  ;;  %1617 = vmatpush.msrb.mxu2 %v7408_v26  ;;  %v7410_v59 = vand.u32 4294901760, %v5287_v50  ;;  %v7414_v50 = vand.u32 4294901760, %v5137_v18 }
  0xe4   : > { %1728 = vmatpush.msrb.mxu3 %v5179_v62  ;;  %v5550_v6 = vpop.f32.mrf.mxu1  ;;  %1621 = vmatpush.msrb.mxu2 %v7410_v59 }
  0xe5   : > { %626 = vmatmul.f32.gmra.mxu2 %v5137_v18  ;;  %749 = vmatmul.f32.gmra.mxu3 %v7409_v45  ;;  %v7417_v18 = vand.u32 4294901760, %v5429_v8  ;;  %v7420_v8 = vand.u32 4294901760, %v5509_v22 }
  0xe6   : > { %v5557_v42 = vpop.f32.mrf.mxu0  ;;  %1730 = vmatpush.msrb.mxu3 %v5194_v11  ;;  %1625 = vmatpush.msrb.mxu2 %v7411_v39 }
  0xe7   : > { %977 = vmatmul.f32.gmra.mxu1 %v5076_v3  ;;  %v7413_v3 = vand.u32 4294901760, %v5347_v31 }
  0xe8   : > { %v5563_v62 = vpop.f32.mrf.mxu2  ;;  %v5565_v25 = vpop.f32.mrf.mxu3  ;;  %1732 = vmatpush.msrb.mxu3 %v5212_v46  ;;  %1629 = vmatpush.msrb.mxu2 %v7412_v57 }
  0xe9   : > { %884 = vmatmul.f32.gmra.mxu0 %v5117_v28 }
  0xea   : > { %1734 = vmatpush.msrb.mxu3 %v5232_v32  ;;  %1633 = vmatpush.msrb.mxu2 %v7413_v3 }
  0xec   : > { %v5574_v11 = vpop.f32.mrf.mxu1  ;;  %1736 = vmatpush.msrb.mxu3 %v5252_v38  ;;  %1637 = vmatpush.msrb.mxu2 %v7415_v23  ;;  %v7416_v38 = vand.u32 4294901760, %v5401_v40 }
  0xed   : > { %755 = vmatmul.f32.gmra.mxu3 %v7414_v50  ;;  %v451_v50 = vadd.f32 %v5449_v47, %v5431_v35 }
  0xee   : > { %v825_v46 = vpop.f32.mrf.mxu0  ;;  %1738 = vmatpush.msrb.mxu3 %v5279_v16  ;;  %1641 = vmatpush.msrb.mxu2 %v7416_v38  ;;  %v7418_v16 = vand.u32 4294901760, %v5457_v12 }
  0xef   : > { %981 = vmatmul.f32.gmra.mxu1 %v5117_v28  ;;  %v439_v28 = vadd.f32 %v5365_v19, %v5349_v2 }
  0xf0   : > { %v5585_v32 = vpop.f32.mrf.mxu3  ;;  %v552_v54 = vpop.f32.mrf.mxu2  ;;  %1740 = vmatpush.msrb.mxu3 %v5299_v10  ;;  %1645 = vmatpush.msrb.mxu2 %v7417_v18  ;;  %v7419_v10 = vand.u32 4294901760, %v5481_v51  ;;  %v443_v51 = vadd.f32 %v5393_v52, %v5375_v29  ;;  %v447_v52 = vadd.f32 %v5421_v27, %v5403_v7 }
  0xf1   : > { %v553_v5 = vadd.f32 %v552_v54, %v439_v28 }
  0xf2   : > { %1742 = vmatpush.msrb.mxu3 %v5319_v24  ;;  %1649 = vmatpush.msrb.mxu2 %v7418_v16 }
  0xf4   : > { %v922_v31 = vpop.f32.mrf.mxu1  ;;  %1744 = vmatpush.msrb.mxu3 %v5339_v41  ;;  %1653 = vmatpush.msrb.mxu2 %v7419_v10 }
  0xf6   : > { %v829_v55 = vpop.f32.mrf.mxu0  ;;  %1746 = vmatpush.msrb.mxu3 %v5363_v36  ;;  %1657 = vmatpush.msrb.mxu2 %v7420_v8 }
  0xf8   : > { %v557_v24 = vpop.f32.mrf.mxu2  ;;  %v666_v40 = vpop.f32.mrf.mxu3  ;;  %1748 = vmatpush.msrb.mxu3 %v5391_v63  ;;  %1661 = vmatpush.msrb.mxu2 %v1271_v21 }
  0xf9   : > { %v667_v41 = vadd.f32 %v666_v40, %v553_v5  ;;  %v558_v34 = vadd.f32 %v557_v24, %v443_v51  ;;  %v455_v40 = vadd.f32 %v5477_v1, %v5459_v60 }
  0xfa   : > { %1750 = vmatpush.msrb.mxu3 %v5419_v56 }
  0xfb   : > { %v826_v12 = vadd.f32 %v825_v46, %v667_v41 }
  0xfc   : > { %v926_v2 = vpop.f32.mrf.mxu1  ;;  %1752 = vmatpush.msrb.mxu3 %v5447_v4 }
  0xfd   : > { %v923_v36 = vadd.f32 %v922_v31, %v826_v12 }
  0xfe   : > { %v833_v19 = vpop.f32.mrf.mxu0  ;;  %1754 = vmatpush.msrb.mxu3 %v5475_v43 }
  0xff   : > { %v985_v63 = vmax.f32 %v923_v36, 0.0 }
 0x100   : > { %v562_v15 = vpop.f32.mrf.mxu2  ;;  %v672_v22 = vpop.f32.mrf.mxu3  ;;  %1756 = vmatpush.msrb.mxu3 %v5493_v37 }
 0x101   : > { %v5610_v33 = vand.u32 4294901760, %v985_v63  ;;  %v673_v21 = vadd.f32 %v672_v22, %v558_v34  ;;  %v563_v37 = vadd.f32 %v562_v15, %v447_v52 }
 0x102   : > { %1758 = vmatpush.msrb.mxu3 %v5511_v49 }
 0x103   : > { %v1051_v56 = vsub.f32 %v985_v63, %v5610_v33  ;;  %v830_v4 = vadd.f32 %v829_v55, %v673_v21  ;;  %1276 = vmatmul.f32.vlgmr.msra.gmra.mxu3 %v5610_v33 }
 0x104   : > { %v930_v29 = vpop.f32.mrf.mxu1 }
 0x105   : > { %v1052_v43 = vand.u32 4294901760, %v1051_v56  ;;  %v927_v48 = vadd.f32 %v926_v2, %v830_v4  ;;  %1390 = vmatmul.f32.vlgmr.msra.gmra.mxu0 %v1051_v56 }
 0x106   : > { %v837_v14 = vpop.f32.mrf.mxu0 }
 0x107   : > { %v1053_v20 = vsub.f32 %v1051_v56, %v1052_v43  ;;  %v986_v26 = vmax.f32 %v927_v48, 0.0  ;;  %1504 = vmatmul.f32.vlgmr.msra.gmra.mxu1 %v1052_v43  ;;  %v459_v56 = vadd.f32 %v5524_v13, %v5490_v0 }
 0x108   : > { %v567_v45 = vpop.f32.mrf.mxu2  ;;  %v678_v59 = vpop.f32.mrf.mxu3 }
 0x109   : > { %v1054_v49 = vand.u32 4294901760, %v1053_v20  ;;  %v5617_v39 = vand.u32 4294901760, %v986_v26  ;;  %v679_v57 = vadd.f32 %v678_v59, %v563_v37  ;;  %v568_v38 = vadd.f32 %v567_v45, %v451_v50 }
 0x10b   : > { %v834_v3 = vadd.f32 %v833_v19, %v679_v57  ;;  %1055 = vmatmul.f32.vlgmr.msra.gmra.mxu2 %v1054_v49  ;;  %1280 = vmatmul.f32.gmra.mxu3 %v5617_v39  ;;  %v1059_v7 = vsub.f32 %v986_v26, %v5617_v39  ;;  %v463_v57 = vadd.f32 %v5550_v6, %v5534_v53 }
 0x10c   : > { %v934_v27 = vpop.f32.mrf.mxu1 }
 0x10d   : > { %v931_v46 = vadd.f32 %v930_v29, %v834_v3  ;;  %1395 = vmatmul.f32.gmra.mxu0 %v1059_v7  ;;  %v1060_v23 = vand.u32 4294901760, %v1059_v7 }
 0x10e   : > { %v841_v54 = vpop.f32.mrf.mxu0 }
 0x10f   : > { %v987_v18 = vmax.f32 %v931_v46, 0.0  ;;  %1510 = vmatmul.f32.gmra.mxu1 %v1060_v23  ;;  %v1061_v31 = vsub.f32 %v1059_v7, %v1060_v23 }
 0x110   : > { %v572_v16 = vpop.f32.mrf.mxu2  ;;  %v684_v28 = vpop.f32.mrf.mxu3 }
 0x111   : > { %v5623_v55 = vand.u32 4294901760, %v987_v18  ;;  %v685_v10 = vadd.f32 %v684_v28, %v568_v38  ;;  %v1062_v5 = vand.u32 4294901760, %v1061_v31  ;;  %v573_v2 = vadd.f32 %v572_v16, %v455_v40 }
 0x113   : > { %v838_v24 = vadd.f32 %v837_v14, %v685_v10  ;;  %1063 = vmatmul.f32.gmra.mxu2 %v1062_v5  ;;  %1284 = vmatmul.f32.gmra.mxu3 %v5623_v55  ;;  %v1067_v35 = vsub.f32 %v987_v18, %v5623_v55  ;;  %v467_v10 = vadd.f32 %v5574_v11, %v5557_v42 }
 0x114   : > { %v938_v47 = vpop.f32.mrf.mxu1 }
 0x115   : > { %v935_v8 = vadd.f32 %v934_v27, %v838_v24  ;;  %1400 = vmatmul.f32.gmra.mxu0 %v1067_v35  ;;  %v1068_v41 = vand.u32 4294901760, %v1067_v35 }
 0x116   : > { %v845_v12 = vpop.f32.mrf.mxu0 }
 0x117   : > { %v988_v51 = vmax.f32 %v935_v8, 0.0  ;;  %1516 = vmatmul.f32.gmra.mxu1 %v1068_v41  ;;  %v1069_v36 = vsub.f32 %v1067_v35, %v1068_v41 }
 0x118   : > { %v577_v19 = vpop.f32.mrf.mxu2  ;;  %v690_v34 = vpop.f32.mrf.mxu3 }
 0x119   : > { %v5629_v63 = vand.u32 4294901760, %v988_v51  ;;  %v691_v15 = vadd.f32 %v690_v34, %v573_v2  ;;  %v1070_v22 = vand.u32 4294901760, %v1069_v36  ;;  %v578_v43 = vadd.f32 %v577_v19, %v459_v56 }
 0x11a   : > { %v471_v34 = vadd.f32 %v5382_v17, %v5354_v30 }
 0x11b   : > { %v842_v21 = vadd.f32 %v841_v54, %v691_v15  ;;  %1071 = vmatmul.f32.gmra.mxu2 %v1070_v22  ;;  %1288 = vmatmul.f32.gmra.mxu3 %v5629_v63  ;;  %v1075_v60 = vsub.f32 %v988_v51, %v5629_v63 }
 0x11c   : > { %v942_v1 = vpop.f32.mrf.mxu1 }
 0x11d   : > { %v939_v4 = vadd.f32 %v938_v47, %v842_v21  ;;  %1405 = vmatmul.f32.gmra.mxu0 %v1075_v60  ;;  %v1076_v29 = vand.u32 4294901760, %v1075_v60 }
 0x11e   : > { %v849_v52 = vpop.f32.mrf.mxu0 }
 0x11f   : > { %v989_v48 = vmax.f32 %v939_v4, 0.0  ;;  %1522 = vmatmul.f32.gmra.mxu1 %v1076_v29  ;;  %v1077_v14 = vsub.f32 %v1075_v60, %v1076_v29 }
 0x120   : > { %v582_v20 = vpop.f32.mrf.mxu2  ;;  %v696_v37 = vpop.f32.mrf.mxu3 }
 0x121   : > { %v5635_v26 = vand.u32 4294901760, %v989_v48  ;;  %v697_v45 = vadd.f32 %v696_v37, %v578_v43  ;;  %v1078_v59 = vand.u32 4294901760, %v1077_v14  ;;  %v583_v50 = vadd.f32 %v582_v20, %v463_v57 }
 0x122   : > { %v475_v20 = vadd.f32 %v5410_v9, %v5380_v44 }
 0x123   : > { %v846_v49 = vadd.f32 %v845_v12, %v697_v45  ;;  %1079 = vmatmul.f32.gmra.mxu2 %v1078_v59  ;;  %1292 = vmatmul.f32.gmra.mxu3 %v5635_v26  ;;  %v1083_v0 = vsub.f32 %v989_v48, %v5635_v26 }
 0x124   : > { %v946_v13 = vpop.f32.mrf.mxu1 }
 0x125   : > { %v943_v3 = vadd.f32 %v942_v1, %v846_v49  ;;  %1410 = vmatmul.f32.gmra.mxu0 %v1083_v0  ;;  %v1084_v7 = vand.u32 4294901760, %v1083_v0 }
 0x126   : > { %v853_v27 = vpop.f32.mrf.mxu0 }
 0x127   : > { %v990_v46 = vmax.f32 %v943_v3, 0.0  ;;  %1528 = vmatmul.f32.gmra.mxu1 %v1084_v7  ;;  %v1085_v23 = vsub.f32 %v1083_v0, %v1084_v7 }
 0x128   : > { %v587_v54 = vpop.f32.mrf.mxu2  ;;  %v702_v38 = vpop.f32.mrf.mxu3 }
 0x129   : > { %v5641_v18 = vand.u32 4294901760, %v990_v46  ;;  %v703_v31 = vadd.f32 %v702_v38, %v583_v50  ;;  %v1086_v16 = vand.u32 4294901760, %v1085_v23  ;;  %v588_v47 = vadd.f32 %v587_v54, %v467_v10  ;;  %v7421_v23 = vld [vmem:[#allocation2_spill] sm:$0xff]  ;;  %v7422_v54 = vld [vmem:[#allocation4_spill] sm:$0xff] }
 0x12a   : > { %v479_v38 = vadd.f32 %v7422_v54, %v7421_v23  ;;  %v7427_v23 = vld [vmem:[#allocation7_spill] sm:$0xff] }
 0x12b   : > { %v850_v28 = vadd.f32 %v849_v52, %v703_v31  ;;  %1087 = vmatmul.f32.gmra.mxu2 %v1086_v16  ;;  %1296 = vmatmul.f32.gmra.mxu3 %v5641_v18  ;;  %v1091_v53 = vsub.f32 %v990_v46, %v5641_v18  ;;  %v491_v54 = vadd.f32 %v5542_v61, %v7427_v23 }
 0x12c   : > { %v950_v6 = vpop.f32.mrf.mxu1 }
 0x12d   : > { %v947_v5 = vadd.f32 %v946_v13, %v850_v28  ;;  %1415 = vmatmul.f32.gmra.mxu0 %v1091_v53  ;;  %v1092_v24 = vand.u32 4294901760, %v1091_v53 }
 0x12e   : > { %v857_v35 = vpop.f32.mrf.mxu0 }
 0x12f   : > { %v991_v40 = vmax.f32 %v947_v5, 0.0  ;;  %1534 = vmatmul.f32.gmra.mxu1 %v1092_v24  ;;  %v1093_v8 = vsub.f32 %v1091_v53, %v1092_v24 }
 0x130   : > { %v592_v41 = vpop.f32.mrf.mxu2  ;;  %v708_v12 = vpop.f32.mrf.mxu3 }
 0x131   : > { %v5647_v2 = vand.u32 4294901760, %v991_v40  ;;  %v709_v51 = vadd.f32 %v708_v12, %v588_v47  ;;  %v1094_v36 = vand.u32 4294901760, %v1093_v8  ;;  %v593_v60 = vadd.f32 %v592_v41, %v471_v34 }
 0x133   : > { %v854_v19 = vadd.f32 %v853_v27, %v709_v51  ;;  %1095 = vmatmul.f32.gmra.mxu2 %v1094_v36  ;;  %1300 = vmatmul.f32.gmra.mxu3 %v5647_v2  ;;  %v1099_v42 = vsub.f32 %v991_v40, %v5647_v2  ;;  %v7423_v51 = vld [vmem:[#allocation3_spill] sm:$0xff]  ;;  %v7424_v36 = vld [vmem:[#allocation6_spill] sm:$0xff] }
 0x134   : > { %v954_v11 = vpop.f32.mrf.mxu1 }
 0x135   : > { %v951_v15 = vadd.f32 %v950_v6, %v854_v19  ;;  %1420 = vmatmul.f32.gmra.mxu0 %v1099_v42  ;;  %v1100_v22 = vand.u32 4294901760, %v1099_v42  ;;  %v483_v19 = vadd.f32 %v7424_v36, %v7423_v51 }
 0x136   : > { %v861_v21 = vpop.f32.mrf.mxu0 }
 0x137   : > { %v992_v1 = vmax.f32 %v951_v15, 0.0  ;;  %1540 = vmatmul.f32.gmra.mxu1 %v1100_v22  ;;  %v1101_v56 = vsub.f32 %v1099_v42, %v1100_v22 }
 0x138   : > { %v597_v4 = vpop.f32.mrf.mxu2  ;;  %v714_v29 = vpop.f32.mrf.mxu3 }
 0x139   : > { %v5653_v52 = vand.u32 4294901760, %v992_v1  ;;  %v715_v43 = vadd.f32 %v714_v29, %v593_v60  ;;  %v1102_v48 = vand.u32 4294901760, %v1101_v56  ;;  %v598_v49 = vadd.f32 %v597_v4, %v475_v20 }
 0x13b   : > { %v858_v14 = vadd.f32 %v857_v35, %v715_v43  ;;  %1103 = vmatmul.f32.gmra.mxu2 %v1102_v48  ;;  %1304 = vmatmul.f32.gmra.mxu3 %v5653_v52  ;;  %v1107_v30 = vsub.f32 %v992_v1, %v5653_v52 }
 0x13c   : > { %v958_v17 = vpop.f32.mrf.mxu1 }
 0x13d   : > { %v955_v37 = vadd.f32 %v954_v11, %v858_v14  ;;  %1425 = vmatmul.f32.gmra.mxu0 %v1107_v30  ;;  %v1108_v45 = vand.u32 4294901760, %v1107_v30 }
 0x13e   : > { %v865_v59 = vpop.f32.mrf.mxu0 }
 0x13f   : > { %v993_v0 = vmax.f32 %v955_v37, 0.0  ;;  %1546 = vmatmul.f32.gmra.mxu1 %v1108_v45  ;;  %v1109_v13 = vsub.f32 %v1107_v30, %v1108_v45  ;;  %v7425_v30 = vld [vmem:[#allocation5_spill] sm:$0xff] }
 0x140   : > { %v602_v57 = vpop.f32.mrf.mxu2  ;;  %v720_v3 = vpop.f32.mrf.mxu3 }
 0x141   : > { %v5659_v7 = vand.u32 4294901760, %v993_v0  ;;  %v721_v27 = vadd.f32 %v720_v3, %v598_v49  ;;  %v1110_v50 = vand.u32 4294901760, %v1109_v13  ;;  %v603_v28 = vadd.f32 %v602_v57, %v479_v38 }
 0x143   : > { %v862_v46 = vadd.f32 %v861_v21, %v721_v27  ;;  %1111 = vmatmul.f32.gmra.mxu2 %v1110_v50  ;;  %1308 = vmatmul.f32.gmra.mxu3 %v5659_v7  ;;  %v1115_v9 = vsub.f32 %v993_v0, %v5659_v7 }
 0x144   : > { %v962_v44 = vpop.f32.mrf.mxu1 }
 0x145   : > { %v959_v31 = vadd.f32 %v958_v17, %v862_v46  ;;  %1430 = vmatmul.f32.gmra.mxu0 %v1115_v9  ;;  %v1116_v16 = vand.u32 4294901760, %v1115_v9  ;;  %v7426_v17 = vld [vmem:[#allocation8_spill] sm:$0xff] }
 0x146   : > { %v869_v10 = vpop.f32.mrf.mxu0  ;;  %v487_v20 = vadd.f32 %v7426_v17, %v7425_v30 }
 0x147   : > { %v994_v53 = vmax.f32 %v959_v31, 0.0  ;;  %1552 = vmatmul.f32.gmra.mxu1 %v1116_v16  ;;  %v1117_v6 = vsub.f32 %v1115_v9, %v1116_v16 }
 0x148   : > { %v607_v5 = vpop.f32.mrf.mxu2  ;;  %v726_v24 = vpop.f32.mrf.mxu3 }
 0x149   : > { %v5665_v35 = vand.u32 4294901760, %v994_v53  ;;  %v727_v47 = vadd.f32 %v726_v24, %v603_v28  ;;  %v1118_v40 = vand.u32 4294901760, %v1117_v6  ;;  %v608_v34 = vadd.f32 %v607_v5, %v483_v19 }
 0x14b   : > { %v866_v8 = vadd.f32 %v865_v59, %v727_v47  ;;  %1119 = vmatmul.f32.gmra.mxu2 %v1118_v40  ;;  %1312 = vmatmul.f32.gmra.mxu3 %v5665_v35  ;;  %v1123_v41 = vsub.f32 %v994_v53, %v5665_v35 }
 0x14c   : > { %v966_v12 = vpop.f32.mrf.mxu1 }
 0x14d   : > { %v963_v42 = vadd.f32 %v962_v44, %v866_v8  ;;  %1435 = vmatmul.f32.gmra.mxu0 %v1123_v41  ;;  %v1124_v11 = vand.u32 4294901760, %v1123_v41 }
 0x14e   : > { %v873_v29 = vpop.f32.mrf.mxu0 }
 0x14f   : > { %v995_v15 = vmax.f32 %v963_v42, 0.0  ;;  %1558 = vmatmul.f32.gmra.mxu1 %v1124_v11  ;;  %v1125_v22 = vsub.f32 %v1123_v41, %v1124_v11  ;;  %v495_v41 = vadd.f32 %v5565_v25, %v5540_v58 }
 0x150   : > { %v612_v21 = vpop.f32.mrf.mxu2  ;;  %v732_v60 = vpop.f32.mrf.mxu3 }
 0x151   : > { %v5671_v1 = vand.u32 4294901760, %v995_v15  ;;  %v733_v56 = vadd.f32 %v732_v60, %v608_v34  ;;  %v1126_v4 = vand.u32 4294901760, %v1125_v22  ;;  %v613_v59 = vadd.f32 %v612_v21, %v487_v20 }
 0x153   : > { %v870_v43 = vadd.f32 %v869_v10, %v733_v56  ;;  %1127 = vmatmul.f32.gmra.mxu2 %v1126_v4  ;;  %1316 = vmatmul.f32.gmra.mxu3 %v5671_v1  ;;  %v1131_v48 = vsub.f32 %v995_v15, %v5671_v1  ;;  %v499_v4 = vadd.f32 %v5585_v32, %v5563_v62 }
 0x154   : > { %v970_v14 = vpop.f32.mrf.mxu1 }
 0x155   : > { %v967_v37 = vadd.f32 %v966_v12, %v870_v43  ;;  %1440 = vmatmul.f32.gmra.mxu0 %v1131_v48  ;;  %v1132_v45 = vand.u32 4294901760, %v1131_v48 }
 0x156   : > { %v877_v44 = vpop.f32.mrf.mxu0 }
 0x157   : > { %v996_v49 = vmax.f32 %v967_v37, 0.0  ;;  %1564 = vmatmul.f32.gmra.mxu1 %v1132_v45  ;;  %v1133_v0 = vsub.f32 %v1131_v48, %v1132_v45 }
 0x158   : > { %v617_v13 = vpop.f32.mrf.mxu2  ;;  %v738_v57 = vpop.f32.mrf.mxu3 }
 0x159   : > { %v5677_v3 = vand.u32 4294901760, %v996_v49  ;;  %v739_v27 = vadd.f32 %v738_v57, %v613_v59  ;;  %v1134_v50 = vand.u32 4294901760, %v1133_v0  ;;  %v618_v28 = vadd.f32 %v617_v13, %v491_v54 }
 0x15b   : > { %v874_v46 = vadd.f32 %v873_v29, %v739_v27  ;;  %1135 = vmatmul.f32.gmra.mxu2 %v1134_v50  ;;  %1320 = vmatmul.f32.gmra.mxu3 %v5677_v3  ;;  %v1139_v9 = vsub.f32 %v996_v49, %v5677_v3 }
 0x15c   : > { %v974_v16 = vpop.f32.mrf.mxu1 }
 0x15d   : > { %v971_v38 = vadd.f32 %v970_v14, %v874_v46  ;;  %1445 = vmatmul.f32.gmra.mxu0 %v1139_v9  ;;  %v1140_v31 = vand.u32 4294901760, %v1139_v9 }
 0x15e   : > { %v881_v36 = vpop.f32.mrf.mxu0 }
 0x15f   : > { %v997_v53 = vmax.f32 %v971_v38, 0.0  ;;  %1570 = vmatmul.f32.gmra.mxu1 %v1140_v31  ;;  %v1141_v6 = vsub.f32 %v1139_v9, %v1140_v31  ;;  %v4533_v38 = vld [vmem:[%s7311_s1 + $0x178] sm:$0xff] }
 0x160   : > { %v744_v10 = vpop.f32.mrf.mxu3  ;;  %v622_v40 = vpop.f32.mrf.mxu2  ;;  %v5706_v31 = vand.u32 4294901760, %v4533_v38 }
 0x161   : > { %v5683_v5 = vand.u32 4294901760, %v997_v53  ;;  %v745_v24 = vadd.f32 %v744_v10, %v618_v28  ;;  %v1142_v47 = vand.u32 4294901760, %v1141_v6  ;;  %v623_v19 = vadd.f32 %v622_v40, %v495_v41  ;;  %v4532_v10 = vld [vmem:[%s7311_s1 + $0x170] sm:$0xff] }
 0x162   : > { %1858 = vmatpush.msrb.mxu0 %v5706_v31  ;;  %2309 = vmatpush.msra.mxu3 %v5706_v31 }
 0x163   : > { %v878_v8 = vadd.f32 %v877_v44, %v745_v24  ;;  %1143 = vmatmul.f32.gmra.mxu2 %v1142_v47  ;;  %1324 = vmatmul.f32.gmra.mxu3 %v5683_v5  ;;  %v1147_v61 = vsub.f32 %v997_v53, %v5683_v5  ;;  %v5722_v47 = vand.u32 4294901760, %v4532_v10 }
 0x164   : > { %v978_v15 = vpop.f32.mrf.mxu1 }
 0x165   : > { %v975_v12 = vadd.f32 %v974_v16, %v878_v8  ;;  %1450 = vmatmul.f32.gmra.mxu0 %v1147_v61  ;;  %v1148_v51 = vand.u32 4294901760, %v1147_v61  ;;  %v5711_v16 = vsub.f32 %v4533_v38, %v5706_v31  ;;  %v5728_v40 = vsub.f32 %v4532_v10, %v5722_v47  ;;  %2311 = vmatpush.msra.mxu3 %v5722_v47 }
 0x166   : > { %v885_v20 = vpop.f32.mrf.mxu0  ;;  %1860 = vmatpush.msrb.mxu0 %v5722_v47 }
 0x167   : > { %v998_v42 = vmax.f32 %v975_v12, 0.0  ;;  %1576 = vmatmul.f32.gmra.mxu1 %v1148_v51  ;;  %v1149_v11 = vsub.f32 %v1147_v61, %v1148_v51  ;;  %v2020_v53 = vand.u32 4294901760, %v5711_v16  ;;  %2181 = vmatpush.msra.mxu2 %v5711_v16  ;;  %v7355_v41 = vand.u32 4294901760, %v5728_v40  ;;  %v4531_v51 = vld [vmem:[%s7311_s1 + $0x168] sm:$0xff] }
 0x168   : > { %v750_v34 = vpop.f32.mrf.mxu3  ;;  %v627_v25 = vpop.f32.mrf.mxu2 }
 0x169   : > { %v5689_v22 = vand.u32 4294901760, %v998_v42  ;;  %v751_v21 = vadd.f32 %v750_v34, %v623_v19  ;;  %v1150_v60 = vand.u32 4294901760, %v1149_v11  ;;  %v628_v48 = vadd.f32 %v627_v25, %v499_v4  ;;  %2184 = vmatpush.msra.mxu2 %v5728_v40 }
 0x16a   : > { %v2021_v6 = vsub.f32 %v5711_v16, %v2020_v53  ;;  %v5741_v19 = vand.u32 4294901760, %v4531_v51 }
 0x16b   : > { %v882_v56 = vadd.f32 %v881_v36, %v751_v21  ;;  %1151 = vmatmul.f32.gmra.mxu2 %v1150_v60  ;;  %1328 = vmatmul.f32.gmra.mxu3 %v5689_v22  ;;  %v1155_v58 = vsub.f32 %v998_v42, %v5689_v22  ;;  %v4530_v60 = vld [vmem:[%s7311_s1 + $0x160] sm:$0xff] }
 0x16c   : > { %v982_v49 = vpop.f32.mrf.mxu1  ;;  %v2022_v24 = vand.u32 4294901760, %v2021_v6  ;;  %1862 = vmatpush.msrb.mxu0 %v5741_v19  ;;  %v5747_v42 = vsub.f32 %v4531_v51, %v5741_v19  ;;  %2313 = vmatpush.msra.mxu3 %v5741_v19 }
 0x16d   : > { %v979_v29 = vadd.f32 %v978_v15, %v882_v56  ;;  %1455 = vmatmul.f32.gmra.mxu0 %v1155_v58  ;;  %v1156_v43 = vand.u32 4294901760, %v1155_v58 }
 0x16e   : > { %2023 = vmatpush.msrb.mxu1 %v2022_v24  ;;  %v7354_v15 = vand.u32 4294901760, %v5747_v42  ;;  %2187 = vmatpush.msra.mxu2 %v5747_v42 }
 0x16f   : > { %v999_v14 = vmax.f32 %v979_v29, 0.0  ;;  %1582 = vmatmul.f32.gmra.mxu1 %v1156_v43  ;;  %v1157_v30 = vsub.f32 %v1155_v58, %v1156_v43  ;;  %v5760_v58 = vand.u32 4294901760, %v4530_v60 }
 0x170   : > { %v756_v17 = vpop.f32.mrf.mxu3 }
 0x171   : > { %v5695_v37 = vand.u32 4294901760, %v999_v14  ;;  %v757_v45 = vadd.f32 %v756_v17, %v628_v48  ;;  %v1158_v59 = vand.u32 4294901760, %v1157_v30  ;;  %1864 = vmatpush.msrb.mxu0 %v5760_v58  ;;  %v5766_v25 = vsub.f32 %v4530_v60, %v5760_v58  ;;  %2315 = vmatpush.msra.mxu3 %v5760_v58 }
 0x173   : > { %v886_v0 = vadd.f32 %v885_v20, %v757_v45  ;;  %1159 = vmatmul.f32.gmra.mxu2 %v1158_v59  ;;  %1332 = vmatmul.f32.gmra.mxu3 %v5695_v37  ;;  %v1163_v62 = vsub.f32 %v999_v14, %v5695_v37  ;;  %v7353_v43 = vand.u32 4294901760, %v5766_v25  ;;  %v4529_v14 = vld [vmem:[%s7311_s1 + $0x158] sm:$0xff] }
 0x174   : > { %2190 = vmatpush.msra.mxu2 %v5766_v25  ;;  %v5779_v17 = vand.u32 4294901760, %v4529_v14 }
 0x175   : > { %v983_v32 = vadd.f32 %v982_v49, %v886_v0  ;;  %1460 = vmatmul.f32.gmra.mxu0 %v1163_v62  ;;  %v1164_v13 = vand.u32 4294901760, %v1163_v62 }
 0x176   : > { %1866 = vmatpush.msrb.mxu0 %v5779_v17  ;;  %v5785_v20 = vsub.f32 %v4529_v14, %v5779_v17  ;;  %2317 = vmatpush.msra.mxu3 %v5779_v17 }
 0x177   : > { %v1000_v57 = vmax.f32 %v983_v32, 0.0  ;;  %1588 = vmatmul.f32.gmra.mxu1 %v1164_v13  ;;  %v1165_v27 = vsub.f32 %v1163_v62, %v1164_v13  ;;  %v4528_v62 = vld [vmem:[%s7311_s1 + $0x150] sm:$0xff] }
 0x178   : > { %v7352_v49 = vand.u32 4294901760, %v5785_v20  ;;  %2193 = vmatpush.msra.mxu2 %v5785_v20  ;;  %v5798_v13 = vand.u32 4294901760, %v4528_v62 }
 0x179   : > { %v5699_v50 = vand.u32 4294901760, %v1000_v57  ;;  %v1166_v46 = vand.u32 4294901760, %v1165_v27 }
 0x17a   : > { %1868 = vmatpush.msrb.mxu0 %v5798_v13  ;;  %2319 = vmatpush.msra.mxu3 %v5798_v13 }
 0x17b   : > { %1167 = vmatmul.f32.gmra.mxu2 %v1166_v46  ;;  %1336 = vmatmul.f32.gmra.mxu3 %v5699_v50  ;;  %v1171_v9 = vsub.f32 %v1000_v57, %v5699_v50  ;;  %v5804_v57 = vsub.f32 %v4528_v62, %v5798_v13 }
 0x17d   : > { %1465 = vmatmul.f32.gmra.mxu0 %v1171_v9  ;;  %v1172_v44 = vand.u32 4294901760, %v1171_v9  ;;  %2196 = vmatpush.msra.mxu2 %v5804_v57 }
 0x17f   : > { %1594 = vmatmul.f32.gmra.mxu1 %v1172_v44  ;;  %v1173_v23 = vsub.f32 %v1171_v9, %v1172_v44  ;;  %v7351_v9 = vand.u32 4294901760, %v5804_v57 }
 0x181   : > { %v1174_v54 = vand.u32 4294901760, %v1173_v23  ;;  %v4527_v23 = vld [vmem:[%s7311_s1 + $0x148] sm:$0xff] }
 0x182   : > { %v5817_v38 = vand.u32 4294901760, %v4527_v23 }
 0x183   : > { %1175 = vmatmul.f32.gmra.mxu2 %v1174_v54  ;;  %1760 = vmatmul.f32.vlgmr.msrb.gmra.mxu3 %v5610_v33 }
 0x184   : > { %1870 = vmatpush.msrb.mxu0 %v5817_v38  ;;  %2321 = vmatpush.msra.mxu3 %v5817_v38 }
 0x186   : > { %v1277_v28 = vpop.f32.mrf.mxu3 }
 0x18b   : > { %1663 = vmatmul.f32.vlgmr.msrb.gmra.mxu2 %v5610_v33  ;;  %1764 = vmatmul.f32.gmra.mxu3 %v5617_v39  ;;  %v2027_v33 = vsub.f32 %v5728_v40, %v7355_v41 }
 0x18d   : > { %v2028_v36 = vand.u32 4294901760, %v2027_v33 }
 0x18e   : > { %v1056_v8 = vpop.f32.mrf.mxu2  ;;  %v1281_v61 = vpop.f32.mrf.mxu3 }
 0x18f   : > { %v5733_v12 = vadd.f32 %v1277_v28, %v1056_v8  ;;  %2029 = vmatpush.msrb.mxu1 %v2028_v36  ;;  %v5823_v28 = vsub.f32 %v4527_v23, %v5817_v38 }
 0x191   : > { %v7350_v24 = vand.u32 4294901760, %v5823_v28  ;;  %2199 = vmatpush.msra.mxu2 %v5823_v28 }
 0x193   : > { %1667 = vmatmul.f32.gmra.mxu2 %v5617_v39  ;;  %1768 = vmatmul.f32.gmra.mxu3 %v5623_v55  ;;  %v2033_v39 = vsub.f32 %v5747_v42, %v7354_v15 }
 0x195   : > { %v2034_v56 = vand.u32 4294901760, %v2033_v39 }
 0x196   : > { %v1064_v11 = vpop.f32.mrf.mxu2  ;;  %v1285_v34 = vpop.f32.mrf.mxu3 }
 0x197   : > { %v5752_v21 = vadd.f32 %v1281_v61, %v1064_v11  ;;  %2035 = vmatpush.msrb.mxu1 %v2034_v56  ;;  %v4526_v61 = vld [vmem:[%s7311_s1 + $0x140] sm:$0xff]  ;;  %v4525_v56 = vld [vmem:[%s7311_s1 + $0x138] sm:$0xff] }
 0x198   : > { %v5836_v51 = vand.u32 4294901760, %v4526_v61 }
 0x19a   : > { %1872 = vmatpush.msrb.mxu0 %v5836_v51  ;;  %v5842_v36 = vsub.f32 %v4526_v61, %v5836_v51  ;;  %2323 = vmatpush.msra.mxu3 %v5836_v51 }
 0x19b   : > { %1671 = vmatmul.f32.gmra.mxu2 %v5623_v55  ;;  %1772 = vmatmul.f32.gmra.mxu3 %v5629_v63  ;;  %v2039_v55 = vsub.f32 %v5766_v25, %v7353_v43 }
 0x19c   : > { %v7349_v39 = vand.u32 4294901760, %v5842_v36  ;;  %2202 = vmatpush.msra.mxu2 %v5842_v36 }
 0x19d   : > { %v2040_v30 = vand.u32 4294901760, %v2039_v55 }
 0x19e   : > { %v1072_v4 = vpop.f32.mrf.mxu2  ;;  %v1289_v29 = vpop.f32.mrf.mxu3 }
 0x19f   : > { %v5771_v48 = vadd.f32 %v1285_v34, %v1072_v4  ;;  %2041 = vmatpush.msrb.mxu1 %v2040_v30 }
 0x1a3   : > { %1675 = vmatmul.f32.gmra.mxu2 %v5629_v63  ;;  %1776 = vmatmul.f32.gmra.mxu3 %v5635_v26  ;;  %v2045_v63 = vsub.f32 %v5785_v20, %v7352_v49 }
 0x1a5   : > { %v2046_v32 = vand.u32 4294901760, %v2045_v63  ;;  %v4524_v63 = vld [vmem:[%s7311_s1 + $0x130] sm:$0xff] }
 0x1a6   : > { %v1080_v45 = vpop.f32.mrf.mxu2  ;;  %v1293_v59 = vpop.f32.mrf.mxu3 }
 0x1a7   : > { %v5790_v0 = vadd.f32 %v1289_v29, %v1080_v45  ;;  %2047 = vmatpush.msrb.mxu1 %v2046_v32  ;;  %v5855_v29 = vand.u32 4294901760, %v4525_v56  ;;  %v5876_v32 = vand.u32 4294901760, %v4524_v63 }
 0x1a9   : > { %1874 = vmatpush.msrb.mxu0 %v5855_v29  ;;  %v5861_v55 = vsub.f32 %v4525_v56, %v5855_v29  ;;  %2325 = vmatpush.msra.mxu3 %v5855_v29 }
 0x1ab   : > { %1679 = vmatmul.f32.gmra.mxu2 %v5635_v26  ;;  %1780 = vmatmul.f32.gmra.mxu3 %v5641_v18  ;;  %v2051_v26 = vsub.f32 %v5804_v57, %v7351_v9  ;;  %v7347_v45 = vand.u32 4294901760, %v5861_v55 }
 0x1ac   : > { %2205 = vmatpush.msra.mxu2 %v5861_v55  ;;  %1876 = vmatpush.msrb.mxu0 %v5876_v32 }
 0x1ad   : > { %v2052_v54 = vand.u32 4294901760, %v2051_v26  ;;  %2327 = vmatpush.msra.mxu3 %v5876_v32 }
 0x1ae   : > { %v1088_v27 = vpop.f32.mrf.mxu2  ;;  %v1297_v46 = vpop.f32.mrf.mxu3 }
 0x1af   : > { %v5809_v44 = vadd.f32 %v1293_v59, %v1088_v27  ;;  %2053 = vmatpush.msrb.mxu1 %v2052_v54  ;;  %v5882_v27 = vsub.f32 %v4524_v63, %v5876_v32  ;;  %v4523_v54 = vld [vmem:[%s7311_s1 + $0x128] sm:$0xff] }
 0x1b1   : > { %v7346_v23 = vand.u32 4294901760, %v5882_v27  ;;  %2208 = vmatpush.msra.mxu2 %v5882_v27 }
 0x1b3   : > { %1683 = vmatmul.f32.gmra.mxu2 %v5641_v18  ;;  %1784 = vmatmul.f32.gmra.mxu3 %v5647_v2  ;;  %v2057_v18 = vsub.f32 %v5823_v28, %v7350_v24  ;;  %v5986_v24 = vpop.f32.mrf.mxu1 }
 0x1b5   : > { %v2058_v33 = vand.u32 4294901760, %v2057_v18 }
 0x1b6   : > { %v1096_v6 = vpop.f32.mrf.mxu2  ;;  %v1301_v10 = vpop.f32.mrf.mxu3 }
 0x1b7   : > { %v5828_v8 = vadd.f32 %v1297_v46, %v1096_v6  ;;  %2059 = vmatpush.msrb.mxu1 %v2058_v33 }
 0x1bb   : > { %1687 = vmatmul.f32.gmra.mxu2 %v5647_v2  ;;  %1788 = vmatmul.f32.gmra.mxu3 %v5653_v52  ;;  %v2063_v2 = vsub.f32 %v5842_v36, %v7349_v39 }
 0x1bd   : > { %v2064_v4 = vand.u32 4294901760, %v2063_v2 }
 0x1be   : > { %v1104_v11 = vpop.f32.mrf.mxu2  ;;  %v1305_v34 = vpop.f32.mrf.mxu3 }
 0x1bf   : > { %v5847_v60 = vadd.f32 %v1301_v10, %v1104_v11  ;;  %2065 = vmatpush.msrb.mxu1 %v2064_v4  ;;  %v5897_v10 = vand.u32 4294901760, %v4523_v54 }
 0x1c1   : > { %1878 = vmatpush.msrb.mxu0 %v5897_v10  ;;  %v5903_v18 = vsub.f32 %v4523_v54, %v5897_v10  ;;  %2329 = vmatpush.msra.mxu3 %v5897_v10 }
 0x1c3   : > { %1691 = vmatmul.f32.gmra.mxu2 %v5653_v52  ;;  %1792 = vmatmul.f32.gmra.mxu3 %v5659_v7  ;;  %v2069_v52 = vsub.f32 %v5861_v55, %v7347_v45  ;;  %v7345_v11 = vand.u32 4294901760, %v5903_v18 }
 0x1c4   : > { %2211 = vmatpush.msra.mxu2 %v5903_v18 }
 0x1c5   : > { %v2070_v62 = vand.u32 4294901760, %v2069_v52 }
 0x1c6   : > { %v1112_v14 = vpop.f32.mrf.mxu2  ;;  %v5864_v30 = vpop.f32.mrf.mxu3 }
 0x1c7   : > { %v5868_v59 = vadd.f32 %v1305_v34, %v1112_v14  ;;  %2071 = vmatpush.msrb.mxu1 %v2070_v62  ;;  %v4522_v34 = vld [vmem:[%s7311_s1 + $0x120] sm:$0xff]  ;;  %v4521_v62 = vld [vmem:[%s7311_s1 + $0x118] sm:$0xff] }
 0x1c8   : > { %v5918_v56 = vand.u32 4294901760, %v4522_v34  ;;  %v5939_v54 = vand.u32 4294901760, %v4521_v62 }
 0x1ca   : > { %1880 = vmatpush.msrb.mxu0 %v5918_v56  ;;  %v5924_v4 = vsub.f32 %v4522_v34, %v5918_v56  ;;  %2331 = vmatpush.msra.mxu3 %v5918_v56 }
 0x1cb   : > { %1695 = vmatmul.f32.gmra.mxu2 %v5659_v7  ;;  %1796 = vmatmul.f32.gmra.mxu3 %v5665_v35  ;;  %v2075_v7 = vsub.f32 %v5882_v27, %v7346_v23 }
 0x1cc   : > { %v7344_v63 = vand.u32 4294901760, %v5924_v4  ;;  %2214 = vmatpush.msra.mxu2 %v5924_v4  ;;  %1882 = vmatpush.msrb.mxu0 %v5939_v54 }
 0x1cd   : > { %v2076_v6 = vand.u32 4294901760, %v2075_v7  ;;  %2333 = vmatpush.msra.mxu3 %v5939_v54 }
 0x1ce   : > { %v5885_v46 = vpop.f32.mrf.mxu2  ;;  %v5887_v26 = vpop.f32.mrf.mxu3 }
 0x1cf   : > { %2077 = vmatpush.msrb.mxu1 %v2076_v6  ;;  %v5945_v6 = vsub.f32 %v4521_v62, %v5939_v54 }
 0x1d1   : > { %2217 = vmatpush.msra.mxu2 %v5945_v6 }
 0x1d3   : > { %1699 = vmatmul.f32.gmra.mxu2 %v5665_v35  ;;  %1800 = vmatmul.f32.gmra.mxu3 %v5671_v1  ;;  %v2081_v35 = vsub.f32 %v5903_v18, %v7345_v11 }
 0x1d5   : > { %v2082_v2 = vand.u32 4294901760, %v2081_v35 }
 0x1d6   : > { %v5906_v61 = vpop.f32.mrf.mxu2  ;;  %v5908_v33 = vpop.f32.mrf.mxu3 }
 0x1d7   : > { %2083 = vmatpush.msrb.mxu1 %v2082_v2  ;;  %v7348_v2 = vand.u32 4294901760, %v5945_v6 }
 0x1db   : > { %1703 = vmatmul.f32.gmra.mxu2 %v5671_v1  ;;  %1804 = vmatmul.f32.gmra.mxu3 %v5677_v3  ;;  %v2087_v1 = vsub.f32 %v5924_v4, %v7344_v63  ;;  %v4519_v63 = vld [vmem:[%s7311_s1 + $0x108] sm:$0xff] }
 0x1dc   : > { %v5971_v45 = vand.u32 4294901760, %v4519_v63 }
 0x1dd   : > { %v2088_v7 = vand.u32 4294901760, %v2087_v1  ;;  %v2093_v1 = vsub.f32 %v5945_v6, %v7348_v2  ;;  %v4518_v2 = vld [vmem:[%s7311_s1 + $0x100] sm:$0xff] }
 0x1de   : > { %v5927_v14 = vpop.f32.mrf.mxu2  ;;  %v5929_v52 = vpop.f32.mrf.mxu3  ;;  %v5984_v39 = vand.u32 4294901760, %v4518_v2 }
 0x1df   : > { %2089 = vmatpush.msrb.mxu1 %v2088_v7  ;;  %v5962_v7 = vpop.f32.mrf.mxu0  ;;  %v2094_v11 = vand.u32 4294901760, %v2093_v1 }
 0x1e1   : > { %2095 = vmatpush.msrb.mxu1 %v2094_v11 }
 0x1e3   : > { %1707 = vmatmul.f32.gmra.mxu2 %v5677_v3  ;;  %1808 = vmatmul.f32.gmra.mxu3 %v5683_v5  ;;  %v4520_v3 = vld [vmem:[%s7311_s1 + $0x110] sm:$0xff] }
 0x1e4   : > { %v5960_v62 = vand.u32 4294901760, %v4520_v3 }
 0x1e6   : > { %v5948_v35 = vpop.f32.mrf.mxu2  ;;  %v5950_v34 = vpop.f32.mrf.mxu3  ;;  %1884 = vmatpush.msrb.mxu0 %v5960_v62  ;;  %v5969_v23 = vsub.f32 %v4520_v3, %v5960_v62  ;;  %2335 = vmatpush.msra.mxu3 %v5960_v62  ;;  %v5982_v3 = vsub.f32 %v4519_v63, %v5971_v45  ;;  %v2109_v63 = vsub.f32 %v4518_v2, %v5984_v39 }
 0x1e7   : > { %7428 = vst [vmem:[#allocation2_spill] sm:$0xff] %v5950_v34  ;;  %v7431_v34 = vand.u32 4294901760, %v5728_v40  ;;  %v1396_v2 = vpop.f32.mrf.mxu0  ;;  %v1511_v40 = vpop.f32.mrf.mxu1 }
 0x1e8   : > { %v7356_v1 = vand.u32 4294901760, %v5969_v23  ;;  %1886 = vmatpush.msrb.mxu0 %v5971_v45  ;;  %2220 = vmatpush.msra.mxu2 %v5969_v23  ;;  %v2104_v49 = vand.u32 4294901760, %v5982_v3  ;;  %v2110_v41 = vand.u32 4294901760, %v2109_v63 }
 0x1e9   : > { %2337 = vmatpush.msra.mxu3 %v5971_v45 }
 0x1ea   : > { %v2099_v11 = vsub.f32 %v5969_v23, %v7356_v1  ;;  %1888 = vmatpush.msrb.mxu0 %v5984_v39  ;;  %2223 = vmatpush.msra.mxu2 %v5982_v3  ;;  %v2105_v15 = vsub.f32 %v5982_v3, %v2104_v49  ;;  %v7432_v3 = vand.u32 4294901760, %v5747_v42  ;;  %v7436_v42 = vand.u32 4294901760, %v5823_v28 }
 0x1eb   : > { %1711 = vmatmul.f32.gmra.mxu2 %v5683_v5  ;;  %1812 = vmatmul.f32.gmra.mxu3 %v5689_v22 }
 0x1ec   : > { %2339 = vmatpush.msra.mxu3 %v5984_v39  ;;  %v2100_v43 = vand.u32 4294901760, %v2099_v11  ;;  %2440 = vmatpush.msra.mxu0 %v2020_v53  ;;  %v2106_v1 = vand.u32 4294901760, %v2105_v15  ;;  %v7433_v53 = vand.u32 4294901760, %v5766_v25  ;;  %v7435_v15 = vand.u32 4294901760, %v5804_v57 }
 0x1ed   : > { %2226 = vmatpush.msra.mxu2 %v2109_v63 }
 0x1ee   : > { %v5990_v5 = vpop.f32.mrf.mxu2  ;;  %v5992_v9 = vpop.f32.mrf.mxu3  ;;  %2101 = vmatpush.msrb.mxu1 %v2100_v43  ;;  %2444 = vmatpush.msra.mxu0 %v7431_v34 }
 0x1ef   : > { %7429 = vst [vmem:[#allocation4_spill] sm:$0xff] %v5990_v5  ;;  %v1401_v25 = vpop.f32.mrf.mxu0 }
 0x1f0   : > { %7430 = vst [vmem:[#allocation3_spill] sm:$0xff] %v5992_v9  ;;  %v2111_v9 = vsub.f32 %v2109_v63, %v2110_v41  ;;  %2107 = vmatpush.msrb.mxu1 %v2106_v1  ;;  %2448 = vmatpush.msra.mxu0 %v7432_v3 }
 0x1f2   : > { %v2112_v11 = vand.u32 4294901760, %v2111_v9  ;;  %2452 = vmatpush.msra.mxu0 %v7433_v53 }
 0x1f3   : > { %1715 = vmatmul.f32.gmra.mxu2 %v5689_v22  ;;  %1816 = vmatmul.f32.gmra.mxu3 %v5695_v37  ;;  %v7434_v22 = vand.u32 4294901760, %v5785_v20  ;;  %v1517_v20 = vpop.f32.mrf.mxu1 }
 0x1f4   : > { %2113 = vmatpush.msrb.mxu1 %v2112_v11 }
 0x1f5   : > { %2456 = vmatpush.msra.mxu0 %v7434_v22 }
 0x1f6   : > { %v6011_v5 = vpop.f32.mrf.mxu2  ;;  %v6013_v16 = vpop.f32.mrf.mxu3  ;;  %2567 = vmatpush.msra.mxu1 %v5706_v31 }
 0x1f7   : > { %2460 = vmatpush.msra.mxu0 %v7435_v15  ;;  %v1406_v28 = vpop.f32.mrf.mxu0 }
 0x1f8   : > { %2569 = vmatpush.msra.mxu1 %v5722_v47  ;;  %v7437_v47 = vand.u32 4294901760, %v5842_v36 }
 0x1f9   : > { %2464 = vmatpush.msra.mxu0 %v7436_v42 }
 0x1fa   : > { %2571 = vmatpush.msra.mxu1 %v5741_v19  ;;  %v7439_v19 = vand.u32 4294901760, %v5882_v27 }
 0x1fb   : > { %1719 = vmatmul.f32.gmra.mxu2 %v5695_v37  ;;  %1820 = vmatmul.f32.gmra.mxu3 %v5699_v50  ;;  %v7438_v37 = vand.u32 4294901760, %v5861_v55  ;;  %v1523_v36 = vpop.f32.mrf.mxu1 }
 0x1fc   : > { %2573 = vmatpush.msra.mxu1 %v5760_v58  ;;  %2468 = vmatpush.msra.mxu0 %v7437_v47  ;;  %v7440_v58 = vand.u32 4294901760, %v5903_v18 }
 0x1fe   : > { %v6028_v43 = vpop.f32.mrf.mxu2  ;;  %v6030_v31 = vpop.f32.mrf.mxu3  ;;  %2575 = vmatpush.msra.mxu1 %v5779_v17  ;;  %2472 = vmatpush.msra.mxu0 %v7438_v37  ;;  %v7441_v17 = vand.u32 4294901760, %v5924_v4 }
 0x200   : > { %2577 = vmatpush.msra.mxu1 %v5798_v13  ;;  %2476 = vmatpush.msra.mxu0 %v7439_v19  ;;  %v7442_v13 = vand.u32 4294901760, %v5945_v6 }
 0x202   : > { %2579 = vmatpush.msra.mxu1 %v5817_v38  ;;  %2480 = vmatpush.msra.mxu0 %v7440_v58  ;;  %v7443_v38 = vand.u32 4294901760, %v5969_v23 }
 0x203   : > { %1723 = vmatmul.f32.gmra.mxu2 %v5699_v50  ;;  %v1392_v50 = vadd.f32 %v5962_v7, %v5733_v12  ;;  %v1397_v12 = vadd.f32 %v1396_v2, %v5752_v21  ;;  %v1402_v21 = vadd.f32 %v1401_v25, %v5771_v48 }
 0x204   : > { %2581 = vmatpush.msra.mxu1 %v5836_v51  ;;  %2484 = vmatpush.msra.mxu0 %v7441_v17 }
 0x205   : > { %v1506_v51 = vadd.f32 %v5986_v24, %v1392_v50  ;;  %v1512_v24 = vadd.f32 %v1511_v40, %v1397_v12  ;;  %v1518_v2 = vadd.f32 %v1517_v20, %v1402_v21  ;;  %v1407_v40 = vadd.f32 %v1406_v28, %v5790_v0 }
 0x206   : > { %v6045_v57 = vpop.f32.mrf.mxu2  ;;  %v1761_v9 = vpop.f32.mrf.mxu3  ;;  %2583 = vmatpush.msra.mxu1 %v5855_v29  ;;  %2488 = vmatpush.msra.mxu0 %v7442_v13 }
 0x207   : > { %v1524_v20 = vadd.f32 %v1523_v36, %v1407_v40 }
 0x208   : > { %2585 = vmatpush.msra.mxu1 %v5876_v32  ;;  %2492 = vmatpush.msra.mxu0 %v7443_v38  ;;  %v1411_v32 = vpop.f32.mrf.mxu0 }
 0x209   : > { %v1412_v0 = vadd.f32 %v1411_v32, %v5809_v44 }
 0x20a   : > { %2587 = vmatpush.msra.mxu1 %v5897_v10  ;;  %2496 = vmatpush.msra.mxu0 %v2104_v49  ;;  %v1529_v49 = vpop.f32.mrf.mxu1 }
 0x20b   : > { %v1530_v36 = vadd.f32 %v1529_v49, %v1412_v0  ;;  %v1310_v0 = vadd.f32 %v5864_v30, %v5885_v46 }
 0x20c   : > { %2589 = vmatpush.msra.mxu1 %v5918_v56  ;;  %2500 = vmatpush.msra.mxu0 %v2110_v41 }
 0x20e   : > { %v1664_v55 = vpop.f32.mrf.mxu2  ;;  %v1765_v27 = vpop.f32.mrf.mxu3  ;;  %2591 = vmatpush.msra.mxu1 %v5939_v54 }
 0x20f   : > { %v1665_v29 = vadd.f32 %v1664_v55, %v1506_v51 }
 0x210   : > { %2593 = vmatpush.msra.mxu1 %v5960_v62  ;;  %v1416_v62 = vpop.f32.mrf.mxu0 }
 0x211   : > { %v1762_v18 = vadd.f32 %v1761_v9, %v1665_v29  ;;  %v1417_v32 = vadd.f32 %v1416_v62, %v5828_v8 }
 0x212   : > { %2595 = vmatpush.msra.mxu1 %v5971_v45  ;;  %v1535_v3 = vpop.f32.mrf.mxu1 }
 0x213   : > { %v1824_v23 = vmax.f32 %v1762_v18, 0.0 }
 0x214   : > { %2597 = vmatpush.msra.mxu1 %v5984_v39 }
 0x215   : > { %v6065_v10 = vand.u32 4294901760, %v1824_v23 }
 0x216   : > { %v1668_v4 = vpop.f32.mrf.mxu2  ;;  %v1769_v6 = vpop.f32.mrf.mxu3 }
 0x217   : > { %v1890_v41 = vsub.f32 %v1824_v23, %v6065_v10  ;;  %v1669_v56 = vadd.f32 %v1668_v4, %v1512_v24  ;;  %2115 = vmatmul.f32.vlgmr.msrb.gmra.mxu1 %v6065_v10 }
 0x218   : > { %v1421_v47 = vpop.f32.mrf.mxu0 }
 0x219   : > { %v1891_v54 = vand.u32 4294901760, %v1890_v41  ;;  %v1766_v34 = vadd.f32 %v1765_v27, %v1669_v56  ;;  %2229 = vmatmul.f32.vlgmr.msra.gmra.mxu2 %v1890_v41  ;;  %v1422_v8 = vadd.f32 %v1421_v47, %v5847_v60 }
 0x21a   : > { %v1541_v28 = vpop.f32.mrf.mxu1 }
 0x21b   : > { %v1892_v45 = vsub.f32 %v1890_v41, %v1891_v54  ;;  %v1825_v7 = vmax.f32 %v1766_v34, 0.0  ;;  %2343 = vmatmul.f32.vlgmr.msra.gmra.mxu3 %v1891_v54  ;;  %v1536_v54 = vadd.f32 %v1535_v3, %v1417_v32 }
 0x21d   : > { %v1893_v1 = vand.u32 4294901760, %v1892_v45  ;;  %v6071_v63 = vand.u32 4294901760, %v1825_v7 }
 0x21e   : > { %v1672_v11 = vpop.f32.mrf.mxu2  ;;  %v1773_v39 = vpop.f32.mrf.mxu3 }
 0x21f   : > { %v1673_v53 = vadd.f32 %v1672_v11, %v1518_v2  ;;  %1894 = vmatmul.f32.vlgmr.msrb.gmra.mxu0 %v1893_v1  ;;  %2119 = vmatmul.f32.gmra.mxu1 %v6071_v63  ;;  %v1898_v48 = vsub.f32 %v1825_v7, %v6071_v63 }
 0x220   : > { %v1426_v23 = vpop.f32.mrf.mxu0 }
 0x221   : > { %v1770_v22 = vadd.f32 %v1769_v6, %v1673_v53  ;;  %2234 = vmatmul.f32.gmra.mxu2 %v1898_v48  ;;  %v1899_v15 = vand.u32 4294901760, %v1898_v48  ;;  %v1427_v47 = vadd.f32 %v1426_v23, %v5868_v59 }
 0x222   : > { %v1547_v41 = vpop.f32.mrf.mxu1 }
 0x223   : > { %v1826_v42 = vmax.f32 %v1770_v22, 0.0  ;;  %2349 = vmatmul.f32.gmra.mxu3 %v1899_v15  ;;  %v1900_v25 = vsub.f32 %v1898_v48, %v1899_v15  ;;  %v1542_v22 = vadd.f32 %v1541_v28, %v1422_v8 }
 0x225   : > { %v6076_v37 = vand.u32 4294901760, %v1826_v42  ;;  %v1901_v19 = vand.u32 4294901760, %v1900_v25 }
 0x226   : > { %v1676_v58 = vpop.f32.mrf.mxu2  ;;  %v1777_v9 = vpop.f32.mrf.mxu3 }
 0x227   : > { %v1677_v17 = vadd.f32 %v1676_v58, %v1524_v20  ;;  %1902 = vmatmul.f32.gmra.mxu0 %v1901_v19  ;;  %2123 = vmatmul.f32.gmra.mxu1 %v6076_v37  ;;  %v1906_v13 = vsub.f32 %v1826_v42, %v6076_v37 }
 0x228   : > { %v1431_v62 = vpop.f32.mrf.mxu0 }
 0x229   : > { %v1774_v50 = vadd.f32 %v1773_v39, %v1677_v17  ;;  %2239 = vmatmul.f32.gmra.mxu2 %v1906_v13  ;;  %v1907_v38 = vand.u32 4294901760, %v1906_v13 }
 0x22a   : > { %v1553_v40 = vpop.f32.mrf.mxu1 }
 0x22b   : > { %v1827_v51 = vmax.f32 %v1774_v50, 0.0  ;;  %2355 = vmatmul.f32.gmra.mxu3 %v1907_v38  ;;  %v1908_v55 = vsub.f32 %v1906_v13, %v1907_v38  ;;  %v1548_v50 = vadd.f32 %v1547_v41, %v1427_v47 }
 0x22d   : > { %v6081_v27 = vand.u32 4294901760, %v1827_v51  ;;  %v1909_v29 = vand.u32 4294901760, %v1908_v55 }
 0x22e   : > { %v1680_v12 = vpop.f32.mrf.mxu2  ;;  %v1781_v18 = vpop.f32.mrf.mxu3 }
 0x22f   : > { %v1681_v24 = vadd.f32 %v1680_v12, %v1530_v36  ;;  %1910 = vmatmul.f32.gmra.mxu0 %v1909_v29  ;;  %2127 = vmatmul.f32.gmra.mxu1 %v6081_v27  ;;  %v1914_v44 = vsub.f32 %v1827_v51, %v6081_v27  ;;  %v1432_v12 = vadd.f32 %v1431_v62, %v1310_v0 }
 0x231   : > { %v1778_v4 = vadd.f32 %v1777_v9, %v1681_v24  ;;  %2244 = vmatmul.f32.gmra.mxu2 %v1914_v44  ;;  %v1915_v6 = vand.u32 4294901760, %v1914_v44  ;;  %v1436_v9 = vpop.f32.mrf.mxu0 }
 0x232   : > { %v1559_v29 = vpop.f32.mrf.mxu1 }
 0x233   : > { %v1828_v56 = vmax.f32 %v1778_v4, 0.0  ;;  %2361 = vmatmul.f32.gmra.mxu3 %v1915_v6  ;;  %v1916_v21 = vsub.f32 %v1914_v44, %v1915_v6  ;;  %v1314_v44 = vadd.f32 %v5887_v26, %v5906_v61  ;;  %v1554_v4 = vadd.f32 %v1553_v40, %v1432_v12 }
 0x234   : > { %v1318_v61 = vadd.f32 %v5908_v33, %v5927_v14 }
 0x235   : > { %v6086_v49 = vand.u32 4294901760, %v1828_v56  ;;  %v1917_v34 = vand.u32 4294901760, %v1916_v21 }
 0x236   : > { %v1684_v45 = vpop.f32.mrf.mxu2  ;;  %v1785_v7 = vpop.f32.mrf.mxu3 }
 0x237   : > { %v1685_v1 = vadd.f32 %v1684_v45, %v1536_v54  ;;  %1918 = vmatmul.f32.gmra.mxu0 %v1917_v34  ;;  %2131 = vmatmul.f32.gmra.mxu1 %v6086_v49  ;;  %v1922_v2 = vsub.f32 %v1828_v56, %v6086_v49  ;;  %v1437_v34 = vadd.f32 %v1436_v9, %v1314_v44 }
 0x239   : > { %v1782_v11 = vadd.f32 %v1781_v18, %v1685_v1  ;;  %2249 = vmatmul.f32.gmra.mxu2 %v1922_v2  ;;  %v1923_v39 = vand.u32 4294901760, %v1922_v2  ;;  %v1441_v46 = vpop.f32.mrf.mxu0  ;;  %v1560_v62 = vadd.f32 %v1559_v29, %v1437_v34 }
 0x23a   : > { %v1565_v1 = vpop.f32.mrf.mxu1 }
 0x23b   : > { %v1829_v53 = vmax.f32 %v1782_v11, 0.0  ;;  %2367 = vmatmul.f32.gmra.mxu3 %v1923_v39  ;;  %v1924_v48 = vsub.f32 %v1922_v2, %v1923_v39 }
 0x23d   : > { %v6091_v3 = vand.u32 4294901760, %v1829_v53  ;;  %v1925_v15 = vand.u32 4294901760, %v1924_v48 }
 0x23e   : > { %v1688_v42 = vpop.f32.mrf.mxu2  ;;  %v1789_v25 = vpop.f32.mrf.mxu3 }
 0x23f   : > { %v1689_v20 = vadd.f32 %v1688_v42, %v1542_v22  ;;  %1926 = vmatmul.f32.gmra.mxu0 %v1925_v15  ;;  %2135 = vmatmul.f32.gmra.mxu1 %v6091_v3  ;;  %v1930_v60 = vsub.f32 %v1829_v53, %v6091_v3  ;;  %v1442_v15 = vadd.f32 %v1441_v46, %v1318_v61 }
 0x241   : > { %v1786_v19 = vadd.f32 %v1785_v7, %v1689_v20  ;;  %2254 = vmatmul.f32.gmra.mxu2 %v1930_v60  ;;  %v1931_v58 = vand.u32 4294901760, %v1930_v60  ;;  %v1446_v22 = vpop.f32.mrf.mxu0 }
 0x242   : > { %v1571_v14 = vpop.f32.mrf.mxu1 }
 0x243   : > { %v1830_v17 = vmax.f32 %v1786_v19, 0.0  ;;  %2373 = vmatmul.f32.gmra.mxu3 %v1931_v58  ;;  %v1932_v13 = vsub.f32 %v1930_v60, %v1931_v58  ;;  %v1322_v60 = vadd.f32 %v5929_v52, %v5948_v35  ;;  %v1566_v19 = vadd.f32 %v1565_v1, %v1442_v15  ;;  %v7444_v35 = vld [vmem:[#allocation4_spill] sm:$0xff] }
 0x245   : > { %v6098_v28 = vand.u32 4294901760, %v1830_v17  ;;  %v1933_v38 = vand.u32 4294901760, %v1932_v13 }
 0x246   : > { %v1692_v51 = vpop.f32.mrf.mxu2  ;;  %v1793_v55 = vpop.f32.mrf.mxu3 }
 0x247   : > { %v1693_v36 = vadd.f32 %v1692_v51, %v1548_v50  ;;  %1934 = vmatmul.f32.gmra.mxu0 %v1933_v38  ;;  %2139 = vmatmul.f32.gmra.mxu1 %v6098_v28  ;;  %v1938_v59 = vsub.f32 %v1830_v17, %v6098_v28  ;;  %v1447_v50 = vadd.f32 %v1446_v22, %v1322_v60 }
 0x249   : > { %v1790_v18 = vadd.f32 %v1789_v25, %v1693_v36  ;;  %2259 = vmatmul.f32.gmra.mxu2 %v1938_v59  ;;  %v1939_v23 = vand.u32 4294901760, %v1938_v59 }
 0x24b   : > { %v1831_v24 = vmax.f32 %v1790_v18, 0.0  ;;  %2379 = vmatmul.f32.gmra.mxu3 %v1939_v23  ;;  %v1940_v30 = vsub.f32 %v1938_v59, %v1939_v23  ;;  %v7445_v59 = vld [vmem:[#allocation2_spill] sm:$0xff]  ;;  %v1572_v18 = vadd.f32 %v1571_v14, %v1447_v50 }
 0x24c   : > { %v1326_v29 = vadd.f32 %v7445_v59, %v7444_v35 }
 0x24d   : > { %v6104_v32 = vand.u32 4294901760, %v1831_v24  ;;  %v1941_v6 = vand.u32 4294901760, %v1940_v30 }
 0x24e   : > { %v1696_v41 = vpop.f32.mrf.mxu2  ;;  %v1797_v56 = vpop.f32.mrf.mxu3 }
 0x24f   : > { %v1697_v21 = vadd.f32 %v1696_v41, %v1554_v4  ;;  %1942 = vmatmul.f32.gmra.mxu0 %v1941_v6  ;;  %2143 = vmatmul.f32.gmra.mxu1 %v6104_v32  ;;  %v1946_v54 = vsub.f32 %v1831_v24, %v6104_v32  ;;  %v1577_v24 = vpop.f32.mrf.mxu1 }
 0x251   : > { %v1794_v45 = vadd.f32 %v1793_v55, %v1697_v21  ;;  %2264 = vmatmul.f32.gmra.mxu2 %v1946_v54  ;;  %v1947_v7 = vand.u32 4294901760, %v1946_v54  ;;  %v1451_v55 = vpop.f32.mrf.mxu0 }
 0x252   : > { %v1452_v4 = vadd.f32 %v1451_v55, %v1326_v29 }
 0x253   : > { %v1832_v2 = vmax.f32 %v1794_v45, 0.0  ;;  %2385 = vmatmul.f32.gmra.mxu3 %v1947_v7  ;;  %v1948_v26 = vsub.f32 %v1946_v54, %v1947_v7  ;;  %v7446_v45 = vld [vmem:[#allocation3_spill] sm:$0xff] }
 0x254   : > { %v1330_v7 = vadd.f32 %v7446_v45, %v6011_v5 }
 0x255   : > { %v6110_v8 = vand.u32 4294901760, %v1832_v2  ;;  %v1949_v11 = vand.u32 4294901760, %v1948_v26 }
 0x256   : > { %v1700_v39 = vpop.f32.mrf.mxu2  ;;  %v1801_v53 = vpop.f32.mrf.mxu3 }
 0x257   : > { %v1701_v48 = vadd.f32 %v1700_v39, %v1560_v62  ;;  %1950 = vmatmul.f32.gmra.mxu0 %v1949_v11  ;;  %2147 = vmatmul.f32.gmra.mxu1 %v6110_v8  ;;  %v1954_v40 = vsub.f32 %v1832_v2, %v6110_v8  ;;  %v1578_v2 = vadd.f32 %v1577_v24, %v1452_v4  ;;  %v1583_v39 = vpop.f32.mrf.mxu1 }
 0x259   : > { %v1798_v42 = vadd.f32 %v1797_v56, %v1701_v48  ;;  %2269 = vmatmul.f32.gmra.mxu2 %v1954_v40  ;;  %v1955_v25 = vand.u32 4294901760, %v1954_v40  ;;  %v1456_v34 = vpop.f32.mrf.mxu0 }
 0x25b   : > { %v1833_v20 = vmax.f32 %v1798_v42, 0.0  ;;  %2391 = vmatmul.f32.gmra.mxu3 %v1955_v25  ;;  %v1956_v33 = vsub.f32 %v1954_v40, %v1955_v25  ;;  %v1334_v42 = vadd.f32 %v6013_v16, %v6028_v43  ;;  %v1338_v43 = vadd.f32 %v6030_v31, %v6045_v57 }
 0x25d   : > { %v6116_v47 = vand.u32 4294901760, %v1833_v20  ;;  %v1957_v58 = vand.u32 4294901760, %v1956_v33 }
 0x25e   : > { %v1704_v9 = vpop.f32.mrf.mxu2  ;;  %v1805_v0 = vpop.f32.mrf.mxu3 }
 0x25f   : > { %v1705_v17 = vadd.f32 %v1704_v9, %v1566_v19  ;;  %1958 = vmatmul.f32.gmra.mxu0 %v1957_v58  ;;  %2151 = vmatmul.f32.gmra.mxu1 %v6116_v47  ;;  %v1962_v13 = vsub.f32 %v1833_v20, %v6116_v47 }
 0x261   : > { %v1802_v38 = vadd.f32 %v1801_v53, %v1705_v17  ;;  %2274 = vmatmul.f32.gmra.mxu2 %v1962_v13  ;;  %v1963_v51 = vand.u32 4294901760, %v1962_v13  ;;  %v1457_v53 = vadd.f32 %v1456_v34, %v1330_v7  ;;  %v1461_v14 = vpop.f32.mrf.mxu0 }
 0x262   : > { %v1462_v9 = vadd.f32 %v1461_v14, %v1334_v42 }
 0x263   : > { %v1834_v36 = vmax.f32 %v1802_v38, 0.0  ;;  %2397 = vmatmul.f32.gmra.mxu3 %v1963_v51  ;;  %v1964_v52 = vsub.f32 %v1962_v13, %v1963_v51  ;;  %v1584_v20 = vadd.f32 %v1583_v39, %v1457_v53 }
 0x265   : > { %v6122_v12 = vand.u32 4294901760, %v1834_v36  ;;  %v1965_v23 = vand.u32 4294901760, %v1964_v52 }
 0x266   : > { %v1708_v30 = vpop.f32.mrf.mxu2  ;;  %v1809_v56 = vpop.f32.mrf.mxu3 }
 0x267   : > { %v1709_v46 = vadd.f32 %v1708_v30, %v1572_v18  ;;  %1966 = vmatmul.f32.gmra.mxu0 %v1965_v23  ;;  %2155 = vmatmul.f32.gmra.mxu1 %v6122_v12  ;;  %v1970_v44 = vsub.f32 %v1834_v36, %v6122_v12 }
 0x269   : > { %v1806_v6 = vadd.f32 %v1805_v0, %v1709_v46  ;;  %2279 = vmatmul.f32.gmra.mxu2 %v1970_v44  ;;  %v1971_v41 = vand.u32 4294901760, %v1970_v44  ;;  %v1589_v0 = vpop.f32.mrf.mxu1  ;;  %v1466_v29 = vpop.f32.mrf.mxu0 }
 0x26a   : > { %v1590_v51 = vadd.f32 %v1589_v0, %v1462_v9  ;;  %v1467_v18 = vadd.f32 %v1466_v29, %v1338_v43 }
 0x26b   : > { %v1835_v21 = vmax.f32 %v1806_v6, 0.0  ;;  %2403 = vmatmul.f32.gmra.mxu3 %v1971_v41  ;;  %v1972_v54 = vsub.f32 %v1970_v44, %v1971_v41 }
 0x26d   : > { %v6128_v1 = vand.u32 4294901760, %v1835_v21  ;;  %v1973_v26 = vand.u32 4294901760, %v1972_v54 }
 0x26e   : > { %v1712_v61 = vpop.f32.mrf.mxu2  ;;  %v1813_v5 = vpop.f32.mrf.mxu3 }
 0x26f   : > { %v1713_v62 = vadd.f32 %v1712_v61, %v1578_v2  ;;  %1974 = vmatmul.f32.gmra.mxu0 %v1973_v26  ;;  %2159 = vmatmul.f32.gmra.mxu1 %v6128_v1  ;;  %v1978_v11 = vsub.f32 %v1835_v21, %v6128_v1 }
 0x271   : > { %v1810_v48 = vadd.f32 %v1809_v56, %v1713_v62  ;;  %2284 = vmatmul.f32.gmra.mxu2 %v1978_v11  ;;  %v1979_v40 = vand.u32 4294901760, %v1978_v11  ;;  %v1595_v57 = vpop.f32.mrf.mxu1 }
 0x272   : > { %v1596_v44 = vadd.f32 %v1595_v57, %v1467_v18 }
 0x273   : > { %v1836_v22 = vmax.f32 %v1810_v48, 0.0  ;;  %2409 = vmatmul.f32.gmra.mxu3 %v1979_v40  ;;  %v1980_v15 = vsub.f32 %v1978_v11, %v1979_v40 }
 0x275   : > { %v6134_v25 = vand.u32 4294901760, %v1836_v22  ;;  %v1981_v33 = vand.u32 4294901760, %v1980_v15 }
 0x276   : > { %v1716_v60 = vpop.f32.mrf.mxu2  ;;  %v1817_v36 = vpop.f32.mrf.mxu3 }
 0x277   : > { %v1717_v19 = vadd.f32 %v1716_v60, %v1584_v20  ;;  %1982 = vmatmul.f32.gmra.mxu0 %v1981_v33  ;;  %2163 = vmatmul.f32.gmra.mxu1 %v6134_v25  ;;  %v1986_v58 = vsub.f32 %v1836_v22, %v6134_v25 }
 0x279   : > { %v1814_v17 = vadd.f32 %v1813_v5, %v1717_v19  ;;  %2289 = vmatmul.f32.gmra.mxu2 %v1986_v58  ;;  %v1987_v13 = vand.u32 4294901760, %v1986_v58 }
 0x27b   : > { %v1837_v50 = vmax.f32 %v1814_v17, 0.0  ;;  %2415 = vmatmul.f32.gmra.mxu3 %v1987_v13  ;;  %v1988_v16 = vsub.f32 %v1986_v58, %v1987_v13 }
 0x27d   : > { %v6140_v38 = vand.u32 4294901760, %v1837_v50  ;;  %v1989_v55 = vand.u32 4294901760, %v1988_v16 }
 0x27e   : > { %v1720_v52 = vpop.f32.mrf.mxu2  ;;  %v1821_v21 = vpop.f32.mrf.mxu3 }
 0x27f   : > { %v1721_v35 = vadd.f32 %v1720_v52, %v1590_v51  ;;  %1990 = vmatmul.f32.gmra.mxu0 %v1989_v55  ;;  %2167 = vmatmul.f32.gmra.mxu1 %v6140_v38  ;;  %v1994_v59 = vsub.f32 %v1837_v50, %v6140_v38 }
 0x281   : > { %v1818_v23 = vadd.f32 %v1817_v36, %v1721_v35  ;;  %2294 = vmatmul.f32.gmra.mxu2 %v1994_v59  ;;  %v1995_v24 = vand.u32 4294901760, %v1994_v59 }
 0x283   : > { %v1838_v30 = vmax.f32 %v1818_v23, 0.0  ;;  %2421 = vmatmul.f32.gmra.mxu3 %v1995_v24  ;;  %v1996_v31 = vsub.f32 %v1994_v59, %v1995_v24  ;;  %v4548_v23 = vld [vmem:[%s7311_s1 + $0x1f0] sm:$0xff] }
 0x285   : > { %v6144_v46 = vand.u32 4294901760, %v1838_v30  ;;  %v1997_v4 = vand.u32 4294901760, %v1996_v31 }
 0x286   : > { %v1724_v6 = vpop.f32.mrf.mxu2 }
 0x287   : > { %v1725_v41 = vadd.f32 %v1724_v6, %v1596_v44  ;;  %1998 = vmatmul.f32.gmra.mxu0 %v1997_v4  ;;  %2171 = vmatmul.f32.gmra.mxu1 %v6144_v46  ;;  %v2002_v56 = vsub.f32 %v1838_v30, %v6144_v46  ;;  %v6263_v30 = vand.u32 4294901760, %v4548_v23 }
 0x289   : > { %v1822_v54 = vadd.f32 %v1821_v21, %v1725_v41  ;;  %2299 = vmatmul.f32.gmra.mxu2 %v2002_v56  ;;  %v2003_v34 = vand.u32 4294901760, %v2002_v56  ;;  %v6273_v6 = vsub.f32 %v4548_v23, %v6263_v30  ;;  %v4547_v21 = vld [vmem:[%s7311_s1 + $0x1e8] sm:$0xff] }
 0x28b   : > { %v1839_v45 = vmax.f32 %v1822_v54, 0.0  ;;  %2427 = vmatmul.f32.gmra.mxu3 %v2003_v34  ;;  %v2004_v7 = vsub.f32 %v2002_v56, %v2003_v34  ;;  %v7369_v56 = vand.u32 4294901760, %v6273_v6  ;;  %v6282_v54 = vand.u32 4294901760, %v4547_v21 }
 0x28d   : > { %v6148_v2 = vand.u32 4294901760, %v1839_v45  ;;  %v2005_v26 = vand.u32 4294901760, %v2004_v7  ;;  %v2946_v7 = vsub.f32 %v6273_v6, %v7369_v56 }
 0x28f   : > { %2006 = vmatmul.f32.gmra.mxu0 %v2005_v26  ;;  %2175 = vmatmul.f32.gmra.mxu1 %v6148_v2  ;;  %v2010_v61 = vsub.f32 %v1839_v45, %v6148_v2 }
 0x291   : > { %2304 = vmatmul.f32.gmra.mxu2 %v2010_v61  ;;  %v2011_v62 = vand.u32 4294901760, %v2010_v61 }
 0x293   : > { %2433 = vmatmul.f32.gmra.mxu3 %v2011_v62  ;;  %v2012_v11 = vsub.f32 %v2010_v61, %v2011_v62  ;;  %v2947_v62 = vand.u32 4294901760, %v2946_v7 }
 0x294   : > { %v6152_v39 = vpop.f32.mrf.mxu1 }
 0x295   : > { %v2013_v53 = vand.u32 4294901760, %v2012_v11  ;;  %v6292_v11 = vsub.f32 %v4547_v21, %v6282_v54 }
 0x297   : > { %2014 = vmatmul.f32.gmra.mxu0 %v2013_v53  ;;  %2599 = vmatmul.f32.vlgmr.msra.gmra.mxu1 %v6065_v10 }
 0x29c   : > { %v6155_v48 = vpop.f32.mrf.mxu0  ;;  %v6157_v40 = vpop.f32.mrf.mxu1 }
 0x29d   : > { %v2230_v0 = vpop.f32.mrf.mxu2  ;;  %v2117_v31 = vadd.f32 %v6152_v39, %v6155_v48 }
 0x29f   : > { %2502 = vmatmul.f32.vlgmr.msra.gmra.mxu0 %v6065_v10  ;;  %2603 = vmatmul.f32.gmra.mxu1 %v6071_v63  ;;  %v2231_v4 = vadd.f32 %v2230_v0, %v2117_v31  ;;  %v4546_v0 = vld [vmem:[%s7311_s1 + $0x1e0] sm:$0xff] }
 0x2a4   : > { %v6161_v22 = vpop.f32.mrf.mxu0  ;;  %v6163_v15 = vpop.f32.mrf.mxu1 }
 0x2a5   : > { %v2121_v45 = vadd.f32 %v6157_v40, %v6161_v22  ;;  %v7368_v40 = vand.u32 4294901760, %v6292_v11 }
 0x2a7   : > { %2506 = vmatmul.f32.gmra.mxu0 %v6071_v63  ;;  %2607 = vmatmul.f32.gmra.mxu1 %v6076_v37  ;;  %v2952_v22 = vsub.f32 %v6292_v11, %v7368_v40 }
 0x2a9   : > { %v2953_v23 = vand.u32 4294901760, %v2952_v22 }
 0x2ac   : > { %v6167_v5 = vpop.f32.mrf.mxu0  ;;  %v6169_v42 = vpop.f32.mrf.mxu1 }
 0x2af   : > { %2510 = vmatmul.f32.gmra.mxu0 %v6076_v37  ;;  %2611 = vmatmul.f32.gmra.mxu1 %v6081_v27 }
 0x2b4   : > { %v6173_v20 = vpop.f32.mrf.mxu0  ;;  %v6175_v10 = vpop.f32.mrf.mxu1 }
 0x2b5   : > { %v2129_v7 = vadd.f32 %v6169_v42, %v6173_v20  ;;  %v4544_v20 = vld [vmem:[%s7311_s1 + $0x1d0] sm:$0xff] }
 0x2b7   : > { %2514 = vmatmul.f32.gmra.mxu0 %v6081_v27  ;;  %2615 = vmatmul.f32.gmra.mxu1 %v6086_v49 }
 0x2bc   : > { %v6179_v33 = vpop.f32.mrf.mxu0  ;;  %v6181_v63 = vpop.f32.mrf.mxu1 }
 0x2bf   : > { %2518 = vmatmul.f32.gmra.mxu0 %v6086_v49  ;;  %2619 = vmatmul.f32.gmra.mxu1 %v6091_v3 }
 0x2c4   : > { %v6185_v14 = vpop.f32.mrf.mxu0  ;;  %v6187_v37 = vpop.f32.mrf.mxu1 }
 0x2c7   : > { %2522 = vmatmul.f32.gmra.mxu0 %v6091_v3  ;;  %2623 = vmatmul.f32.gmra.mxu1 %v6098_v28 }
 0x2cc   : > { %v6191_v60 = vpop.f32.mrf.mxu0  ;;  %v6193_v27 = vpop.f32.mrf.mxu1 }
 0x2cf   : > { %2526 = vmatmul.f32.gmra.mxu0 %v6098_v28  ;;  %2627 = vmatmul.f32.gmra.mxu1 %v6104_v32 }
 0x2d4   : > { %v6197_v19 = vpop.f32.mrf.mxu0  ;;  %v6199_v49 = vpop.f32.mrf.mxu1 }
 0x2d7   : > { %2530 = vmatmul.f32.gmra.mxu0 %v6104_v32  ;;  %2631 = vmatmul.f32.gmra.mxu1 %v6110_v8 }
 0x2dc   : > { %v6203_v58 = vpop.f32.mrf.mxu0  ;;  %v6205_v3 = vpop.f32.mrf.mxu1 }
 0x2df   : > { %2534 = vmatmul.f32.gmra.mxu0 %v6110_v8  ;;  %2635 = vmatmul.f32.gmra.mxu1 %v6116_v47 }
 0x2e4   : > { %v6209_v9 = vpop.f32.mrf.mxu0  ;;  %v6211_v28 = vpop.f32.mrf.mxu1 }
 0x2e7   : > { %2538 = vmatmul.f32.gmra.mxu0 %v6116_v47  ;;  %2639 = vmatmul.f32.gmra.mxu1 %v6122_v12  ;;  %v2344_v47 = vpop.f32.mrf.mxu3 }
 0x2e8   : > { %v2345_v34 = vadd.f32 %v2344_v47, %v2231_v4  ;;  %v6306_v47 = vand.u32 4294901760, %v4546_v0 }
 0x2ec   : > { %v6215_v17 = vpop.f32.mrf.mxu0  ;;  %v6217_v32 = vpop.f32.mrf.mxu1 }
 0x2ef   : > { %2542 = vmatmul.f32.gmra.mxu0 %v6122_v12  ;;  %2643 = vmatmul.f32.gmra.mxu1 %v6128_v1  ;;  %v2235_v12 = vpop.f32.mrf.mxu2  ;;  %v2350_v55 = vpop.f32.mrf.mxu3 }
 0x2f0   : > { %v2236_v39 = vadd.f32 %v2235_v12, %v2121_v45 }
 0x2f2   : > { %v2351_v12 = vadd.f32 %v2350_v55, %v2236_v39 }
 0x2f4   : > { %v6221_v13 = vpop.f32.mrf.mxu0  ;;  %v6223_v8 = vpop.f32.mrf.mxu1 }
 0x2f7   : > { %2546 = vmatmul.f32.gmra.mxu0 %v6128_v1  ;;  %2647 = vmatmul.f32.gmra.mxu1 %v6134_v25  ;;  %v4549_v1 = vld [vmem:[%s7311_s1 + $0x1f8] sm:$0xff]  ;;  %v2240_v52 = vpop.f32.mrf.mxu2  ;;  %v2356_v29 = vpop.f32.mrf.mxu3 }
 0x2f8   : > { %v6242_v36 = vand.u32 4294901760, %v4549_v1 }
 0x2fa   : > { %2777 = vmatpush.msrb.mxu2 %v6242_v36  ;;  %v6250_v59 = vsub.f32 %v4549_v1, %v6242_v36  ;;  %3228 = vmatpush.msrb.mxu1 %v6242_v36  ;;  %v2125_v1 = vadd.f32 %v6163_v15, %v6167_v5  ;;  %v4545_v5 = vld [vmem:[%s7311_s1 + $0x1d8] sm:$0xff] }
 0x2fb   : > { %v6324_v45 = vand.u32 4294901760, %v4545_v5 }
 0x2fc   : > { %v6227_v50 = vpop.f32.mrf.mxu0  ;;  %v6229_v16 = vpop.f32.mrf.mxu1  ;;  %3100 = vmatpush.msrb.mxu0 %v6250_v59  ;;  %2779 = vmatpush.msrb.mxu2 %v6263_v30  ;;  %v2241_v4 = vadd.f32 %v2240_v52, %v2125_v1  ;;  %v6345_v1 = vand.u32 4294901760, %v4544_v20 }
 0x2fd   : > { %3230 = vmatpush.msrb.mxu1 %v6263_v30 }
 0x2fe   : > { %3103 = vmatpush.msrb.mxu0 %v6273_v6  ;;  %2781 = vmatpush.msrb.mxu2 %v6282_v54  ;;  %v2357_v52 = vadd.f32 %v2356_v29, %v2241_v4  ;;  %v6336_v29 = vsub.f32 %v4545_v5, %v6324_v45 }
 0x2ff   : > { %2550 = vmatmul.f32.gmra.mxu0 %v6134_v25  ;;  %2651 = vmatmul.f32.gmra.mxu1 %v6140_v38  ;;  %v6275_v41 = vpop.f32.mrf.mxu3 }
 0x300   : > { %3232 = vmatpush.msrb.mxu1 %v6282_v54  ;;  %3106 = vmatpush.msrb.mxu0 %v6292_v11  ;;  %v7360_v42 = vand.u32 4294901760, %v6336_v29 }
 0x301   : > { %2783 = vmatpush.msrb.mxu2 %v6306_v47 }
 0x302   : > { %3234 = vmatpush.msrb.mxu1 %v6306_v47 }
 0x303   : > { %2785 = vmatpush.msrb.mxu2 %v6324_v45 }
 0x304   : > { %v6233_v43 = vpop.f32.mrf.mxu0  ;;  %v6235_v51 = vpop.f32.mrf.mxu1  ;;  %3236 = vmatpush.msrb.mxu1 %v6324_v45 }
 0x305   : > { %2787 = vmatpush.msrb.mxu2 %v6345_v1 }
 0x306   : > { %3238 = vmatpush.msrb.mxu1 %v6345_v1 }
 0x307   : > { %2554 = vmatmul.f32.gmra.mxu0 %v6140_v38  ;;  %2655 = vmatmul.f32.gmra.mxu1 %v6144_v46  ;;  %v2939_v38 = vand.u32 4294901760, %v6250_v59 }
 0x309   : > { %v2940_v18 = vsub.f32 %v6250_v59, %v2939_v38 }
 0x30b   : > { %v2941_v24 = vand.u32 4294901760, %v2940_v18  ;;  %v2368_v18 = vpop.f32.mrf.mxu3 }
 0x30c   : > { %v6244_v25 = vpop.f32.mrf.mxu0  ;;  %v6246_v35 = vpop.f32.mrf.mxu1 }
 0x30d   : > { %2942 = vmatpush.msrb.mxu3 %v2941_v24 }
 0x30f   : > { %2558 = vmatmul.f32.gmra.mxu0 %v6144_v46  ;;  %2659 = vmatmul.f32.gmra.mxu1 %v6148_v2  ;;  %v2245_v46 = vpop.f32.mrf.mxu2 }
 0x310   : > { %2948 = vmatpush.msrb.mxu3 %v2947_v62 }
 0x312   : > { %2954 = vmatpush.msrb.mxu3 %v2953_v23  ;;  %v2133_v23 = vadd.f32 %v6175_v10, %v6179_v33  ;;  %v6358_v10 = vsub.f32 %v4544_v20, %v6345_v1 }
 0x313   : > { %v2374_v62 = vpop.f32.mrf.mxu3 }
 0x314   : > { %v6267_v57 = vpop.f32.mrf.mxu0  ;;  %v2600_v44 = vpop.f32.mrf.mxu1  ;;  %v7357_v33 = vand.u32 4294901760, %v6358_v10 }
 0x317   : > { %2562 = vmatmul.f32.gmra.mxu0 %v6148_v2  ;;  %v2250_v53 = vpop.f32.mrf.mxu2 }
 0x31c   : > { %v2503_v2 = vpop.f32.mrf.mxu0  ;;  %v2604_v26 = vpop.f32.mrf.mxu1 }
 0x31d   : > { %v2504_v61 = vadd.f32 %v2503_v2, %v2345_v34  ;;  %v6315_v34 = vsub.f32 %v4546_v0, %v6306_v47  ;;  %v2246_v0 = vadd.f32 %v2245_v46, %v2129_v7  ;;  %v2251_v7 = vadd.f32 %v2250_v53, %v2133_v23 }
 0x31f   : > { %v6294_v48 = vadd.f32 %v2600_v44, %v2504_v61  ;;  %v2255_v55 = vpop.f32.mrf.mxu2  ;;  %v7363_v15 = vand.u32 4294901760, %v6315_v34  ;;  %3109 = vmatpush.msrb.mxu0 %v6315_v34  ;;  %v2363_v46 = vadd.f32 %v6275_v41, %v2246_v0  ;;  %v4543_v41 = vld [vmem:[%s7311_s1 + $0x1c8] sm:$0xff]  ;;  %v2369_v53 = vadd.f32 %v2368_v18, %v2251_v7 }
 0x321   : > { %2663 = vrot.lane.b32.xlu0 %v6294_v48, %s4665_s20  ;;  %v2958_v2 = vsub.f32 %v6315_v34, %v7363_v15  ;;  %3112 = vmatpush.msrb.mxu0 %v6336_v29 }
 0x323   : > { %v2959_v22 = vand.u32 4294901760, %v2958_v2  ;;  %v2380_v2 = vpop.f32.mrf.mxu3  ;;  %3115 = vmatpush.msrb.mxu0 %v6358_v10 }
 0x324   : > { %v2507_v24 = vpop.f32.mrf.mxu0  ;;  %v2608_v31 = vpop.f32.mrf.mxu1 }
 0x325   : > { %v2508_v44 = vadd.f32 %v2507_v24, %v2351_v12  ;;  %2960 = vmatpush.msrb.mxu3 %v2959_v22  ;;  %v2970_v22 = vsub.f32 %v6358_v10, %v7357_v33 }
 0x327   : > { %v6312_v21 = vadd.f32 %v2604_v26, %v2508_v44  ;;  %v2260_v24 = vpop.f32.mrf.mxu2 }
 0x329   : > { %2665 = vrot.lane.b32.xlu0 %v6312_v21, %s4665_s20 }
 0x32c   : > { %v2511_v26 = vpop.f32.mrf.mxu0  ;;  %v2612_v61 = vpop.f32.mrf.mxu1 }
 0x32d   : > { %v2512_v39 = vadd.f32 %v2511_v26, %v2357_v52 }
 0x32f   : > { %v6333_v12 = vadd.f32 %v2608_v31, %v2512_v39  ;;  %v2964_v31 = vsub.f32 %v6336_v29, %v7360_v42  ;;  %v6367_v39 = vand.u32 4294901760, %v4543_v41 }
 0x331   : > { %2667 = vrot.lane.b32.xlu1 %v6333_v12, %s4665_s20  ;;  %v2965_v52 = vand.u32 4294901760, %v2964_v31  ;;  %2789 = vmatpush.msrb.mxu2 %v6367_v39  ;;  %v2971_v31 = vand.u32 4294901760, %v2970_v22  ;;  %v6379_v18 = vsub.f32 %v4543_v41, %v6367_v39 }
 0x332   : > { %3240 = vmatpush.msrb.mxu1 %v6367_v39 }
 0x333   : > { %2966 = vmatpush.msrb.mxu3 %v2965_v52  ;;  %v4542_v52 = vld [vmem:[%s7311_s1 + $0x1c0] sm:$0xff]  ;;  %3118 = vmatpush.msrb.mxu0 %v6379_v18 }
 0x334   : > { %v2515_v44 = vpop.f32.mrf.mxu0  ;;  %v2616_v4 = vpop.f32.mrf.mxu1  ;;  %v6388_v7 = vand.u32 4294901760, %v4542_v52 }
 0x335   : > { %v2516_v5 = vadd.f32 %v2515_v44, %v2363_v46  ;;  %v2265_v46 = vpop.f32.mrf.mxu2  ;;  %2972 = vmatpush.msrb.mxu3 %v2971_v31 }
 0x336   : > { %2791 = vmatpush.msrb.mxu2 %v6388_v7  ;;  %3242 = vmatpush.msrb.mxu1 %v6388_v7 }
 0x337   : > { %v6355_v26 = vadd.f32 %v2612_v61, %v2516_v5  ;;  %v2137_v61 = vadd.f32 %v6181_v63, %v6185_v14  ;;  %v2386_v63 = vpop.f32.mrf.mxu3  ;;  %v7358_v14 = vand.u32 4294901760, %v6379_v18 }
 0x339   : > { %2669 = vrot.lane.b32.xlu1 %v6355_v26, %s4665_s20  ;;  %v2256_v44 = vadd.f32 %v2255_v55, %v2137_v61  ;;  %v2976_v41 = vsub.f32 %v6379_v18, %v7358_v14 }
 0x33b   : > { %v2375_v55 = vadd.f32 %v2374_v62, %v2256_v44  ;;  %v6400_v62 = vsub.f32 %v4542_v52, %v6388_v7 }
 0x33c   : > { %v2519_v0 = vpop.f32.mrf.mxu0  ;;  %v2620_v20 = vpop.f32.mrf.mxu1 }
 0x33d   : > { %v2520_v23 = vadd.f32 %v2519_v0, %v2369_v53  ;;  %v2977_v0 = vand.u32 4294901760, %v2976_v41  ;;  %v2270_v31 = vpop.f32.mrf.mxu2  ;;  %3121 = vmatpush.msrb.mxu0 %v6400_v62 }
 0x33f   : > { %v6376_v5 = vadd.f32 %v2616_v4, %v2520_v23  ;;  %v2141_v4 = vadd.f32 %v6187_v37, %v6191_v60  ;;  %2978 = vmatpush.msrb.mxu3 %v2977_v0  ;;  %v7359_v37 = vand.u32 4294901760, %v6400_v62  ;;  %v4541_v60 = vld [vmem:[%s7311_s1 + $0x1b8] sm:$0xff] }
 0x340   : > { %v6409_v44 = vand.u32 4294901760, %v4541_v60 }
 0x341   : > { %2671 = vrot.lane.b32.xlu2 %v6376_v5, %s4665_s20  ;;  %v2261_v23 = vadd.f32 %v2260_v24, %v2141_v4  ;;  %v2982_v52 = vsub.f32 %v6400_v62, %v7359_v37 }
 0x342   : > { %2793 = vmatpush.msrb.mxu2 %v6409_v44  ;;  %3244 = vmatpush.msrb.mxu1 %v6409_v44 }
 0x343   : > { %v2381_v24 = vadd.f32 %v2380_v2, %v2261_v23  ;;  %v6421_v2 = vsub.f32 %v4541_v60, %v6409_v44  ;;  %v4540_v23 = vld [vmem:[%s7311_s1 + $0x1b0] sm:$0xff] }
 0x344   : > { %v2523_v53 = vpop.f32.mrf.mxu0  ;;  %v2624_v61 = vpop.f32.mrf.mxu1 }
 0x345   : > { %v2524_v22 = vadd.f32 %v2523_v53, %v2375_v55  ;;  %v2392_v55 = vpop.f32.mrf.mxu3  ;;  %3124 = vmatpush.msrb.mxu0 %v6421_v2 }
 0x347   : > { %v6397_v33 = vadd.f32 %v2620_v20, %v2524_v22  ;;  %v2145_v20 = vadd.f32 %v6193_v27, %v6197_v19  ;;  %v2983_v22 = vand.u32 4294901760, %v2982_v52  ;;  %v2275_v27 = vpop.f32.mrf.mxu2  ;;  %v7361_v19 = vand.u32 4294901760, %v6421_v2 }
 0x349   : > { %2673 = vrot.lane.b32.xlu2 %v6397_v33, %s4665_s20  ;;  %v2266_v0 = vadd.f32 %v2265_v46, %v2145_v20  ;;  %2984 = vmatpush.msrb.mxu3 %v2983_v22  ;;  %v2988_v60 = vsub.f32 %v6421_v2, %v7361_v19 }
 0x34b   : > { %v2387_v46 = vadd.f32 %v2386_v63, %v2266_v0 }
 0x34c   : > { %v2527_v4 = vpop.f32.mrf.mxu0  ;;  %v2628_v41 = vpop.f32.mrf.mxu1 }
 0x34d   : > { %v2528_v53 = vadd.f32 %v2527_v4, %v2381_v24  ;;  %v6430_v24 = vand.u32 4294901760, %v4540_v23  ;;  %v2398_v22 = vpop.f32.mrf.mxu3 }
 0x34f   : > { %v6418_v14 = vadd.f32 %v2624_v61, %v2528_v53  ;;  %v2149_v61 = vadd.f32 %v6199_v49, %v6203_v58  ;;  %2795 = vmatpush.msrb.mxu2 %v6430_v24  ;;  %3246 = vmatpush.msrb.mxu1 %v6430_v24  ;;  %v2989_v53 = vand.u32 4294901760, %v2988_v60  ;;  %v6442_v63 = vsub.f32 %v4540_v23, %v6430_v24  ;;  %v4539_v58 = vld [vmem:[%s7311_s1 + $0x1a8] sm:$0xff] }
 0x350   : > { %v6451_v0 = vand.u32 4294901760, %v4539_v58 }
 0x351   : > { %2675 = vrot.lane.b32.xlu0 %v6418_v14, %s4665_s20  ;;  %v2271_v37 = vadd.f32 %v2270_v31, %v2149_v61  ;;  %2990 = vmatpush.msrb.mxu3 %v2989_v53  ;;  %v7362_v49 = vand.u32 4294901760, %v6442_v63 }
 0x352   : > { %3127 = vmatpush.msrb.mxu0 %v6442_v63  ;;  %2797 = vmatpush.msrb.mxu2 %v6451_v0 }
 0x353   : > { %v2393_v31 = vadd.f32 %v2392_v55, %v2271_v37  ;;  %v2994_v23 = vsub.f32 %v6442_v63, %v7362_v49  ;;  %3248 = vmatpush.msrb.mxu1 %v6451_v0  ;;  %v6463_v37 = vsub.f32 %v4539_v58, %v6451_v0  ;;  %v4538_v55 = vld [vmem:[%s7311_s1 + $0x1a0] sm:$0xff] }
 0x354   : > { %v2531_v20 = vpop.f32.mrf.mxu0  ;;  %v2632_v52 = vpop.f32.mrf.mxu1 }
 0x355   : > { %v2532_v4 = vadd.f32 %v2531_v20, %v2387_v46  ;;  %v2280_v46 = vpop.f32.mrf.mxu2  ;;  %3130 = vmatpush.msrb.mxu0 %v6463_v37 }
 0x357   : > { %v6439_v42 = vadd.f32 %v2628_v41, %v2532_v4  ;;  %v2153_v41 = vadd.f32 %v6205_v3, %v6209_v9  ;;  %v2995_v4 = vand.u32 4294901760, %v2994_v23  ;;  %v2404_v3 = vpop.f32.mrf.mxu3  ;;  %v7364_v9 = vand.u32 4294901760, %v6463_v37 }
 0x359   : > { %2677 = vrot.lane.b32.xlu1 %v6439_v42, %s4665_s20  ;;  %v2276_v53 = vadd.f32 %v2275_v27, %v2153_v41  ;;  %2996 = vmatpush.msrb.mxu3 %v2995_v4  ;;  %v3000_v58 = vsub.f32 %v6463_v37, %v7364_v9 }
 0x35b   : > { %v2399_v27 = vadd.f32 %v2398_v22, %v2276_v53 }
 0x35c   : > { %v2535_v61 = vpop.f32.mrf.mxu0  ;;  %v2636_v60 = vpop.f32.mrf.mxu1 }
 0x35d   : > { %v2536_v20 = vadd.f32 %v2535_v61, %v2393_v31  ;;  %v6472_v31 = vand.u32 4294901760, %v4538_v55  ;;  %v2285_v4 = vpop.f32.mrf.mxu2 }
 0x35f   : > { %v6460_v19 = vadd.f32 %v2632_v52, %v2536_v20  ;;  %v2157_v52 = vadd.f32 %v6211_v28, %v6215_v17  ;;  %2799 = vmatpush.msrb.mxu2 %v6472_v31  ;;  %3250 = vmatpush.msrb.mxu1 %v6472_v31  ;;  %v3001_v20 = vand.u32 4294901760, %v3000_v58  ;;  %v6484_v22 = vsub.f32 %v4538_v55, %v6472_v31  ;;  %v4537_v17 = vld [vmem:[%s7311_s1 + $0x198] sm:$0xff]  ;;  %v2410_v53 = vpop.f32.mrf.mxu3 }
 0x361   : > { %2679 = vrot.lane.b32.xlu2 %v6460_v19, %s4665_s20  ;;  %v2281_v49 = vadd.f32 %v2280_v46, %v2157_v52  ;;  %3002 = vmatpush.msrb.mxu3 %v3001_v20  ;;  %v7366_v28 = vand.u32 4294901760, %v6484_v22 }
 0x362   : > { %3133 = vmatpush.msrb.mxu0 %v6484_v22 }
 0x363   : > { %v2405_v46 = vadd.f32 %v2404_v3, %v2281_v49  ;;  %v3006_v55 = vsub.f32 %v6484_v22, %v7366_v28  ;;  %v4536_v3 = vld [vmem:[%s7311_s1 + $0x190] sm:$0xff]  ;;  %v4534_v28 = vld [vmem:[%s7311_s1 + $0x180] sm:$0xff] }
 0x364   : > { %v2539_v41 = vpop.f32.mrf.mxu0  ;;  %v2640_v23 = vpop.f32.mrf.mxu1 }
 0x365   : > { %v2540_v61 = vadd.f32 %v2539_v41, %v2399_v27  ;;  %v6493_v27 = vand.u32 4294901760, %v4537_v17  ;;  %v3007_v41 = vand.u32 4294901760, %v3006_v55 }
 0x367   : > { %v6481_v15 = vadd.f32 %v2636_v60, %v2540_v61  ;;  %v2161_v60 = vadd.f32 %v6217_v32, %v6221_v13  ;;  %2801 = vmatpush.msrb.mxu2 %v6493_v27  ;;  %3252 = vmatpush.msrb.mxu1 %v6493_v27  ;;  %v6505_v49 = vsub.f32 %v4537_v17, %v6493_v27  ;;  %v2290_v32 = vpop.f32.mrf.mxu2 }
 0x368   : > { %3008 = vmatpush.msrb.mxu3 %v3007_v41 }
 0x369   : > { %2681 = vrot.lane.b32.xlu0 %v6481_v15, %s4665_s20  ;;  %v2286_v20 = vadd.f32 %v2285_v4, %v2161_v60  ;;  %v7365_v13 = vand.u32 4294901760, %v6505_v49  ;;  %3136 = vmatpush.msrb.mxu0 %v6505_v49  ;;  %v6516_v4 = vand.u32 4294901760, %v4536_v3  ;;  %v2416_v60 = vpop.f32.mrf.mxu3 }
 0x36b   : > { %v3012_v17 = vsub.f32 %v6505_v49, %v7365_v13  ;;  %2803 = vmatpush.msrb.mxu2 %v6516_v4  ;;  %3254 = vmatpush.msrb.mxu1 %v6516_v4 }
 0x36c   : > { %v2543_v52 = vpop.f32.mrf.mxu0  ;;  %v2644_v61 = vpop.f32.mrf.mxu1 }
 0x36d   : > { %v2544_v58 = vadd.f32 %v2543_v52, %v2405_v46  ;;  %v2411_v46 = vadd.f32 %v2410_v53, %v2286_v20  ;;  %v6529_v53 = vsub.f32 %v4536_v3, %v6516_v4 }
 0x36f   : > { %v6502_v9 = vadd.f32 %v2640_v23, %v2544_v58  ;;  %v2165_v23 = vadd.f32 %v6223_v8, %v6227_v50  ;;  %v3013_v58 = vand.u32 4294901760, %v3012_v17  ;;  %v4535_v8 = vld [vmem:[%s7311_s1 + $0x188] sm:$0xff]  ;;  %3139 = vmatpush.msrb.mxu0 %v6529_v53  ;;  %v2169_v17 = vadd.f32 %v6229_v16, %v6233_v43 }
 0x370   : > { %v6531_v20 = vand.u32 4294901760, %v4535_v8 }
 0x371   : > { %2683 = vrot.lane.b32.xlu1 %v6502_v9, %s4665_s20  ;;  %v2291_v41 = vadd.f32 %v2290_v32, %v2165_v23  ;;  %3014 = vmatpush.msrb.mxu3 %v3013_v58  ;;  %v7367_v32 = vand.u32 4294901760, %v6529_v53  ;;  %v6543_v23 = vand.u32 4294901760, %v4534_v28 }
 0x372   : > { %2805 = vmatpush.msrb.mxu2 %v6531_v20  ;;  %3256 = vmatpush.msrb.mxu1 %v6531_v20 }
 0x373   : > { %v2417_v3 = vadd.f32 %v2416_v60, %v2291_v41  ;;  %v6554_v58 = vsub.f32 %v4534_v28, %v6543_v23  ;;  %v2422_v28 = vpop.f32.mrf.mxu3 }
 0x374   : > { %v2547_v55 = vpop.f32.mrf.mxu0  ;;  %v2648_v13 = vpop.f32.mrf.mxu1  ;;  %2807 = vmatpush.msrb.mxu2 %v6543_v23  ;;  %3258 = vmatpush.msrb.mxu1 %v6543_v23 }
 0x375   : > { %v2548_v52 = vadd.f32 %v2547_v55, %v2411_v46  ;;  %v2295_v46 = vpop.f32.mrf.mxu2  ;;  %v3018_v55 = vsub.f32 %v6529_v53, %v7367_v32  ;;  %v3029_v43 = vand.u32 4294901760, %v6554_v58 }
 0x376   : > { %3359 = vmatpush.msra.mxu2 %v2939_v38  ;;  %v2296_v32 = vadd.f32 %v2295_v46, %v2169_v17  ;;  %v2173_v46 = vadd.f32 %v6235_v51, %v6244_v25  ;;  %v7451_v51 = vand.u32 4294901760, %v6358_v10 }
 0x377   : > { %v6526_v50 = vadd.f32 %v2644_v61, %v2548_v52  ;;  %v6541_v61 = vsub.f32 %v4535_v8, %v6531_v20  ;;  %v3019_v8 = vand.u32 4294901760, %v3018_v55  ;;  %v7447_v55 = vand.u32 4294901760, %v6273_v6 }
 0x378   : > { %v7449_v6 = vand.u32 4294901760, %v6315_v34 }
 0x379   : > { %2685 = vrot.lane.b32.xlu2 %v6526_v50, %s4665_s20  ;;  %v3023_v52 = vand.u32 4294901760, %v6541_v61  ;;  %3142 = vmatpush.msrb.mxu0 %v6541_v61 }
 0x37a   : > { %3020 = vmatpush.msrb.mxu3 %v3019_v8  ;;  %3363 = vmatpush.msra.mxu2 %v7447_v55 }
 0x37b   : > { %v3024_v16 = vsub.f32 %v6541_v61, %v3023_v52  ;;  %3145 = vmatpush.msrb.mxu0 %v6554_v58 }
 0x37c   : > { %v2551_v60 = vpop.f32.mrf.mxu0  ;;  %v2652_v38 = vpop.f32.mrf.mxu1 }
 0x37d   : > { %v2552_v41 = vadd.f32 %v2551_v60, %v2417_v3  ;;  %v3025_v56 = vand.u32 4294901760, %v3024_v16  ;;  %v3030_v3 = vsub.f32 %v6554_v58, %v3029_v43  ;;  %v7448_v60 = vand.u32 4294901760, %v6292_v11  ;;  %v2300_v17 = vpop.f32.mrf.mxu2 }
 0x37e   : > { %v2301_v11 = vadd.f32 %v2300_v17, %v2173_v46 }
 0x37f   : > { %v6566_v40 = vadd.f32 %v2648_v13, %v2552_v41  ;;  %3026 = vmatpush.msrb.mxu3 %v3025_v56  ;;  %v3031_v59 = vand.u32 4294901760, %v3030_v3  ;;  %3367 = vmatpush.msra.mxu2 %v7448_v60  ;;  %v2423_v13 = vadd.f32 %v2422_v28, %v2296_v32  ;;  %v7450_v56 = vand.u32 4294901760, %v6336_v29  ;;  %v2428_v32 = vpop.f32.mrf.mxu3 }
 0x380   : > { %v2429_v25 = vadd.f32 %v2428_v32, %v2301_v11 }
 0x381   : > { %2687 = vrot.lane.b32.xlu0 %v6566_v40, %s4665_s20  ;;  %3032 = vmatpush.msrb.mxu3 %v3031_v59 }
 0x382   : > { %3371 = vmatpush.msra.mxu2 %v7449_v6 }
 0x383   : > { %3486 = vmatpush.msra.mxu3 %v6242_v36  ;;  %v7452_v36 = vand.u32 4294901760, %v6379_v18 }
 0x384   : > { %v2555_v41 = vpop.f32.mrf.mxu0  ;;  %3375 = vmatpush.msra.mxu2 %v7450_v56  ;;  %v2656_v34 = vpop.f32.mrf.mxu1 }
 0x385   : > { %v2556_v8 = vadd.f32 %v2555_v41, %v2423_v13  ;;  %3488 = vmatpush.msra.mxu3 %v6263_v30  ;;  %v2177_v30 = vadd.f32 %v6246_v35, %v6267_v57  ;;  %v2305_v28 = vpop.f32.mrf.mxu2  ;;  %v7455_v35 = vand.u32 4294901760, %v6442_v63  ;;  %v4642_v13 = vld [vmem:[%s4794_s10 + $0x8] sm:$0xff] }
 0x386   : > { %3379 = vmatpush.msra.mxu2 %v7451_v51  ;;  %v4643_v51 = vld [vmem:[%s4794_s10 + $0x10] sm:$0xff] }
 0x387   : > { %v6585_v16 = vadd.f32 %v2652_v38, %v2556_v8  ;;  %3490 = vmatpush.msra.mxu3 %v6282_v54  ;;  %v7453_v54 = vand.u32 4294901760, %v6400_v62  ;;  %v2306_v18 = vadd.f32 %v2305_v28, %v2177_v30  ;;  %v2434_v57 = vpop.f32.mrf.mxu3  ;;  %v7459_v38 = vand.u32 4294901760, %v6529_v53 }
 0x388   : > { %3383 = vmatpush.msra.mxu2 %v7452_v36 }
 0x389   : > { %2689 = vrot.lane.b32.xlu1 %v6585_v16, %s4665_s20  ;;  %3492 = vmatpush.msra.mxu3 %v6306_v47  ;;  %v7454_v47 = vand.u32 4294901760, %v6421_v2 }
 0x38a   : > { %3387 = vmatpush.msra.mxu2 %v7453_v54 }
 0x38b   : > { %3494 = vmatpush.msra.mxu3 %v6324_v45  ;;  %v7456_v45 = vand.u32 4294901760, %v6463_v37 }
 0x38c   : > { %v2559_v29 = vpop.f32.mrf.mxu0  ;;  %3391 = vmatpush.msra.mxu2 %v7454_v47  ;;  %v2660_v59 = vpop.f32.mrf.mxu1 }
 0x38d   : > { %v2560_v10 = vadd.f32 %v2559_v29, %v2429_v25  ;;  %3496 = vmatpush.msra.mxu3 %v6345_v1  ;;  %v2435_v1 = vadd.f32 %v2434_v57, %v2306_v18  ;;  %v4644_v29 = vld [vmem:[%s4794_s10 + $0x20] sm:$0xff] }
 0x38e   : > { %3395 = vmatpush.msra.mxu2 %v7455_v35  ;;  %v4645_v35 = vld [vmem:[%s4794_s10 + $0x18] sm:$0xff] }
 0x38f   : > { %v6603_v3 = vadd.f32 %v2656_v34, %v2560_v10  ;;  %3498 = vmatpush.msra.mxu3 %v6367_v39  ;;  %v7457_v39 = vand.u32 4294901760, %v6484_v22 }
 0x390   : > { %3399 = vmatpush.msra.mxu2 %v7456_v45 }
 0x391   : > { %2691 = vrot.lane.b32.xlu2 %v6603_v3, %s4665_s20  ;;  %3500 = vmatpush.msra.mxu3 %v6388_v7  ;;  %v7458_v7 = vand.u32 4294901760, %v6505_v49 }
 0x392   : > { %3403 = vmatpush.msra.mxu2 %v7457_v39  ;;  %v4646_v39 = vld [vmem:[%s4794_s10 + $0x28] sm:$0xff] }
 0x393   : > { %v2664_v62 = vpop.permute.xlu0 %2663  ;;  %3502 = vmatpush.msra.mxu3 %v6409_v44 }
 0x394   : > { %v2695_v2 = vmul.f32 1.442695, %v2664_v62  ;;  %v2563_v55 = vpop.f32.mrf.mxu0  ;;  %3407 = vmatpush.msra.mxu2 %v7458_v7 }
 0x395   : > { %v2564_v63 = vadd.f32 %v2563_v55, %v2435_v1  ;;  %3504 = vmatpush.msra.mxu3 %v6430_v24 }
 0x396   : > { %4609 = vpow2.f32 %v2695_v2  ;;  %3411 = vmatpush.msra.mxu2 %v7459_v38 }
 0x397   : > { %v6619_v37 = vadd.f32 %v2660_v59, %v2564_v63  ;;  %3506 = vmatpush.msra.mxu3 %v6451_v0  ;;  %v4641_v0 = vld [vmem:[%s4794_s10] sm:$0xff] }
 0x398   : > { %3415 = vmatpush.msra.mxu2 %v3023_v52 }
 0x399   : > { %2693 = vrot.lane.b32.xlu0 %v6619_v37, %s4665_s20  ;;  %3508 = vmatpush.msra.mxu3 %v6472_v31 }
 0x39a   : > { %3419 = vmatpush.msra.mxu2 %v3029_v43 }
 0x39b   : > { %v2666_v44 = vpop.permute.xlu0 %2665  ;;  %3510 = vmatpush.msra.mxu3 %v6493_v27  ;;  %v2672_v31 = vpop.permute.xlu2 %2671 }
 0x39c   : > { %v4610_v24 = vpop.eup %4609  ;;  %v2697_v22 = vmul.f32 1.442695, %v2666_v44  ;;  %v2703_v60 = vmul.f32 1.442695, %v2672_v31 }
 0x39d   : > { %v2727_v49 = vmul.f32 %v4641_v0, %v4610_v24  ;;  %3512 = vmatpush.msra.mxu3 %v6516_v4 }
 0x39e   : > { %4611 = vpow2.f32 %v2697_v22 }
 0x39f   : > { %v2743_v53 = vadd.f32 %v2727_v49, %v6294_v48  ;;  %3514 = vmatpush.msra.mxu3 %v6531_v20 }
 0x3a1   : > { %v6636_v61 = vand.u32 4294901760, %v2743_v53  ;;  %3516 = vmatpush.msra.mxu3 %v6543_v23 }
 0x3a3   : > { %v2668_v52 = vpop.permute.xlu1 %2667  ;;  %3034 = vmatmul.f32.vlgmr.msrb.gmra.mxu3 %v6636_v61  ;;  %v2809_v27 = vsub.f32 %v2743_v53, %v6636_v61  ;;  %v2674_v17 = vpop.permute.xlu2 %2673 }
 0x3a4   : > { %v2699_v58 = vmul.f32 1.442695, %v2668_v52  ;;  %v4612_v43 = vpop.eup %4611  ;;  %v2705_v32 = vmul.f32 1.442695, %v2674_v17 }
 0x3a5   : > { %3148 = vmatmul.f32.vlgmr.msrb.gmra.mxu0 %v2809_v27  ;;  %v2810_v4 = vand.u32 4294901760, %v2809_v27  ;;  %v2728_v48 = vmul.f32 %v4642_v13, %v4612_v43 }
 0x3a6   : > { %4613 = vpow2.f32 %v2699_v58 }
 0x3a7   : > { %3262 = vmatmul.f32.vlgmr.msrb.gmra.mxu1 %v2810_v4  ;;  %v2811_v20 = vsub.f32 %v2809_v27, %v2810_v4  ;;  %v2744_v46 = vadd.f32 %v2728_v48, %v6312_v21  ;;  %4615 = vpow2.f32 %v2703_v60 }
 0x3a9   : > { %v2812_v23 = vand.u32 4294901760, %v2811_v20  ;;  %v6643_v41 = vand.u32 4294901760, %v2744_v46  ;;  %v4647_v20 = vld [vmem:[%s4794_s10 + $0x30] sm:$0xff] }
 0x3ab   : > { %v2670_v6 = vpop.permute.xlu1 %2669  ;;  %2813 = vmatmul.f32.vlgmr.msrb.gmra.mxu2 %v2812_v23  ;;  %3038 = vmatmul.f32.gmra.mxu3 %v6643_v41  ;;  %v2817_v56 = vsub.f32 %v2744_v46, %v6643_v41 }
 0x3ac   : > { %v2701_v8 = vmul.f32 1.442695, %v2670_v6  ;;  %v4614_v11 = vpop.eup %4613 }
 0x3ad   : > { %v2729_v36 = vmul.f32 %v4643_v51, %v4614_v11  ;;  %3153 = vmatmul.f32.gmra.mxu0 %v2817_v56  ;;  %v2818_v21 = vand.u32 4294901760, %v2817_v56  ;;  %v4616_v25 = vpop.eup %4615 }
 0x3ae   : > { %4617 = vpow2.f32 %v2701_v8  ;;  %v2731_v54 = vmul.f32 %v4644_v29, %v4616_v25 }
 0x3af   : > { %3268 = vmatmul.f32.gmra.mxu1 %v2818_v21  ;;  %v2819_v30 = vsub.f32 %v2817_v56, %v2818_v21  ;;  %v2745_v34 = vadd.f32 %v2729_v36, %v6333_v12  ;;  %4619 = vpow2.f32 %v2705_v32  ;;  %v4648_v56 = vld [vmem:[%s4794_s10 + $0x40] sm:$0xff]  ;;  %v4649_v21 = vld [vmem:[%s4794_s10 + $0x38] sm:$0xff] }
 0x3b0   : > { %v2747_v1 = vadd.f32 %v2731_v54, %v6376_v5 }
 0x3b1   : > { %v2820_v10 = vand.u32 4294901760, %v2819_v30  ;;  %v6650_v28 = vand.u32 4294901760, %v2745_v34 }
 0x3b2   : > { %v6660_v7 = vand.u32 4294901760, %v2747_v1 }
 0x3b3   : > { %2821 = vmatmul.f32.gmra.mxu2 %v2820_v10  ;;  %3042 = vmatmul.f32.gmra.mxu3 %v6650_v28  ;;  %v2825_v18 = vsub.f32 %v2745_v34, %v6650_v28 }
 0x3b4   : > { %v4618_v47 = vpop.eup %4617  ;;  %v2841_v5 = vsub.f32 %v2747_v1, %v6660_v7 }
 0x3b5   : > { %v2730_v57 = vmul.f32 %v4645_v35, %v4618_v47  ;;  %3158 = vmatmul.f32.gmra.mxu0 %v2825_v18  ;;  %v2826_v45 = vand.u32 4294901760, %v2825_v18  ;;  %v4620_v12 = vpop.eup %4619 }
 0x3b6   : > { %v2732_v63 = vmul.f32 %v4646_v39, %v4620_v12  ;;  %v2842_v49 = vand.u32 4294901760, %v2841_v5 }
 0x3b7   : > { %v2746_v62 = vadd.f32 %v2730_v57, %v6355_v26  ;;  %3274 = vmatmul.f32.gmra.mxu1 %v2826_v45  ;;  %v2827_v2 = vsub.f32 %v2825_v18, %v2826_v45 }
 0x3b8   : > { %v2748_v26 = vadd.f32 %v2732_v63, %v6397_v33  ;;  %v2843_v58 = vsub.f32 %v2841_v5, %v2842_v49 }
 0x3b9   : > { %v6657_v55 = vand.u32 4294901760, %v2746_v62  ;;  %v2828_v59 = vand.u32 4294901760, %v2827_v2 }
 0x3ba   : > { %v6666_v53 = vand.u32 4294901760, %v2748_v26  ;;  %v2844_v33 = vand.u32 4294901760, %v2843_v58  ;;  %v4652_v58 = vld [vmem:[%s4794_s10 + $0x50] sm:$0xff] }
 0x3bb   : > { %v2833_v38 = vsub.f32 %v2746_v62, %v6657_v55  ;;  %2829 = vmatmul.f32.gmra.mxu2 %v2828_v59  ;;  %3046 = vmatmul.f32.gmra.mxu3 %v6657_v55  ;;  %v2680_v0 = vpop.permute.xlu2 %2679 }
 0x3bc   : > { %v2711_v27 = vmul.f32 1.442695, %v2680_v0  ;;  %v2849_v43 = vsub.f32 %v2748_v26, %v6666_v53  ;;  %v4651_v0 = vld [vmem:[%s4794_s10 + $0x58] sm:$0xff] }
 0x3bd   : > { %v2834_v44 = vand.u32 4294901760, %v2833_v38  ;;  %3163 = vmatmul.f32.gmra.mxu0 %v2833_v38 }
 0x3be   : > { %v2850_v60 = vand.u32 4294901760, %v2849_v43 }
 0x3bf   : > { %v2835_v24 = vsub.f32 %v2833_v38, %v2834_v44  ;;  %3280 = vmatmul.f32.gmra.mxu1 %v2834_v44  ;;  %v4650_v38 = vld [vmem:[%s4794_s10 + $0x48] sm:$0xff] }
 0x3c0   : > { %v2851_v23 = vsub.f32 %v2849_v43, %v2850_v60 }
 0x3c1   : > { %v2836_v22 = vand.u32 4294901760, %v2835_v24 }
 0x3c2   : > { %v2852_v32 = vand.u32 4294901760, %v2851_v23 }
 0x3c3   : > { %v2676_v31 = vpop.permute.xlu0 %2675  ;;  %2837 = vmatmul.f32.gmra.mxu2 %v2836_v22  ;;  %3050 = vmatmul.f32.gmra.mxu3 %v6660_v7 }
 0x3c4   : > { %v2707_v52 = vmul.f32 1.442695, %v2676_v31 }
 0x3c5   : > { %3168 = vmatmul.f32.gmra.mxu0 %v2841_v5 }
 0x3c6   : > { %4621 = vpow2.f32 %v2707_v52 }
 0x3c7   : > { %3286 = vmatmul.f32.gmra.mxu1 %v2842_v49  ;;  %4623 = vpow2.f32 %v2711_v27 }
 0x3cb   : > { %v2678_v4 = vpop.permute.xlu1 %2677  ;;  %2845 = vmatmul.f32.gmra.mxu2 %v2844_v33  ;;  %3054 = vmatmul.f32.gmra.mxu3 %v6666_v53 }
 0x3cc   : > { %v4622_v13 = vpop.eup %4621  ;;  %v2709_v48 = vmul.f32 1.442695, %v2678_v4 }
 0x3cd   : > { %v2733_v46 = vmul.f32 %v4647_v20, %v4622_v13  ;;  %3173 = vmatmul.f32.gmra.mxu0 %v2849_v43  ;;  %v4624_v17 = vpop.eup %4623 }
 0x3ce   : > { %4625 = vpow2.f32 %v2709_v48  ;;  %v2735_v11 = vmul.f32 %v4648_v56, %v4624_v17 }
 0x3cf   : > { %v2749_v6 = vadd.f32 %v2733_v46, %v6418_v14  ;;  %3292 = vmatmul.f32.gmra.mxu1 %v2850_v60 }
 0x3d0   : > { %v2751_v34 = vadd.f32 %v2735_v11, %v6460_v19 }
 0x3d1   : > { %v6673_v8 = vand.u32 4294901760, %v2749_v6 }
 0x3d2   : > { %v6683_v18 = vand.u32 4294901760, %v2751_v34 }
 0x3d3   : > { %v2857_v51 = vsub.f32 %v2749_v6, %v6673_v8  ;;  %2853 = vmatmul.f32.gmra.mxu2 %v2852_v32  ;;  %3058 = vmatmul.f32.gmra.mxu3 %v6673_v8  ;;  %v2686_v47 = vpop.permute.xlu2 %2685 }
 0x3d4   : > { %v4626_v36 = vpop.eup %4625  ;;  %v2717_v1 = vmul.f32 1.442695, %v2686_v47 }
 0x3d5   : > { %v2734_v25 = vmul.f32 %v4649_v21, %v4626_v36  ;;  %v2858_v30 = vand.u32 4294901760, %v2857_v51  ;;  %3178 = vmatmul.f32.gmra.mxu0 %v2857_v51 }
 0x3d7   : > { %v2859_v29 = vsub.f32 %v2857_v51, %v2858_v30  ;;  %v2750_v14 = vadd.f32 %v2734_v25, %v6439_v42  ;;  %3298 = vmatmul.f32.gmra.mxu1 %v2858_v30  ;;  %v2873_v42 = vsub.f32 %v2751_v34, %v6683_v18  ;;  %v4653_v30 = vld [vmem:[%s4794_s10 + $0x60] sm:$0xff] }
 0x3d9   : > { %v2860_v54 = vand.u32 4294901760, %v2859_v29  ;;  %v6681_v10 = vand.u32 4294901760, %v2750_v14  ;;  %v2874_v2 = vand.u32 4294901760, %v2873_v42 }
 0x3db   : > { %v2682_v35 = vpop.permute.xlu0 %2681  ;;  %v2865_v57 = vsub.f32 %v2750_v14, %v6681_v10  ;;  %2861 = vmatmul.f32.gmra.mxu2 %v2860_v54  ;;  %3062 = vmatmul.f32.gmra.mxu3 %v6681_v10  ;;  %v2875_v5 = vsub.f32 %v2873_v42, %v2874_v2 }
 0x3dc   : > { %v2713_v45 = vmul.f32 1.442695, %v2682_v35  ;;  %v4654_v35 = vld [vmem:[%s4794_s10 + $0x70] sm:$0xff] }
 0x3dd   : > { %v2866_v19 = vand.u32 4294901760, %v2865_v57  ;;  %3183 = vmatmul.f32.gmra.mxu0 %v2865_v57  ;;  %v2876_v31 = vand.u32 4294901760, %v2875_v5 }
 0x3de   : > { %4627 = vpow2.f32 %v2713_v45 }
 0x3df   : > { %v2867_v12 = vsub.f32 %v2865_v57, %v2866_v19  ;;  %3304 = vmatmul.f32.gmra.mxu1 %v2866_v19  ;;  %4629 = vpow2.f32 %v2717_v1 }
 0x3e1   : > { %v2868_v62 = vand.u32 4294901760, %v2867_v12 }
 0x3e3   : > { %v2684_v39 = vpop.permute.xlu1 %2683  ;;  %2869 = vmatmul.f32.gmra.mxu2 %v2868_v62  ;;  %3066 = vmatmul.f32.gmra.mxu3 %v6683_v18 }
 0x3e4   : > { %v4628_v63 = vpop.eup %4627  ;;  %v2715_v59 = vmul.f32 1.442695, %v2684_v39 }
 0x3e5   : > { %v2736_v44 = vmul.f32 %v4650_v38, %v4628_v63  ;;  %3188 = vmatmul.f32.gmra.mxu0 %v2873_v42  ;;  %v4630_v26 = vpop.eup %4629  ;;  %v4655_v42 = vld [vmem:[%s4794_s10 + $0x68] sm:$0xff] }
 0x3e6   : > { %4631 = vpow2.f32 %v2715_v59  ;;  %v2738_v49 = vmul.f32 %v4651_v0, %v4630_v26 }
 0x3e7   : > { %v2752_v24 = vadd.f32 %v2736_v44, %v6481_v15  ;;  %3310 = vmatmul.f32.gmra.mxu1 %v2874_v2 }
 0x3e8   : > { %v2754_v60 = vadd.f32 %v2738_v49, %v6526_v50 }
 0x3e9   : > { %v6691_v22 = vand.u32 4294901760, %v2752_v24 }
 0x3ea   : > { %v6701_v46 = vand.u32 4294901760, %v2754_v60 }
 0x3eb   : > { %v2881_v52 = vsub.f32 %v2752_v24, %v6691_v22  ;;  %2877 = vmatmul.f32.gmra.mxu2 %v2876_v31  ;;  %3070 = vmatmul.f32.gmra.mxu3 %v6691_v22  ;;  %v2692_v20 = vpop.permute.xlu2 %2691 }
 0x3ec   : > { %v4632_v27 = vpop.eup %4631  ;;  %v2723_v56 = vmul.f32 1.442695, %v2692_v20 }
 0x3ed   : > { %v2737_v43 = vmul.f32 %v4652_v58, %v4632_v27  ;;  %v2882_v33 = vand.u32 4294901760, %v2881_v52  ;;  %3193 = vmatmul.f32.gmra.mxu0 %v2881_v52 }
 0x3ef   : > { %v2883_v4 = vsub.f32 %v2881_v52, %v2882_v33  ;;  %v2753_v15 = vadd.f32 %v2737_v43, %v6502_v9  ;;  %3316 = vmatmul.f32.gmra.mxu1 %v2882_v33  ;;  %v2897_v9 = vsub.f32 %v2754_v60, %v6701_v46  ;;  %v4656_v52 = vld [vmem:[%s4794_s10 + $0x78] sm:$0xff] }
 0x3f1   : > { %v2884_v13 = vand.u32 4294901760, %v2883_v4  ;;  %v6699_v48 = vand.u32 4294901760, %v2753_v15  ;;  %v2898_v51 = vand.u32 4294901760, %v2897_v9 }
 0x3f3   : > { %v2688_v23 = vpop.permute.xlu0 %2687  ;;  %v2889_v17 = vsub.f32 %v2753_v15, %v6699_v48  ;;  %2885 = vmatmul.f32.gmra.mxu2 %v2884_v13  ;;  %3074 = vmatmul.f32.gmra.mxu3 %v6699_v48  ;;  %v2899_v29 = vsub.f32 %v2897_v9, %v2898_v51 }
 0x3f4   : > { %v2719_v6 = vmul.f32 1.442695, %v2688_v23  ;;  %v4565_v23 = vld [vmem:[%s7311_s1 + $0x278] sm:$0xff] }
 0x3f5   : > { %v2890_v50 = vand.u32 4294901760, %v2889_v17  ;;  %3198 = vmatmul.f32.gmra.mxu0 %v2889_v17  ;;  %v2900_v45 = vand.u32 4294901760, %v2899_v29 }
 0x3f6   : > { %4633 = vpow2.f32 %v2719_v6 }
 0x3f7   : > { %v2891_v11 = vsub.f32 %v2889_v17, %v2890_v50  ;;  %3322 = vmatmul.f32.gmra.mxu1 %v2890_v50  ;;  %4635 = vpow2.f32 %v2723_v56  ;;  %v6734_v17 = vand.u32 4294901760, %v4565_v23 }
 0x3f9   : > { %v2892_v32 = vand.u32 4294901760, %v2891_v11  ;;  %3616 = vmatpush.msra.mxu0 %v6734_v17  ;;  %4067 = vmatpush.msrb.mxu3 %v6734_v17 }
 0x3fb   : > { %v2690_v36 = vpop.permute.xlu1 %2689  ;;  %2893 = vmatmul.f32.gmra.mxu2 %v2892_v32  ;;  %3078 = vmatmul.f32.gmra.mxu3 %v6701_v46 }
 0x3fc   : > { %v4634_v21 = vpop.eup %4633  ;;  %v2721_v25 = vmul.f32 1.442695, %v2690_v36 }
 0x3fd   : > { %v2739_v34 = vmul.f32 %v4653_v30, %v4634_v21  ;;  %3203 = vmatmul.f32.gmra.mxu0 %v2897_v9  ;;  %v4636_v14 = vpop.eup %4635  ;;  %v4564_v9 = vld [vmem:[%s7311_s1 + $0x270] sm:$0xff] }
 0x3fe   : > { %4637 = vpow2.f32 %v2721_v25  ;;  %v2741_v57 = vmul.f32 %v4654_v35, %v4636_v14  ;;  %v6750_v32 = vand.u32 4294901760, %v4564_v9 }
 0x3ff   : > { %v2755_v54 = vadd.f32 %v2739_v34, %v6566_v40  ;;  %3328 = vmatmul.f32.gmra.mxu1 %v2898_v51  ;;  %v4563_v34 = vld [vmem:[%s7311_s1 + $0x268] sm:$0xff] }
 0x400   : > { %v2757_v2 = vadd.f32 %v2741_v57, %v6603_v3  ;;  %3618 = vmatpush.msra.mxu0 %v6750_v32  ;;  %v6756_v51 = vsub.f32 %v4564_v9, %v6750_v32  ;;  %4069 = vmatpush.msrb.mxu3 %v6750_v32  ;;  %v6769_v14 = vand.u32 4294901760, %v4563_v34 }
 0x401   : > { %v6709_v47 = vand.u32 4294901760, %v2755_v54 }
 0x402   : > { %v6719_v38 = vand.u32 4294901760, %v2757_v2  ;;  %v7381_v30 = vand.u32 4294901760, %v6756_v51  ;;  %3620 = vmatpush.msra.mxu0 %v6769_v14  ;;  %4071 = vmatpush.msrb.mxu3 %v6769_v14 }
 0x403   : > { %v2905_v1 = vsub.f32 %v2755_v54, %v6709_v47  ;;  %2901 = vmatmul.f32.gmra.mxu2 %v2900_v45  ;;  %3082 = vmatmul.f32.gmra.mxu3 %v6709_v47  ;;  %v6775_v54 = vsub.f32 %v4563_v34, %v6769_v14 }
 0x404   : > { %v4638_v19 = vpop.eup %4637 }
 0x405   : > { %v2740_v12 = vmul.f32 %v4655_v42, %v4638_v19  ;;  %v2906_v62 = vand.u32 4294901760, %v2905_v1  ;;  %3208 = vmatmul.f32.gmra.mxu0 %v2905_v1  ;;  %v7380_v45 = vand.u32 4294901760, %v6775_v54  ;;  %v4562_v19 = vld [vmem:[%s7311_s1 + $0x260] sm:$0xff] }
 0x407   : > { %v2756_v40 = vadd.f32 %v2740_v12, %v6585_v16  ;;  %v2907_v39 = vsub.f32 %v2905_v1, %v2906_v62  ;;  %3334 = vmatmul.f32.gmra.mxu1 %v2906_v62  ;;  %v2921_v16 = vsub.f32 %v2757_v2, %v6719_v38  ;;  %v6788_v12 = vand.u32 4294901760, %v4562_v19 }
 0x409   : > { %v2908_v63 = vand.u32 4294901760, %v2907_v39  ;;  %v6717_v59 = vand.u32 4294901760, %v2756_v40  ;;  %v2922_v49 = vand.u32 4294901760, %v2921_v16  ;;  %3622 = vmatpush.msra.mxu0 %v6788_v12  ;;  %v6794_v62 = vsub.f32 %v4562_v19, %v6788_v12  ;;  %4073 = vmatpush.msrb.mxu3 %v6788_v12 }
 0x40b   : > { %v2694_v44 = vpop.permute.xlu0 %2693  ;;  %v2913_v5 = vsub.f32 %v2756_v40, %v6717_v59  ;;  %2909 = vmatmul.f32.gmra.mxu2 %v2908_v63  ;;  %3086 = vmatmul.f32.gmra.mxu3 %v6717_v59  ;;  %v2923_v58 = vsub.f32 %v2921_v16, %v2922_v49  ;;  %v7379_v39 = vand.u32 4294901760, %v6794_v62 }
 0x40c   : > { %v2725_v26 = vmul.f32 1.442695, %v2694_v44  ;;  %v4561_v44 = vld [vmem:[%s7311_s1 + $0x258] sm:$0xff] }
 0x40d   : > { %v2914_v24 = vand.u32 4294901760, %v2913_v5  ;;  %3213 = vmatmul.f32.gmra.mxu0 %v2913_v5  ;;  %v2924_v60 = vand.u32 4294901760, %v2923_v58 }
 0x40e   : > { %4639 = vpow2.f32 %v2725_v26  ;;  %v6807_v26 = vand.u32 4294901760, %v4561_v44 }
 0x40f   : > { %v2915_v3 = vsub.f32 %v2913_v5, %v2914_v24  ;;  %3340 = vmatmul.f32.gmra.mxu1 %v2914_v24 }
 0x410   : > { %3624 = vmatpush.msra.mxu0 %v6807_v26  ;;  %v6813_v24 = vsub.f32 %v4561_v44, %v6807_v26  ;;  %4075 = vmatpush.msrb.mxu3 %v6807_v26 }
 0x411   : > { %v2916_v0 = vand.u32 4294901760, %v2915_v3 }
 0x413   : > { %2917 = vmatmul.f32.gmra.mxu2 %v2916_v0  ;;  %3090 = vmatmul.f32.gmra.mxu3 %v6719_v38  ;;  %v7378_v0 = vand.u32 4294901760, %v6813_v24 }
 0x414   : > { %v4640_v31 = vpop.eup %4639 }
 0x415   : > { %v2742_v27 = vmul.f32 %v4656_v52, %v4640_v31  ;;  %3218 = vmatmul.f32.gmra.mxu0 %v2921_v16  ;;  %v4560_v31 = vld [vmem:[%s7311_s1 + $0x250] sm:$0xff] }
 0x417   : > { %v2758_v43 = vadd.f32 %v2742_v27, %v6619_v37  ;;  %3346 = vmatmul.f32.gmra.mxu1 %v2922_v49  ;;  %v6739_v37 = vsub.f32 %v4565_v23, %v6734_v17  ;;  %v6826_v27 = vand.u32 4294901760, %v4560_v31 }
 0x419   : > { %v6727_v33 = vand.u32 4294901760, %v2758_v43  ;;  %v3778_v56 = vand.u32 4294901760, %v6739_v37  ;;  %3939 = vmatpush.msrb.mxu2 %v6739_v37  ;;  %3626 = vmatpush.msra.mxu0 %v6826_v27  ;;  %v6832_v58 = vsub.f32 %v4560_v31, %v6826_v27 }
 0x41a   : > { %4077 = vmatpush.msrb.mxu3 %v6826_v27 }
 0x41b   : > { %v2929_v4 = vsub.f32 %v2758_v43, %v6727_v33  ;;  %2925 = vmatmul.f32.gmra.mxu2 %v2924_v60  ;;  %3094 = vmatmul.f32.gmra.mxu3 %v6727_v33  ;;  %v3779_v50 = vsub.f32 %v6739_v37, %v3778_v56 }
 0x41c   : > { %3942 = vmatpush.msrb.mxu2 %v6756_v51 }
 0x41d   : > { %v2930_v15 = vand.u32 4294901760, %v2929_v4  ;;  %3223 = vmatmul.f32.gmra.mxu0 %v2929_v4  ;;  %v3780_v11 = vand.u32 4294901760, %v3779_v50 }
 0x41e   : > { %3945 = vmatpush.msrb.mxu2 %v6775_v54 }
 0x41f   : > { %v2931_v13 = vsub.f32 %v2929_v4, %v2930_v15  ;;  %3352 = vmatmul.f32.gmra.mxu1 %v2930_v15  ;;  %v7377_v4 = vand.u32 4294901760, %v6832_v58 }
 0x420   : > { %3781 = vmatpush.msra.mxu1 %v3780_v11  ;;  %3948 = vmatpush.msrb.mxu2 %v6794_v62 }
 0x421   : > { %v2932_v20 = vand.u32 4294901760, %v2931_v13  ;;  %v4559_v13 = vld [vmem:[%s7311_s1 + $0x248] sm:$0xff] }
 0x422   : > { %3951 = vmatpush.msrb.mxu2 %v6813_v24  ;;  %v6845_v23 = vand.u32 4294901760, %v4559_v13 }
 0x423   : > { %2933 = vmatmul.f32.gmra.mxu2 %v2932_v20  ;;  %3518 = vmatmul.f32.vlgmr.msra.gmra.mxu3 %v6636_v61 }
 0x424   : > { %3954 = vmatpush.msrb.mxu2 %v6832_v58  ;;  %3628 = vmatpush.msra.mxu0 %v6845_v23 }
 0x425   : > { %4079 = vmatpush.msrb.mxu3 %v6845_v23 }
 0x426   : > { %v3035_v6 = vpop.f32.mrf.mxu3 }
 0x42b   : > { %3421 = vmatmul.f32.vlgmr.msra.gmra.mxu2 %v6636_v61  ;;  %3522 = vmatmul.f32.gmra.mxu3 %v6643_v41  ;;  %v3785_v61 = vsub.f32 %v6756_v51, %v7381_v30 }
 0x42d   : > { %v3786_v29 = vand.u32 4294901760, %v3785_v61 }
 0x42e   : > { %v2814_v36 = vpop.f32.mrf.mxu2  ;;  %v3039_v25 = vpop.f32.mrf.mxu3 }
 0x42f   : > { %v6759_v21 = vadd.f32 %v3035_v6, %v2814_v36  ;;  %3787 = vmatpush.msra.mxu1 %v3786_v29  ;;  %v6851_v6 = vsub.f32 %v4559_v13, %v6845_v23 }
 0x431   : > { %v7376_v11 = vand.u32 4294901760, %v6851_v6  ;;  %3957 = vmatpush.msrb.mxu2 %v6851_v6 }
 0x433   : > { %3425 = vmatmul.f32.gmra.mxu2 %v6643_v41  ;;  %3526 = vmatmul.f32.gmra.mxu3 %v6650_v28  ;;  %v3791_v41 = vsub.f32 %v6775_v54, %v7380_v45 }
 0x435   : > { %v3792_v42 = vand.u32 4294901760, %v3791_v41 }
 0x436   : > { %v2822_v35 = vpop.f32.mrf.mxu2  ;;  %v3043_v57 = vpop.f32.mrf.mxu3 }
 0x437   : > { %v6780_v1 = vadd.f32 %v3039_v25, %v2822_v35  ;;  %3793 = vmatpush.msra.mxu1 %v3792_v42  ;;  %v4558_v25 = vld [vmem:[%s7311_s1 + $0x240] sm:$0xff]  ;;  %v4557_v42 = vld [vmem:[%s7311_s1 + $0x238] sm:$0xff] }
 0x438   : > { %v6864_v34 = vand.u32 4294901760, %v4558_v25 }
 0x43a   : > { %3630 = vmatpush.msra.mxu0 %v6864_v34  ;;  %v6870_v29 = vsub.f32 %v4558_v25, %v6864_v34  ;;  %4081 = vmatpush.msrb.mxu3 %v6864_v34 }
 0x43b   : > { %3429 = vmatmul.f32.gmra.mxu2 %v6650_v28  ;;  %3530 = vmatmul.f32.gmra.mxu3 %v6657_v55  ;;  %v3797_v28 = vsub.f32 %v6794_v62, %v7379_v39 }
 0x43c   : > { %v7375_v41 = vand.u32 4294901760, %v6870_v29  ;;  %3960 = vmatpush.msrb.mxu2 %v6870_v29 }
 0x43d   : > { %v3798_v5 = vand.u32 4294901760, %v3797_v28 }
 0x43e   : > { %v2830_v2 = vpop.f32.mrf.mxu2  ;;  %v3047_v40 = vpop.f32.mrf.mxu3 }
 0x43f   : > { %v6799_v63 = vadd.f32 %v3043_v57, %v2830_v2  ;;  %3799 = vmatpush.msra.mxu1 %v3798_v5 }
 0x443   : > { %3433 = vmatmul.f32.gmra.mxu2 %v6657_v55  ;;  %3534 = vmatmul.f32.gmra.mxu3 %v6660_v7  ;;  %v3803_v55 = vsub.f32 %v6813_v24, %v7378_v0 }
 0x445   : > { %v3804_v52 = vand.u32 4294901760, %v3803_v55  ;;  %v4556_v55 = vld [vmem:[%s7311_s1 + $0x230] sm:$0xff] }
 0x446   : > { %v2838_v16 = vpop.f32.mrf.mxu2  ;;  %v3051_v3 = vpop.f32.mrf.mxu3 }
 0x447   : > { %v6818_v49 = vadd.f32 %v3047_v40, %v2838_v16  ;;  %3805 = vmatpush.msra.mxu1 %v3804_v52  ;;  %v6883_v40 = vand.u32 4294901760, %v4557_v42  ;;  %v6904_v52 = vand.u32 4294901760, %v4556_v55 }
 0x449   : > { %3632 = vmatpush.msra.mxu0 %v6883_v40  ;;  %v6889_v28 = vsub.f32 %v4557_v42, %v6883_v40  ;;  %4083 = vmatpush.msrb.mxu3 %v6883_v40 }
 0x44b   : > { %3437 = vmatmul.f32.gmra.mxu2 %v6660_v7  ;;  %3538 = vmatmul.f32.gmra.mxu3 %v6666_v53  ;;  %v3809_v7 = vsub.f32 %v6832_v58, %v7377_v4  ;;  %v7373_v16 = vand.u32 4294901760, %v6889_v28 }
 0x44c   : > { %3963 = vmatpush.msrb.mxu2 %v6889_v28  ;;  %3634 = vmatpush.msra.mxu0 %v6904_v52 }
 0x44d   : > { %v3810_v20 = vand.u32 4294901760, %v3809_v7  ;;  %4085 = vmatpush.msrb.mxu3 %v6904_v52 }
 0x44e   : > { %v2846_v43 = vpop.f32.mrf.mxu2  ;;  %v3055_v60 = vpop.f32.mrf.mxu3 }
 0x44f   : > { %v6837_v15 = vadd.f32 %v3051_v3, %v2846_v43  ;;  %3811 = vmatpush.msra.mxu1 %v3810_v20  ;;  %v6910_v43 = vsub.f32 %v4556_v55, %v6904_v52  ;;  %v4555_v20 = vld [vmem:[%s7311_s1 + $0x228] sm:$0xff] }
 0x451   : > { %v7372_v13 = vand.u32 4294901760, %v6910_v43  ;;  %3966 = vmatpush.msrb.mxu2 %v6910_v43 }
 0x453   : > { %3441 = vmatmul.f32.gmra.mxu2 %v6666_v53  ;;  %3542 = vmatmul.f32.gmra.mxu3 %v6673_v8  ;;  %v3815_v53 = vsub.f32 %v6851_v6, %v7376_v11  ;;  %v7014_v11 = vpop.f32.mrf.mxu1 }
 0x455   : > { %v3816_v61 = vand.u32 4294901760, %v3815_v53 }
 0x456   : > { %v2854_v50 = vpop.f32.mrf.mxu2  ;;  %v3059_v9 = vpop.f32.mrf.mxu3 }
 0x457   : > { %v6856_v36 = vadd.f32 %v3055_v60, %v2854_v50  ;;  %3817 = vmatpush.msra.mxu1 %v3816_v61 }
 0x45b   : > { %3445 = vmatmul.f32.gmra.mxu2 %v6673_v8  ;;  %3546 = vmatmul.f32.gmra.mxu3 %v6681_v10  ;;  %v3821_v8 = vsub.f32 %v6870_v29, %v7375_v41 }
 0x45d   : > { %v3822_v2 = vand.u32 4294901760, %v3821_v8 }
 0x45e   : > { %v2862_v35 = vpop.f32.mrf.mxu2  ;;  %v3063_v57 = vpop.f32.mrf.mxu3 }
 0x45f   : > { %v6875_v19 = vadd.f32 %v3059_v9, %v2862_v35  ;;  %3823 = vmatpush.msra.mxu1 %v3822_v2  ;;  %v6925_v9 = vand.u32 4294901760, %v4555_v20 }
 0x461   : > { %3636 = vmatpush.msra.mxu0 %v6925_v9  ;;  %v6931_v53 = vsub.f32 %v4555_v20, %v6925_v9  ;;  %4087 = vmatpush.msrb.mxu3 %v6925_v9 }
 0x463   : > { %3449 = vmatmul.f32.gmra.mxu2 %v6681_v10  ;;  %3550 = vmatmul.f32.gmra.mxu3 %v6683_v18  ;;  %v3827_v10 = vsub.f32 %v6889_v28, %v7373_v16  ;;  %v7371_v35 = vand.u32 4294901760, %v6931_v53 }
 0x464   : > { %3969 = vmatpush.msrb.mxu2 %v6931_v53 }
 0x465   : > { %v3828_v31 = vand.u32 4294901760, %v3827_v10 }
 0x466   : > { %v2870_v44 = vpop.f32.mrf.mxu2  ;;  %v6892_v5 = vpop.f32.mrf.mxu3 }
 0x467   : > { %v6896_v3 = vadd.f32 %v3063_v57, %v2870_v44  ;;  %3829 = vmatpush.msra.mxu1 %v3828_v31  ;;  %v4554_v57 = vld [vmem:[%s7311_s1 + $0x220] sm:$0xff]  ;;  %v4553_v31 = vld [vmem:[%s7311_s1 + $0x218] sm:$0xff] }
 0x468   : > { %v6946_v42 = vand.u32 4294901760, %v4554_v57  ;;  %v6967_v20 = vand.u32 4294901760, %v4553_v31 }
 0x46a   : > { %3638 = vmatpush.msra.mxu0 %v6946_v42  ;;  %v6952_v2 = vsub.f32 %v4554_v57, %v6946_v42  ;;  %4089 = vmatpush.msrb.mxu3 %v6946_v42 }
 0x46b   : > { %3453 = vmatmul.f32.gmra.mxu2 %v6683_v18  ;;  %3554 = vmatmul.f32.gmra.mxu3 %v6691_v22  ;;  %v3833_v18 = vsub.f32 %v6910_v43, %v7372_v13 }
 0x46c   : > { %v7370_v55 = vand.u32 4294901760, %v6952_v2  ;;  %3972 = vmatpush.msrb.mxu2 %v6952_v2  ;;  %3640 = vmatpush.msra.mxu0 %v6967_v20 }
 0x46d   : > { %v3834_v50 = vand.u32 4294901760, %v3833_v18  ;;  %4091 = vmatpush.msrb.mxu3 %v6967_v20 }
 0x46e   : > { %v6913_v60 = vpop.f32.mrf.mxu2  ;;  %v6915_v7 = vpop.f32.mrf.mxu3 }
 0x46f   : > { %3835 = vmatpush.msra.mxu1 %v3834_v50  ;;  %v6973_v50 = vsub.f32 %v4553_v31, %v6967_v20 }
 0x471   : > { %3975 = vmatpush.msrb.mxu2 %v6973_v50 }
 0x473   : > { %3457 = vmatmul.f32.gmra.mxu2 %v6691_v22  ;;  %3558 = vmatmul.f32.gmra.mxu3 %v6699_v48  ;;  %v3839_v22 = vsub.f32 %v6931_v53, %v7371_v35 }
 0x475   : > { %v3840_v8 = vand.u32 4294901760, %v3839_v22 }
 0x476   : > { %v6934_v25 = vpop.f32.mrf.mxu2  ;;  %v6936_v61 = vpop.f32.mrf.mxu3 }
 0x477   : > { %3841 = vmatpush.msra.mxu1 %v3840_v8  ;;  %v7374_v8 = vand.u32 4294901760, %v6973_v50 }
 0x47b   : > { %3461 = vmatmul.f32.gmra.mxu2 %v6699_v48  ;;  %3562 = vmatmul.f32.gmra.mxu3 %v6701_v46  ;;  %v3845_v48 = vsub.f32 %v6952_v2, %v7370_v55  ;;  %v4551_v55 = vld [vmem:[%s7311_s1 + $0x208] sm:$0xff] }
 0x47c   : > { %v6999_v16 = vand.u32 4294901760, %v4551_v55 }
 0x47d   : > { %v3846_v18 = vand.u32 4294901760, %v3845_v48  ;;  %v3851_v48 = vsub.f32 %v6973_v50, %v7374_v8  ;;  %v4550_v8 = vld [vmem:[%s7311_s1 + $0x200] sm:$0xff] }
 0x47e   : > { %v6955_v44 = vpop.f32.mrf.mxu2  ;;  %v6957_v10 = vpop.f32.mrf.mxu3  ;;  %v7012_v41 = vand.u32 4294901760, %v4550_v8 }
 0x47f   : > { %3847 = vmatpush.msra.mxu1 %v3846_v18  ;;  %v6990_v18 = vpop.f32.mrf.mxu0  ;;  %v3852_v35 = vand.u32 4294901760, %v3851_v48 }
 0x481   : > { %3853 = vmatpush.msra.mxu1 %v3852_v35 }
 0x483   : > { %3465 = vmatmul.f32.gmra.mxu2 %v6701_v46  ;;  %3566 = vmatmul.f32.gmra.mxu3 %v6709_v47  ;;  %v4552_v46 = vld [vmem:[%s7311_s1 + $0x210] sm:$0xff] }
 0x484   : > { %v6988_v31 = vand.u32 4294901760, %v4552_v46 }
 0x486   : > { %v6976_v22 = vpop.f32.mrf.mxu2  ;;  %v6978_v57 = vpop.f32.mrf.mxu3  ;;  %3642 = vmatpush.msra.mxu0 %v6988_v31  ;;  %v6997_v13 = vsub.f32 %v4552_v46, %v6988_v31  ;;  %4093 = vmatpush.msrb.mxu3 %v6988_v31  ;;  %v7010_v46 = vsub.f32 %v4551_v55, %v6999_v16  ;;  %v3867_v55 = vsub.f32 %v4550_v8, %v7012_v41 }
 0x487   : > { %7460 = vst [vmem:[#allocation6_spill] sm:$0xff] %v6978_v57  ;;  %v7463_v57 = vand.u32 4294901760, %v6756_v51  ;;  %v3154_v8 = vpop.f32.mrf.mxu0  ;;  %v3269_v51 = vpop.f32.mrf.mxu1 }
 0x488   : > { %v7382_v48 = vand.u32 4294901760, %v6997_v13  ;;  %3644 = vmatpush.msra.mxu0 %v6999_v16  ;;  %3978 = vmatpush.msrb.mxu2 %v6997_v13  ;;  %v3862_v0 = vand.u32 4294901760, %v7010_v46  ;;  %v3868_v30 = vand.u32 4294901760, %v3867_v55 }
 0x489   : > { %4095 = vmatpush.msrb.mxu3 %v6999_v16 }
 0x48a   : > { %v3857_v35 = vsub.f32 %v6997_v13, %v7382_v48  ;;  %3646 = vmatpush.msra.mxu0 %v7012_v41  ;;  %3981 = vmatpush.msrb.mxu2 %v7010_v46  ;;  %v3863_v45 = vsub.f32 %v7010_v46, %v3862_v0  ;;  %v7464_v46 = vand.u32 4294901760, %v6775_v54  ;;  %v7468_v54 = vand.u32 4294901760, %v6851_v6 }
 0x48b   : > { %3469 = vmatmul.f32.gmra.mxu2 %v6709_v47  ;;  %3570 = vmatmul.f32.gmra.mxu3 %v6717_v59 }
 0x48c   : > { %4097 = vmatpush.msrb.mxu3 %v7012_v41  ;;  %v3858_v39 = vand.u32 4294901760, %v3857_v35  ;;  %4198 = vmatpush.msrb.mxu0 %v3778_v56  ;;  %v3864_v48 = vand.u32 4294901760, %v3863_v45  ;;  %v7465_v56 = vand.u32 4294901760, %v6794_v62  ;;  %v7467_v45 = vand.u32 4294901760, %v6832_v58 }
 0x48d   : > { %3984 = vmatpush.msrb.mxu2 %v3867_v55 }
 0x48e   : > { %v7018_v47 = vpop.f32.mrf.mxu2  ;;  %v7020_v4 = vpop.f32.mrf.mxu3  ;;  %3859 = vmatpush.msra.mxu1 %v3858_v39  ;;  %4202 = vmatpush.msrb.mxu0 %v7463_v57 }
 0x48f   : > { %7461 = vst [vmem:[#allocation5_spill] sm:$0xff] %v7018_v47  ;;  %v3159_v62 = vpop.f32.mrf.mxu0 }
 0x490   : > { %7462 = vst [vmem:[#allocation8_spill] sm:$0xff] %v7020_v4  ;;  %v3869_v4 = vsub.f32 %v3867_v55, %v3868_v30  ;;  %3865 = vmatpush.msra.mxu1 %v3864_v48  ;;  %4206 = vmatpush.msrb.mxu0 %v7464_v46 }
 0x492   : > { %v3870_v35 = vand.u32 4294901760, %v3869_v4  ;;  %4210 = vmatpush.msrb.mxu0 %v7465_v56 }
 0x493   : > { %3473 = vmatmul.f32.gmra.mxu2 %v6717_v59  ;;  %3574 = vmatmul.f32.gmra.mxu3 %v6719_v38  ;;  %v7466_v59 = vand.u32 4294901760, %v6813_v24  ;;  %v3275_v24 = vpop.f32.mrf.mxu1 }
 0x494   : > { %3871 = vmatpush.msra.mxu1 %v3870_v35 }
 0x495   : > { %4214 = vmatpush.msrb.mxu0 %v7466_v59 }
 0x496   : > { %v7039_v47 = vpop.f32.mrf.mxu2  ;;  %v7041_v37 = vpop.f32.mrf.mxu3  ;;  %4325 = vmatpush.msrb.mxu1 %v6734_v17 }
 0x497   : > { %4218 = vmatpush.msrb.mxu0 %v7467_v45  ;;  %v3164_v6 = vpop.f32.mrf.mxu0 }
 0x498   : > { %4327 = vmatpush.msrb.mxu1 %v6750_v32  ;;  %v7469_v32 = vand.u32 4294901760, %v6870_v29 }
 0x499   : > { %4222 = vmatpush.msrb.mxu0 %v7468_v54 }
 0x49a   : > { %4329 = vmatpush.msrb.mxu1 %v6769_v14  ;;  %v7471_v14 = vand.u32 4294901760, %v6910_v43 }
 0x49b   : > { %3477 = vmatmul.f32.gmra.mxu2 %v6719_v38  ;;  %3578 = vmatmul.f32.gmra.mxu3 %v6727_v33  ;;  %v7470_v38 = vand.u32 4294901760, %v6889_v28  ;;  %v3281_v29 = vpop.f32.mrf.mxu1 }
 0x49c   : > { %4331 = vmatpush.msrb.mxu1 %v6788_v12  ;;  %4226 = vmatpush.msrb.mxu0 %v7469_v32  ;;  %v7472_v12 = vand.u32 4294901760, %v6931_v53 }
 0x49e   : > { %v7056_v39 = vpop.f32.mrf.mxu2  ;;  %v7058_v17 = vpop.f32.mrf.mxu3  ;;  %4333 = vmatpush.msrb.mxu1 %v6807_v26  ;;  %4230 = vmatpush.msrb.mxu0 %v7470_v38  ;;  %v7473_v26 = vand.u32 4294901760, %v6952_v2 }
 0x4a0   : > { %4335 = vmatpush.msrb.mxu1 %v6826_v27  ;;  %4234 = vmatpush.msrb.mxu0 %v7471_v14  ;;  %v7474_v27 = vand.u32 4294901760, %v6973_v50 }
 0x4a2   : > { %4337 = vmatpush.msrb.mxu1 %v6845_v23  ;;  %4238 = vmatpush.msrb.mxu0 %v7472_v12  ;;  %v7475_v23 = vand.u32 4294901760, %v6997_v13 }
 0x4a3   : > { %3481 = vmatmul.f32.gmra.mxu2 %v6727_v33  ;;  %v3150_v33 = vadd.f32 %v6990_v18, %v6759_v21  ;;  %v3155_v21 = vadd.f32 %v3154_v8, %v6780_v1  ;;  %v3160_v1 = vadd.f32 %v3159_v62, %v6799_v63 }
 0x4a4   : > { %4339 = vmatpush.msrb.mxu1 %v6864_v34  ;;  %4242 = vmatpush.msrb.mxu0 %v7473_v26 }
 0x4a5   : > { %v3264_v34 = vadd.f32 %v7014_v11, %v3150_v33  ;;  %v3270_v11 = vadd.f32 %v3269_v51, %v3155_v21  ;;  %v3276_v8 = vadd.f32 %v3275_v24, %v3160_v1  ;;  %v3165_v51 = vadd.f32 %v3164_v6, %v6818_v49 }
 0x4a6   : > { %v7073_v58 = vpop.f32.mrf.mxu2  ;;  %v3519_v4 = vpop.f32.mrf.mxu3  ;;  %4341 = vmatpush.msrb.mxu1 %v6883_v40  ;;  %4246 = vmatpush.msrb.mxu0 %v7474_v27 }
 0x4a7   : > { %v3282_v24 = vadd.f32 %v3281_v29, %v3165_v51 }
 0x4a8   : > { %4343 = vmatpush.msrb.mxu1 %v6904_v52  ;;  %4250 = vmatpush.msrb.mxu0 %v7475_v23  ;;  %v3169_v52 = vpop.f32.mrf.mxu0 }
 0x4a9   : > { %v3170_v49 = vadd.f32 %v3169_v52, %v6837_v15 }
 0x4aa   : > { %4345 = vmatpush.msrb.mxu1 %v6925_v9  ;;  %4254 = vmatpush.msrb.mxu0 %v3862_v0  ;;  %v3287_v0 = vpop.f32.mrf.mxu1 }
 0x4ab   : > { %v3288_v29 = vadd.f32 %v3287_v0, %v3170_v49  ;;  %v3068_v49 = vadd.f32 %v6892_v5, %v6913_v60 }
 0x4ac   : > { %4347 = vmatpush.msrb.mxu1 %v6946_v42  ;;  %4258 = vmatpush.msrb.mxu0 %v3868_v30 }
 0x4ae   : > { %v3422_v28 = vpop.f32.mrf.mxu2  ;;  %v3523_v43 = vpop.f32.mrf.mxu3  ;;  %4349 = vmatpush.msrb.mxu1 %v6967_v20 }
 0x4af   : > { %v3423_v40 = vadd.f32 %v3422_v28, %v3264_v34 }
 0x4b0   : > { %4351 = vmatpush.msrb.mxu1 %v6988_v31  ;;  %v3174_v31 = vpop.f32.mrf.mxu0 }
 0x4b1   : > { %v3520_v53 = vadd.f32 %v3519_v4, %v3423_v40  ;;  %v3175_v52 = vadd.f32 %v3174_v31, %v6856_v36 }
 0x4b2   : > { %4353 = vmatpush.msrb.mxu1 %v6999_v16  ;;  %v3293_v46 = vpop.f32.mrf.mxu1 }
 0x4b3   : > { %v3582_v13 = vmax.f32 %v3520_v53, 0.0 }
 0x4b4   : > { %4355 = vmatpush.msrb.mxu1 %v7012_v41 }
 0x4b5   : > { %v7093_v9 = vand.u32 4294901760, %v3582_v13 }
 0x4b6   : > { %v3426_v2 = vpop.f32.mrf.mxu2  ;;  %v3527_v50 = vpop.f32.mrf.mxu3 }
 0x4b7   : > { %v3648_v30 = vsub.f32 %v3582_v13, %v7093_v9  ;;  %v3427_v42 = vadd.f32 %v3426_v2, %v3270_v11  ;;  %3873 = vmatmul.f32.vlgmr.msra.gmra.mxu1 %v7093_v9 }
 0x4b8   : > { %v3179_v32 = vpop.f32.mrf.mxu0 }
 0x4b9   : > { %v3649_v20 = vand.u32 4294901760, %v3648_v30  ;;  %v3524_v57 = vadd.f32 %v3523_v43, %v3427_v42  ;;  %3987 = vmatmul.f32.vlgmr.msrb.gmra.mxu2 %v3648_v30  ;;  %v3180_v36 = vadd.f32 %v3179_v32, %v6875_v19 }
 0x4ba   : > { %v3299_v6 = vpop.f32.mrf.mxu1 }
 0x4bb   : > { %v3650_v16 = vsub.f32 %v3648_v30, %v3649_v20  ;;  %v3583_v18 = vmax.f32 %v3524_v57, 0.0  ;;  %4101 = vmatmul.f32.vlgmr.msrb.gmra.mxu3 %v3649_v20  ;;  %v3294_v20 = vadd.f32 %v3293_v46, %v3175_v52 }
 0x4bd   : > { %v3651_v48 = vand.u32 4294901760, %v3650_v16  ;;  %v7099_v55 = vand.u32 4294901760, %v3583_v18 }
 0x4be   : > { %v3430_v35 = vpop.f32.mrf.mxu2  ;;  %v3531_v41 = vpop.f32.mrf.mxu3 }
 0x4bf   : > { %v3431_v56 = vadd.f32 %v3430_v35, %v3276_v8  ;;  %3652 = vmatmul.f32.vlgmr.msra.gmra.mxu0 %v3651_v48  ;;  %3877 = vmatmul.f32.gmra.mxu1 %v7099_v55  ;;  %v3656_v63 = vsub.f32 %v3583_v18, %v7099_v55 }
 0x4c0   : > { %v3184_v13 = vpop.f32.mrf.mxu0 }
 0x4c1   : > { %v3528_v59 = vadd.f32 %v3527_v50, %v3431_v56  ;;  %3992 = vmatmul.f32.gmra.mxu2 %v3656_v63  ;;  %v3657_v45 = vand.u32 4294901760, %v3656_v63  ;;  %v3185_v32 = vadd.f32 %v3184_v13, %v6896_v3 }
 0x4c2   : > { %v3305_v30 = vpop.f32.mrf.mxu1 }
 0x4c3   : > { %v3584_v54 = vmax.f32 %v3528_v59, 0.0  ;;  %4107 = vmatmul.f32.gmra.mxu3 %v3657_v45  ;;  %v3658_v62 = vsub.f32 %v3656_v63, %v3657_v45  ;;  %v3300_v59 = vadd.f32 %v3299_v6, %v3180_v36 }
 0x4c5   : > { %v7104_v38 = vand.u32 4294901760, %v3584_v54  ;;  %v3659_v14 = vand.u32 4294901760, %v3658_v62 }
 0x4c6   : > { %v3434_v12 = vpop.f32.mrf.mxu2  ;;  %v3535_v4 = vpop.f32.mrf.mxu3 }
 0x4c7   : > { %v3435_v26 = vadd.f32 %v3434_v12, %v3282_v24  ;;  %3660 = vmatmul.f32.gmra.mxu0 %v3659_v14  ;;  %3881 = vmatmul.f32.gmra.mxu1 %v7104_v38  ;;  %v3664_v27 = vsub.f32 %v3584_v54, %v7104_v38 }
 0x4c8   : > { %v3189_v31 = vpop.f32.mrf.mxu0 }
 0x4c9   : > { %v3532_v33 = vadd.f32 %v3531_v41, %v3435_v26  ;;  %3997 = vmatmul.f32.gmra.mxu2 %v3664_v27  ;;  %v3665_v23 = vand.u32 4294901760, %v3664_v27 }
 0x4ca   : > { %v3311_v51 = vpop.f32.mrf.mxu1 }
 0x4cb   : > { %v3585_v34 = vmax.f32 %v3532_v33, 0.0  ;;  %4113 = vmatmul.f32.gmra.mxu3 %v3665_v23  ;;  %v3666_v28 = vsub.f32 %v3664_v27, %v3665_v23  ;;  %v3306_v33 = vadd.f32 %v3305_v30, %v3185_v32 }
 0x4cd   : > { %v7109_v43 = vand.u32 4294901760, %v3585_v34  ;;  %v3667_v40 = vand.u32 4294901760, %v3666_v28 }
 0x4ce   : > { %v3438_v21 = vpop.f32.mrf.mxu2  ;;  %v3539_v53 = vpop.f32.mrf.mxu3 }
 0x4cf   : > { %v3439_v11 = vadd.f32 %v3438_v21, %v3288_v29  ;;  %3668 = vmatmul.f32.gmra.mxu0 %v3667_v40  ;;  %3885 = vmatmul.f32.gmra.mxu1 %v7109_v43  ;;  %v3672_v15 = vsub.f32 %v3585_v34, %v7109_v43  ;;  %v3190_v21 = vadd.f32 %v3189_v31, %v3068_v49 }
 0x4d1   : > { %v3536_v2 = vadd.f32 %v3535_v4, %v3439_v11  ;;  %4002 = vmatmul.f32.gmra.mxu2 %v3672_v15  ;;  %v3673_v50 = vand.u32 4294901760, %v3672_v15  ;;  %v3194_v4 = vpop.f32.mrf.mxu0 }
 0x4d2   : > { %v3317_v40 = vpop.f32.mrf.mxu1 }
 0x4d3   : > { %v3586_v42 = vmax.f32 %v3536_v2, 0.0  ;;  %4119 = vmatmul.f32.gmra.mxu3 %v3673_v50  ;;  %v3674_v1 = vsub.f32 %v3672_v15, %v3673_v50  ;;  %v3072_v15 = vadd.f32 %v6915_v7, %v6934_v25  ;;  %v3312_v2 = vadd.f32 %v3311_v51, %v3190_v21 }
 0x4d4   : > { %v3076_v25 = vadd.f32 %v6936_v61, %v6955_v44 }
 0x4d5   : > { %v7114_v0 = vand.u32 4294901760, %v3586_v42  ;;  %v3675_v57 = vand.u32 4294901760, %v3674_v1 }
 0x4d6   : > { %v3442_v16 = vpop.f32.mrf.mxu2  ;;  %v3543_v18 = vpop.f32.mrf.mxu3 }
 0x4d7   : > { %v3443_v48 = vadd.f32 %v3442_v16, %v3294_v20  ;;  %3676 = vmatmul.f32.gmra.mxu0 %v3675_v57  ;;  %3889 = vmatmul.f32.gmra.mxu1 %v7114_v0  ;;  %v3680_v8 = vsub.f32 %v3586_v42, %v7114_v0  ;;  %v3195_v57 = vadd.f32 %v3194_v4, %v3072_v15 }
 0x4d9   : > { %v3540_v35 = vadd.f32 %v3539_v53, %v3443_v48  ;;  %4007 = vmatmul.f32.gmra.mxu2 %v3680_v8  ;;  %v3681_v41 = vand.u32 4294901760, %v3680_v8  ;;  %v3199_v60 = vpop.f32.mrf.mxu0  ;;  %v3318_v31 = vadd.f32 %v3317_v40, %v3195_v57 }
 0x4da   : > { %v3323_v48 = vpop.f32.mrf.mxu1 }
 0x4db   : > { %v3587_v56 = vmax.f32 %v3540_v35, 0.0  ;;  %4125 = vmatmul.f32.gmra.mxu3 %v3681_v41  ;;  %v3682_v63 = vsub.f32 %v3680_v8, %v3681_v41 }
 0x4dd   : > { %v7119_v46 = vand.u32 4294901760, %v3587_v56  ;;  %v3683_v45 = vand.u32 4294901760, %v3682_v63 }
 0x4de   : > { %v3446_v54 = vpop.f32.mrf.mxu2  ;;  %v3547_v62 = vpop.f32.mrf.mxu3 }
 0x4df   : > { %v3447_v24 = vadd.f32 %v3446_v54, %v3300_v59  ;;  %3684 = vmatmul.f32.gmra.mxu0 %v3683_v45  ;;  %3893 = vmatmul.f32.gmra.mxu1 %v7119_v46  ;;  %v3688_v19 = vsub.f32 %v3587_v56, %v7119_v46  ;;  %v3200_v45 = vadd.f32 %v3199_v60, %v3076_v25 }
 0x4e1   : > { %v3544_v14 = vadd.f32 %v3543_v18, %v3447_v24  ;;  %4012 = vmatmul.f32.gmra.mxu2 %v3688_v19  ;;  %v3689_v12 = vand.u32 4294901760, %v3688_v19  ;;  %v3204_v59 = vpop.f32.mrf.mxu0 }
 0x4e2   : > { %v3329_v44 = vpop.f32.mrf.mxu1 }
 0x4e3   : > { %v3588_v26 = vmax.f32 %v3544_v14, 0.0  ;;  %4131 = vmatmul.f32.gmra.mxu3 %v3689_v12  ;;  %v3690_v27 = vsub.f32 %v3688_v19, %v3689_v12  ;;  %v3080_v19 = vadd.f32 %v6957_v10, %v6976_v22  ;;  %v3324_v14 = vadd.f32 %v3323_v48, %v3200_v45  ;;  %v7476_v22 = vld [vmem:[#allocation5_spill] sm:$0xff] }
 0x4e5   : > { %v7126_v6 = vand.u32 4294901760, %v3588_v26  ;;  %v3691_v23 = vand.u32 4294901760, %v3690_v27 }
 0x4e6   : > { %v3450_v34 = vpop.f32.mrf.mxu2  ;;  %v3551_v28 = vpop.f32.mrf.mxu3 }
 0x4e7   : > { %v3451_v29 = vadd.f32 %v3450_v34, %v3306_v33  ;;  %3692 = vmatmul.f32.gmra.mxu0 %v3691_v23  ;;  %3897 = vmatmul.f32.gmra.mxu1 %v7126_v6  ;;  %v3696_v3 = vsub.f32 %v3588_v26, %v7126_v6  ;;  %v3205_v33 = vadd.f32 %v3204_v59, %v3080_v19 }
 0x4e9   : > { %v3548_v53 = vadd.f32 %v3547_v62, %v3451_v29  ;;  %4017 = vmatmul.f32.gmra.mxu2 %v3696_v3  ;;  %v3697_v13 = vand.u32 4294901760, %v3696_v3 }
 0x4eb   : > { %v3589_v11 = vmax.f32 %v3548_v53, 0.0  ;;  %4137 = vmatmul.f32.gmra.mxu3 %v3697_v13  ;;  %v3698_v5 = vsub.f32 %v3696_v3, %v3697_v13  ;;  %v7477_v3 = vld [vmem:[#allocation6_spill] sm:$0xff]  ;;  %v3330_v53 = vadd.f32 %v3329_v44, %v3205_v33 }
 0x4ec   : > { %v3084_v40 = vadd.f32 %v7477_v3, %v7476_v22 }
 0x4ed   : > { %v7132_v52 = vand.u32 4294901760, %v3589_v11  ;;  %v3699_v50 = vand.u32 4294901760, %v3698_v5 }
 0x4ee   : > { %v3454_v30 = vpop.f32.mrf.mxu2  ;;  %v3555_v42 = vpop.f32.mrf.mxu3 }
 0x4ef   : > { %v3455_v1 = vadd.f32 %v3454_v30, %v3312_v2  ;;  %3700 = vmatmul.f32.gmra.mxu0 %v3699_v50  ;;  %3901 = vmatmul.f32.gmra.mxu1 %v7132_v52  ;;  %v3704_v20 = vsub.f32 %v3589_v11, %v7132_v52  ;;  %v3335_v11 = vpop.f32.mrf.mxu1 }
 0x4f1   : > { %v3552_v16 = vadd.f32 %v3551_v28, %v3455_v1  ;;  %4022 = vmatmul.f32.gmra.mxu2 %v3704_v20  ;;  %v3705_v18 = vand.u32 4294901760, %v3704_v20  ;;  %v3209_v28 = vpop.f32.mrf.mxu0 }
 0x4f2   : > { %v3210_v2 = vadd.f32 %v3209_v28, %v3084_v40 }
 0x4f3   : > { %v3590_v8 = vmax.f32 %v3552_v16, 0.0  ;;  %4143 = vmatmul.f32.gmra.mxu3 %v3705_v18  ;;  %v3706_v7 = vsub.f32 %v3704_v20, %v3705_v18  ;;  %v7478_v16 = vld [vmem:[#allocation8_spill] sm:$0xff] }
 0x4f4   : > { %v3088_v18 = vadd.f32 %v7478_v16, %v7039_v47 }
 0x4f5   : > { %v7138_v36 = vand.u32 4294901760, %v3590_v8  ;;  %v3707_v35 = vand.u32 4294901760, %v3706_v7 }
 0x4f6   : > { %v3458_v41 = vpop.f32.mrf.mxu2  ;;  %v3559_v56 = vpop.f32.mrf.mxu3 }
 0x4f7   : > { %v3459_v63 = vadd.f32 %v3458_v41, %v3318_v31  ;;  %3708 = vmatmul.f32.gmra.mxu0 %v3707_v35  ;;  %3905 = vmatmul.f32.gmra.mxu1 %v7138_v36  ;;  %v3712_v51 = vsub.f32 %v3590_v8, %v7138_v36  ;;  %v3336_v8 = vadd.f32 %v3335_v11, %v3210_v2  ;;  %v3341_v41 = vpop.f32.mrf.mxu1 }
 0x4f9   : > { %v3556_v54 = vadd.f32 %v3555_v42, %v3459_v63  ;;  %4027 = vmatmul.f32.gmra.mxu2 %v3712_v51  ;;  %v3713_v62 = vand.u32 4294901760, %v3712_v51  ;;  %v3214_v57 = vpop.f32.mrf.mxu0 }
 0x4fb   : > { %v3591_v24 = vmax.f32 %v3556_v54, 0.0  ;;  %4149 = vmatmul.f32.gmra.mxu3 %v3713_v62  ;;  %v3714_v61 = vsub.f32 %v3712_v51, %v3713_v62  ;;  %v3092_v54 = vadd.f32 %v7041_v37, %v7056_v39  ;;  %v3096_v39 = vadd.f32 %v7058_v17, %v7073_v58 }
 0x4fd   : > { %v7144_v32 = vand.u32 4294901760, %v3591_v24  ;;  %v3715_v12 = vand.u32 4294901760, %v3714_v61 }
 0x4fe   : > { %v3462_v4 = vpop.f32.mrf.mxu2  ;;  %v3563_v49 = vpop.f32.mrf.mxu3 }
 0x4ff   : > { %v3463_v26 = vadd.f32 %v3462_v4, %v3324_v14  ;;  %3716 = vmatmul.f32.gmra.mxu0 %v3715_v12  ;;  %3909 = vmatmul.f32.gmra.mxu1 %v7144_v32  ;;  %v3720_v27 = vsub.f32 %v3591_v24, %v7144_v32 }
 0x501   : > { %v3560_v23 = vadd.f32 %v3559_v56, %v3463_v26  ;;  %4032 = vmatmul.f32.gmra.mxu2 %v3720_v27  ;;  %v3721_v34 = vand.u32 4294901760, %v3720_v27  ;;  %v3215_v56 = vadd.f32 %v3214_v57, %v3088_v18  ;;  %v3219_v44 = vpop.f32.mrf.mxu0 }
 0x502   : > { %v3220_v4 = vadd.f32 %v3219_v44, %v3092_v54 }
 0x503   : > { %v3592_v29 = vmax.f32 %v3560_v23, 0.0  ;;  %4155 = vmatmul.f32.gmra.mxu3 %v3721_v34  ;;  %v3722_v10 = vsub.f32 %v3720_v27, %v3721_v34  ;;  %v3342_v24 = vadd.f32 %v3341_v41, %v3215_v56 }
 0x505   : > { %v7150_v21 = vand.u32 4294901760, %v3592_v29  ;;  %v3723_v13 = vand.u32 4294901760, %v3722_v10 }
 0x506   : > { %v3466_v5 = vpop.f32.mrf.mxu2  ;;  %v3567_v42 = vpop.f32.mrf.mxu3 }
 0x507   : > { %v3467_v60 = vadd.f32 %v3466_v5, %v3330_v53  ;;  %3724 = vmatmul.f32.gmra.mxu0 %v3723_v13  ;;  %3913 = vmatmul.f32.gmra.mxu1 %v7150_v21  ;;  %v3728_v15 = vsub.f32 %v3592_v29, %v7150_v21 }
 0x509   : > { %v3564_v50 = vadd.f32 %v3563_v49, %v3467_v60  ;;  %4037 = vmatmul.f32.gmra.mxu2 %v3728_v15  ;;  %v3729_v30 = vand.u32 4294901760, %v3728_v15  ;;  %v3347_v49 = vpop.f32.mrf.mxu1  ;;  %v3224_v40 = vpop.f32.mrf.mxu0 }
 0x50a   : > { %v3348_v34 = vadd.f32 %v3347_v49, %v3220_v4  ;;  %v3225_v53 = vadd.f32 %v3224_v40, %v3096_v39 }
 0x50b   : > { %v3593_v1 = vmax.f32 %v3564_v50, 0.0  ;;  %4161 = vmatmul.f32.gmra.mxu3 %v3729_v30  ;;  %v3730_v20 = vsub.f32 %v3728_v15, %v3729_v30 }
 0x50d   : > { %v7156_v48 = vand.u32 4294901760, %v3593_v1  ;;  %v3731_v7 = vand.u32 4294901760, %v3730_v20 }
 0x50e   : > { %v3470_v25 = vpop.f32.mrf.mxu2  ;;  %v3571_v47 = vpop.f32.mrf.mxu3 }
 0x50f   : > { %v3471_v31 = vadd.f32 %v3470_v25, %v3336_v8  ;;  %3732 = vmatmul.f32.gmra.mxu0 %v3731_v7  ;;  %3917 = vmatmul.f32.gmra.mxu1 %v7156_v48  ;;  %v3736_v35 = vsub.f32 %v3593_v1, %v7156_v48 }
 0x511   : > { %v3568_v63 = vadd.f32 %v3567_v42, %v3471_v31  ;;  %4042 = vmatmul.f32.gmra.mxu2 %v3736_v35  ;;  %v3737_v51 = vand.u32 4294901760, %v3736_v35  ;;  %v3353_v58 = vpop.f32.mrf.mxu1 }
 0x512   : > { %v3354_v15 = vadd.f32 %v3353_v58, %v3225_v53 }
 0x513   : > { %v3594_v59 = vmax.f32 %v3568_v63, 0.0  ;;  %4167 = vmatmul.f32.gmra.mxu3 %v3737_v51  ;;  %v3738_v45 = vsub.f32 %v3736_v35, %v3737_v51 }
 0x515   : > { %v7162_v62 = vand.u32 4294901760, %v3594_v59  ;;  %v3739_v61 = vand.u32 4294901760, %v3738_v45 }
 0x516   : > { %v3474_v19 = vpop.f32.mrf.mxu2  ;;  %v3575_v29 = vpop.f32.mrf.mxu3 }
 0x517   : > { %v3475_v14 = vadd.f32 %v3474_v19, %v3342_v24  ;;  %3740 = vmatmul.f32.gmra.mxu0 %v3739_v61  ;;  %3921 = vmatmul.f32.gmra.mxu1 %v7162_v62  ;;  %v3744_v12 = vsub.f32 %v3594_v59, %v7162_v62 }
 0x519   : > { %v3572_v26 = vadd.f32 %v3571_v47, %v3475_v14  ;;  %4047 = vmatmul.f32.gmra.mxu2 %v3744_v12  ;;  %v3745_v27 = vand.u32 4294901760, %v3744_v12 }
 0x51b   : > { %v3595_v33 = vmax.f32 %v3572_v26, 0.0  ;;  %4173 = vmatmul.f32.gmra.mxu3 %v3745_v27  ;;  %v3746_v37 = vsub.f32 %v3744_v12, %v3745_v27 }
 0x51d   : > { %v7168_v23 = vand.u32 4294901760, %v3595_v33  ;;  %v3747_v28 = vand.u32 4294901760, %v3746_v37 }
 0x51e   : > { %v3478_v10 = vpop.f32.mrf.mxu2  ;;  %v3579_v1 = vpop.f32.mrf.mxu3 }
 0x51f   : > { %v3479_v22 = vadd.f32 %v3478_v10, %v3348_v34  ;;  %3748 = vmatmul.f32.gmra.mxu0 %v3747_v28  ;;  %3925 = vmatmul.f32.gmra.mxu1 %v7168_v23  ;;  %v3752_v3 = vsub.f32 %v3595_v33, %v7168_v23 }
 0x521   : > { %v3576_v13 = vadd.f32 %v3575_v29, %v3479_v22  ;;  %4052 = vmatmul.f32.gmra.mxu2 %v3752_v3  ;;  %v3753_v11 = vand.u32 4294901760, %v3752_v3 }
 0x523   : > { %v3596_v5 = vmax.f32 %v3576_v13, 0.0  ;;  %4179 = vmatmul.f32.gmra.mxu3 %v3753_v11  ;;  %v3754_v17 = vsub.f32 %v3752_v3, %v3753_v11 }
 0x525   : > { %v7172_v60 = vand.u32 4294901760, %v3596_v5  ;;  %v3755_v2 = vand.u32 4294901760, %v3754_v17 }
 0x526   : > { %v3482_v50 = vpop.f32.mrf.mxu2 }
 0x527   : > { %v3483_v30 = vadd.f32 %v3482_v50, %v3354_v15  ;;  %3756 = vmatmul.f32.gmra.mxu0 %v3755_v2  ;;  %3929 = vmatmul.f32.gmra.mxu1 %v7172_v60  ;;  %v3760_v42 = vsub.f32 %v3596_v5, %v7172_v60 }
 0x529   : > { %v3580_v20 = vadd.f32 %v3579_v1, %v3483_v30  ;;  %4057 = vmatmul.f32.gmra.mxu2 %v3760_v42  ;;  %v3761_v57 = vand.u32 4294901760, %v3760_v42 }
 0x52b   : > { %v3597_v16 = vmax.f32 %v3580_v20, 0.0  ;;  %4185 = vmatmul.f32.gmra.mxu3 %v3761_v57  ;;  %v3762_v18 = vsub.f32 %v3760_v42, %v3761_v57 }
 0x52d   : > { %v7176_v8 = vand.u32 4294901760, %v3597_v16  ;;  %v3763_v7 = vand.u32 4294901760, %v3762_v18 }
 0x52f   : > { %3764 = vmatmul.f32.gmra.mxu0 %v3763_v7  ;;  %3933 = vmatmul.f32.gmra.mxu1 %v7176_v8  ;;  %v3768_v25 = vsub.f32 %v3597_v16, %v7176_v8 }
 0x531   : > { %4062 = vmatmul.f32.gmra.mxu2 %v3768_v25  ;;  %v3769_v31 = vand.u32 4294901760, %v3768_v25 }
 0x533   : > { %4191 = vmatmul.f32.gmra.mxu3 %v3769_v31  ;;  %v3770_v35 = vsub.f32 %v3768_v25, %v3769_v31 }
 0x534   : > { %v7180_v41 = vpop.f32.mrf.mxu1 }
 0x535   : > { %v3771_v56 = vand.u32 4294901760, %v3770_v35 }
 0x537   : > { %3772 = vmatmul.f32.gmra.mxu0 %v3771_v56  ;;  %4357 = vmatmul.f32.vlgmr.msrb.gmra.mxu1 %v7093_v9 }
 0x53c   : > { %v7183_v63 = vpop.f32.mrf.mxu0  ;;  %v7185_v51 = vpop.f32.mrf.mxu1 }
 0x53d   : > { %v3988_v34 = vpop.f32.mrf.mxu2 }
 0x53f   : > { %4260 = vmatmul.f32.vlgmr.msrb.gmra.mxu0 %v7093_v9  ;;  %4361 = vmatmul.f32.gmra.mxu1 %v7099_v55 }
 0x544   : > { %v7189_v59 = vpop.f32.mrf.mxu0  ;;  %v7191_v45 = vpop.f32.mrf.mxu1 }
 0x545   : > { %v3879_v1 = vadd.f32 %v7185_v51, %v7189_v59 }
 0x547   : > { %4264 = vmatmul.f32.gmra.mxu0 %v7099_v55  ;;  %4365 = vmatmul.f32.gmra.mxu1 %v7104_v38 }
 0x54c   : > { %v7195_v47 = vpop.f32.mrf.mxu0  ;;  %v7197_v54 = vpop.f32.mrf.mxu1 }
 0x54d   : > { %v3883_v25 = vadd.f32 %v7191_v45, %v7195_v47 }
 0x54f   : > { %4268 = vmatmul.f32.gmra.mxu0 %v7104_v38  ;;  %4369 = vmatmul.f32.gmra.mxu1 %v7109_v43 }
 0x554   : > { %v7201_v24 = vpop.f32.mrf.mxu0  ;;  %v7203_v9 = vpop.f32.mrf.mxu1 }
 0x557   : > { %4272 = vmatmul.f32.gmra.mxu0 %v7109_v43  ;;  %4373 = vmatmul.f32.gmra.mxu1 %v7114_v0 }
 0x55c   : > { %v7207_v61 = vpop.f32.mrf.mxu0  ;;  %v7209_v55 = vpop.f32.mrf.mxu1 }
 0x55f   : > { %4276 = vmatmul.f32.gmra.mxu0 %v7114_v0  ;;  %4377 = vmatmul.f32.gmra.mxu1 %v7119_v46 }
 0x564   : > { %v7213_v44 = vpop.f32.mrf.mxu0  ;;  %v7215_v38 = vpop.f32.mrf.mxu1 }
 0x567   : > { %4280 = vmatmul.f32.gmra.mxu0 %v7119_v46  ;;  %4381 = vmatmul.f32.gmra.mxu1 %v7126_v6 }
 0x56c   : > { %v7219_v19 = vpop.f32.mrf.mxu0  ;;  %v7221_v43 = vpop.f32.mrf.mxu1 }
 0x56f   : > { %4284 = vmatmul.f32.gmra.mxu0 %v7126_v6  ;;  %4385 = vmatmul.f32.gmra.mxu1 %v7132_v52 }
 0x574   : > { %v7225_v14 = vpop.f32.mrf.mxu0  ;;  %v3906_v0 = vpop.f32.mrf.mxu1 }
 0x577   : > { %4288 = vmatmul.f32.gmra.mxu0 %v7132_v52  ;;  %4389 = vmatmul.f32.gmra.mxu1 %v7138_v36 }
 0x57c   : > { %v3717_v12 = vpop.f32.mrf.mxu0  ;;  %v3910_v4 = vpop.f32.mrf.mxu1 }
 0x57d   : > { %v7229_v46 = vadd.f32 %v3906_v0, %v3717_v12  ;;  %v3887_v12 = vadd.f32 %v7197_v54, %v7201_v24 }
 0x57f   : > { %4292 = vmatmul.f32.gmra.mxu0 %v7138_v36  ;;  %4393 = vmatmul.f32.gmra.mxu1 %v7144_v32 }
 0x584   : > { %v3725_v26 = vpop.f32.mrf.mxu0  ;;  %v3914_v27 = vpop.f32.mrf.mxu1 }
 0x585   : > { %v7233_v6 = vadd.f32 %v3910_v4, %v3725_v26 }
 0x587   : > { %4296 = vmatmul.f32.gmra.mxu0 %v7144_v32  ;;  %4397 = vmatmul.f32.gmra.mxu1 %v7150_v21  ;;  %v4102_v32 = vpop.f32.mrf.mxu3 }
 0x58c   : > { %v3733_v49 = vpop.f32.mrf.mxu0  ;;  %v3918_v52 = vpop.f32.mrf.mxu1 }
 0x58d   : > { %v7237_v33 = vadd.f32 %v3914_v27, %v3733_v49 }
 0x58f   : > { %4300 = vmatmul.f32.gmra.mxu0 %v7150_v21  ;;  %4401 = vmatmul.f32.gmra.mxu1 %v7156_v48  ;;  %v3993_v21 = vpop.f32.mrf.mxu2  ;;  %v4108_v40 = vpop.f32.mrf.mxu3 }
 0x590   : > { %v3994_v16 = vadd.f32 %v3993_v21, %v3879_v1 }
 0x594   : > { %v3741_v37 = vpop.f32.mrf.mxu0  ;;  %v3922_v36 = vpop.f32.mrf.mxu1 }
 0x595   : > { %v7241_v39 = vadd.f32 %v3918_v52, %v3741_v37  ;;  %v3891_v37 = vadd.f32 %v7203_v9, %v7207_v61 }
 0x597   : > { %4304 = vmatmul.f32.gmra.mxu0 %v7156_v48  ;;  %4405 = vmatmul.f32.gmra.mxu1 %v7162_v62  ;;  %v3998_v48 = vpop.f32.mrf.mxu2  ;;  %v4114_v17 = vpop.f32.mrf.mxu3 }
 0x59c   : > { %v3749_v28 = vpop.f32.mrf.mxu0  ;;  %v3926_v29 = vpop.f32.mrf.mxu1 }
 0x59d   : > { %v7245_v10 = vadd.f32 %v3922_v36, %v3749_v28 }
 0x59f   : > { %4308 = vmatmul.f32.gmra.mxu0 %v7162_v62  ;;  %4409 = vmatmul.f32.gmra.mxu1 %v7168_v23  ;;  %v3875_v62 = vadd.f32 %v7180_v41, %v7183_v63  ;;  %v4003_v2 = vpop.f32.mrf.mxu2  ;;  %v4120_v30 = vpop.f32.mrf.mxu3  ;;  %v3999_v63 = vadd.f32 %v3998_v48, %v3883_v25 }
 0x5a0   : > { %v4004_v52 = vadd.f32 %v4003_v2, %v3887_v12 }
 0x5a1   : > { %v3989_v50 = vadd.f32 %v3988_v34, %v3875_v62  ;;  %v4115_v0 = vadd.f32 %v4114_v17, %v3999_v63  ;;  %v3899_v62 = vadd.f32 %v7215_v38, %v7219_v19 }
 0x5a2   : > { %v4121_v47 = vadd.f32 %v4120_v30, %v4004_v52 }
 0x5a3   : > { %v4103_v42 = vadd.f32 %v4102_v32, %v3989_v50 }
 0x5a4   : > { %v3757_v22 = vpop.f32.mrf.mxu0  ;;  %v3930_v3 = vpop.f32.mrf.mxu1 }
 0x5a5   : > { %v7249_v53 = vadd.f32 %v3926_v29, %v3757_v22  ;;  %v3895_v22 = vadd.f32 %v7209_v55, %v7213_v44 }
 0x5a7   : > { %4312 = vmatmul.f32.gmra.mxu0 %v7168_v23  ;;  %4413 = vmatmul.f32.gmra.mxu1 %v7172_v60  ;;  %v4008_v18 = vpop.f32.mrf.mxu2  ;;  %v4126_v31 = vpop.f32.mrf.mxu3 }
 0x5a8   : > { %v4009_v29 = vadd.f32 %v4008_v18, %v3891_v37 }
 0x5aa   : > { %v4127_v24 = vadd.f32 %v4126_v31, %v4009_v29 }
 0x5ac   : > { %v3765_v13 = vpop.f32.mrf.mxu0  ;;  %v3934_v11 = vpop.f32.mrf.mxu1 }
 0x5ad   : > { %v7253_v5 = vadd.f32 %v3930_v3, %v3765_v13 }
 0x5af   : > { %4316 = vmatmul.f32.gmra.mxu0 %v7172_v60  ;;  %4417 = vmatmul.f32.gmra.mxu1 %v7176_v8  ;;  %v4013_v59 = vpop.f32.mrf.mxu2  ;;  %v4132_v27 = vpop.f32.mrf.mxu3 }
 0x5b4   : > { %v3773_v58 = vpop.f32.mrf.mxu0  ;;  %v4358_v15 = vpop.f32.mrf.mxu1 }
 0x5b5   : > { %v7259_v23 = vadd.f32 %v3934_v11, %v3773_v58  ;;  %v4014_v11 = vadd.f32 %v4013_v59, %v3895_v22 }
 0x5b7   : > { %4320 = vmatmul.f32.gmra.mxu0 %v7176_v8  ;;  %v4109_v8 = vadd.f32 %v4108_v40, %v3994_v16  ;;  %v4018_v36 = vpop.f32.mrf.mxu2  ;;  %v4138_v21 = vpop.f32.mrf.mxu3  ;;  %v4133_v17 = vadd.f32 %v4132_v27, %v4014_v11 }
 0x5b8   : > { %v4019_v50 = vadd.f32 %v4018_v36, %v3899_v62 }
 0x5ba   : > { %v4139_v44 = vadd.f32 %v4138_v21, %v4019_v50 }
 0x5bc   : > { %v4261_v20 = vpop.f32.mrf.mxu0  ;;  %v4362_v60 = vpop.f32.mrf.mxu1 }
 0x5bd   : > { %v4262_v57 = vadd.f32 %v4261_v20, %v4103_v42  ;;  %v3903_v42 = vadd.f32 %v7221_v43, %v7225_v14 }
 0x5bf   : > { %v4359_v7 = vadd.f32 %v4358_v15, %v4262_v57  ;;  %v4023_v48 = vpop.f32.mrf.mxu2  ;;  %v4144_v61 = vpop.f32.mrf.mxu3 }
 0x5c0   : > { %v4024_v16 = vadd.f32 %v4023_v48, %v3903_v42 }
 0x5c1   : > { %4421 = vst [vmem:[%s7269_s3] sm:$0xff] %v4359_v7 }
 0x5c2   : > { %v4145_v19 = vadd.f32 %v4144_v61, %v4024_v16 }
 0x5c4   : > { %v4265_v35 = vpop.f32.mrf.mxu0  ;;  %v4366_v41 = vpop.f32.mrf.mxu1 }
 0x5c5   : > { %v4266_v56 = vadd.f32 %v4265_v35, %v4109_v8 }
 0x5c7   : > { %v4363_v51 = vadd.f32 %v4362_v60, %v4266_v56  ;;  %v4028_v30 = vpop.f32.mrf.mxu2  ;;  %v4150_v1 = vpop.f32.mrf.mxu3 }
 0x5c8   : > { %v4029_v35 = vadd.f32 %v4028_v30, %v7229_v46 }
 0x5c9   : > { %4422 = vst [vmem:[%s7269_s3 + $0x8] sm:$0xff] %v4363_v51 }
 0x5ca   : > { %v4151_v43 = vadd.f32 %v4150_v1, %v4029_v35 }
 0x5cc   : > { %v4269_v4 = vpop.f32.mrf.mxu0  ;;  %v4370_v26 = vpop.f32.mrf.mxu1 }
 0x5cd   : > { %v4270_v49 = vadd.f32 %v4269_v4, %v4115_v0 }
 0x5cf   : > { %v4367_v45 = vadd.f32 %v4366_v41, %v4270_v49  ;;  %v4033_v38 = vpop.f32.mrf.mxu2  ;;  %v4156_v31 = vpop.f32.mrf.mxu3 }
 0x5d0   : > { %v4034_v59 = vadd.f32 %v4033_v38, %v7233_v6 }
 0x5d1   : > { %4423 = vst [vmem:[%s7269_s3 + $0x10] sm:$0xff] %v4367_v45 }
 0x5d2   : > { %v4157_v4 = vadd.f32 %v4156_v31, %v4034_v59 }
 0x5d4   : > { %v4273_v34 = vpop.f32.mrf.mxu0  ;;  %v4374_v32 = vpop.f32.mrf.mxu1 }
 0x5d5   : > { %v4274_v28 = vadd.f32 %v4273_v34, %v4121_v47 }
 0x5d7   : > { %v4371_v54 = vadd.f32 %v4370_v26, %v4274_v28  ;;  %v4038_v14 = vpop.f32.mrf.mxu2  ;;  %v4162_v12 = vpop.f32.mrf.mxu3 }
 0x5d8   : > { %v4039_v46 = vadd.f32 %v4038_v14, %v7237_v33 }
 0x5d9   : > { %4424 = vst [vmem:[%s7269_s3 + $0x18] sm:$0xff] %v4371_v54 }
 0x5da   : > { %v4163_v37 = vadd.f32 %v4162_v12, %v4039_v46 }
 0x5dc   : > { %v4277_v3 = vpop.f32.mrf.mxu0  ;;  %v4378_v40 = vpop.f32.mrf.mxu1 }
 0x5dd   : > { %v4278_v13 = vadd.f32 %v4277_v3, %v4127_v24 }
 0x5df   : > { %v4375_v9 = vadd.f32 %v4374_v32, %v4278_v13  ;;  %v4043_v52 = vpop.f32.mrf.mxu2  ;;  %v4168_v47 = vpop.f32.mrf.mxu3 }
 0x5e0   : > { %v4044_v6 = vadd.f32 %v4043_v52, %v7241_v39 }
 0x5e1   : > { %4425 = vst [vmem:[%s7269_s3 + $0x20] sm:$0xff] %v4375_v9 }
 0x5e2   : > { %v4169_v21 = vadd.f32 %v4168_v47, %v4044_v6 }
 0x5e4   : > { %v4281_v58 = vpop.f32.mrf.mxu0  ;;  %v4382_v15 = vpop.f32.mrf.mxu1 }
 0x5e5   : > { %v4282_v2 = vadd.f32 %v4281_v58, %v4133_v17 }
 0x5e7   : > { %v4379_v55 = vadd.f32 %v4378_v40, %v4282_v2  ;;  %v4048_v29 = vpop.f32.mrf.mxu2  ;;  %v4174_v54 = vpop.f32.mrf.mxu3 }
 0x5e8   : > { %v4049_v33 = vadd.f32 %v4048_v29, %v7245_v10 }
 0x5e9   : > { %4426 = vst [vmem:[%s7269_s3 + $0x28] sm:$0xff] %v4379_v55 }
 0x5ea   : > { %v4175_v13 = vadd.f32 %v4174_v54, %v4049_v33 }
 0x5ec   : > { %v4285_v20 = vpop.f32.mrf.mxu0  ;;  %v4386_v60 = vpop.f32.mrf.mxu1 }
 0x5ed   : > { %v4286_v57 = vadd.f32 %v4285_v20, %v4139_v44 }
 0x5ef   : > { %v4383_v18 = vadd.f32 %v4382_v15, %v4286_v57  ;;  %v4053_v48 = vpop.f32.mrf.mxu2  ;;  %v4180_v61 = vpop.f32.mrf.mxu3 }
 0x5f0   : > { %v4054_v39 = vadd.f32 %v4053_v48, %v7249_v53 }
 0x5f1   : > { %4427 = vst [vmem:[%s7269_s3 + $0x30] sm:$0xff] %v4383_v18 }
 0x5f2   : > { %v4181_v58 = vadd.f32 %v4180_v61, %v4054_v39 }
 0x5f4   : > { %v4289_v7 = vpop.f32.mrf.mxu0  ;;  %v4390_v8 = vpop.f32.mrf.mxu1 }
 0x5f5   : > { %v4290_v25 = vadd.f32 %v4289_v7, %v4145_v19 }
 0x5f7   : > { %v4387_v41 = vadd.f32 %v4386_v60, %v4290_v25  ;;  %v4058_v15 = vpop.f32.mrf.mxu2  ;;  %v4186_v55 = vpop.f32.mrf.mxu3 }
 0x5f8   : > { %v4059_v10 = vadd.f32 %v4058_v15, %v7253_v5 }
 0x5f9   : > { %4428 = vst [vmem:[%s7269_s3 + $0x38] sm:$0xff] %v4387_v41 }
 0x5fa   : > { %v4187_v44 = vadd.f32 %v4186_v55, %v4059_v10 }
 0x5fc   : > { %v4293_v56 = vpop.f32.mrf.mxu0  ;;  %v4394_v63 = vpop.f32.mrf.mxu1 }
 0x5fd   : > { %v4294_v51 = vadd.f32 %v4293_v56, %v4151_v43 }
 0x5ff   : > { %v4391_v0 = vadd.f32 %v4390_v8, %v4294_v51  ;;  %v4063_v60 = vpop.f32.mrf.mxu2  ;;  %v4192_v16 = vpop.f32.mrf.mxu3 }
 0x600   : > { %v4064_v53 = vadd.f32 %v4063_v60, %v7259_v23 }
 0x601   : > { %4429 = vst [vmem:[%s7269_s3 + $0x40] sm:$0xff] %v4391_v0 }
 0x602   : > { %v4193_v18 = vadd.f32 %v4192_v16, %v4064_v53 }
 0x604   : > { %v4297_v26 = vpop.f32.mrf.mxu0  ;;  %v4398_v27 = vpop.f32.mrf.mxu1 }
 0x605   : > { %v4298_v49 = vadd.f32 %v4297_v26, %v4157_v4 }
 0x607   : > { %v4395_v45 = vadd.f32 %v4394_v63, %v4298_v49 }
 0x609   : > { %4430 = vst [vmem:[%s7269_s3 + $0x48] sm:$0xff] %v4395_v45 }
 0x60c   : > { %v4301_v36 = vpop.f32.mrf.mxu0  ;;  %v4402_v32 = vpop.f32.mrf.mxu1 }
 0x60d   : > { %v4302_v34 = vadd.f32 %v4301_v36, %v4163_v37 }
 0x60f   : > { %v4399_v28 = vadd.f32 %v4398_v27, %v4302_v34 }
 0x611   : > { %4431 = vst [vmem:[%s7269_s3 + $0x50] sm:$0xff] %v4399_v28 }
 0x614   : > { %v4305_v24 = vpop.f32.mrf.mxu0  ;;  %v4406_v40 = vpop.f32.mrf.mxu1 }
 0x615   : > { %v4306_v22 = vadd.f32 %v4305_v24, %v4169_v21 }
 0x617   : > { %v4403_v3 = vadd.f32 %v4402_v32, %v4306_v22 }
 0x619   : > { %4432 = vst [vmem:[%s7269_s3 + $0x58] sm:$0xff] %v4403_v3 }
 0x61c   : > { %v4309_v11 = vpop.f32.mrf.mxu0  ;;  %v4410_v62 = vpop.f32.mrf.mxu1 }
 0x61d   : > { %v4310_v9 = vadd.f32 %v4309_v11, %v4175_v13 }
 0x61f   : > { %v4407_v17 = vadd.f32 %v4406_v40, %v4310_v9 }
 0x621   : > { %4433 = vst [vmem:[%s7269_s3 + $0x60] sm:$0xff] %v4407_v17 }
 0x624   : > { %v4313_v2 = vpop.f32.mrf.mxu0  ;;  %v4414_v42 = vpop.f32.mrf.mxu1 }
 0x625   : > { %v4314_v50 = vadd.f32 %v4313_v2, %v4181_v58 }
 0x627   : > { %v4411_v30 = vadd.f32 %v4410_v62, %v4314_v50 }
 0x629   : > { %4434 = vst [vmem:[%s7269_s3 + $0x68] sm:$0xff] %v4411_v30 }
 0x62c   : > { %v4317_v1 = vpop.f32.mrf.mxu0  ;;  %v4418_v7 = vpop.f32.mrf.mxu1 }
 0x62d   : > { %v4318_v20 = vadd.f32 %v4317_v1, %v4187_v44 }
 0x62f   : > { %v4415_v57 = vadd.f32 %v4414_v42, %v4318_v20 }
 0x631   : > { %4435 = vst [vmem:[%s7269_s3 + $0x70] sm:$0xff] %v4415_v57 }
 0x634   : > { %v4321_v38 = vpop.f32.mrf.mxu0 }
 0x635   : > { %v4322_v19 = vadd.f32 %v4321_v38, %v4193_v18 }
 0x637   : > { %v4419_v8 = vadd.f32 %v4418_v7, %v4322_v19 }
 0x639   : > { %4436 = vst [vmem:[%s7269_s3 + $0x78] sm:$0xff] %v4419_v8 }
 0x63a PF: > { %s12_s9 = sadd.s32 1, %s4663_s9  }
 0x63b   : > { %p9_p4 = scmp.ge.s32.totalorder %s12_s9, 6  }
 0x63d   :  { %11 = sbr.rel (!%p9_p4) target bundleno = 1 (0x1), region = 62 }

</bundles_post_ra>
